<compile_context>
chip_gen: v6e
topology: v6e:2x2x1
jax: 0.10.0
libtpu: 0.0.40
codegen_flags: <defaults>
</compile_context>

<pallas_src>
import functools
import math

import jax
import jax.numpy as jnp
from jax import lax
from jax.experimental import pallas as pl
from jax.experimental.pallas import tpu as pltpu


def _round_up(x, m):
    return ((x + m - 1) // m) * m


# ----------------------------------------------------------------------------
# Fused kernel: embedding gather + both nets (grid axis 0) + all MLP layers.
# ----------------------------------------------------------------------------
def _encoder_kernel(*refs, num_layers):
    # refs = (u_idx, i_idx,                  # SMEM scalar prefetch
    #         user_tbl, item_tbl,            # HBM (pl.ANY)
    #         w_0 .. w_{L-1}, bias_packed,   # VMEM, resident across batch tiles
    #         out,                           # VMEM output tile
    #         x_buf, copy_sem)               # scratch
    u_idx_ref, i_idx_ref = refs[0], refs[1]
    user_tbl_ref, item_tbl_ref = refs[2], refs[3]
    w_refs = refs[4:4 + num_layers]
    bias_ref = refs[4 + num_layers]
    out_ref = refs[5 + num_layers]
    x_buf = refs[6 + num_layers]
    copy_sem = refs[7 + num_layers]

    n = pl.program_id(0)          # 0 = user net, 1 = item net
    t = pl.program_id(1)          # batch tile
    tm = x_buf.shape[0]
    base = t * tm

    # --- fused row gather: tm rows of the selected embedding table -> x_buf ---
    def issue_rows(tbl_ref, idx_ref):
        def body(r, carry):
            row = idx_ref[base + r]
            pltpu.make_async_copy(tbl_ref.at[pl.ds(row, 1), :],
                                  x_buf.at[pl.ds(r, 1), :],
                                  copy_sem).start()
            return carry
        lax.fori_loop(0, tm, body, 0)

    @pl.when(n == 0)
    def _():
        issue_rows(user_tbl_ref, u_idx_ref)

    @pl.when(n == 1)
    def _():
        issue_rows(item_tbl_ref, i_idx_ref)

    # Wait for all tm row copies (the wait descriptor only needs shape + sem).
    def wait_body(r, carry):
        pltpu.make_async_copy(user_tbl_ref.at[pl.ds(0, 1), :],
                              x_buf.at[pl.ds(r, 1), :],
                              copy_sem).wait()
        return carry
    lax.fori_loop(0, tm, wait_body, 0)

    # --- MLP chain: intermediates never touch HBM ---
    x = x_buf[...]                                        # [tm, d0] f32
    off = 0
    for l in range(num_layers):
        w = w_refs[l][...]                                # [din, dout] bf16
        dout = w.shape[-1]
        b = bias_ref[:, off:off + dout]                   # [1, dout]  f32
        off += dout
        if l < num_layers - 1:
            y = jnp.dot(x.astype(w.dtype), w,
                        preferred_element_type=jnp.float32) + b
            x = jnp.maximum(y, 0.0)                       # ReLU
        else:
            # Final layer: keep LHS in f32 (accuracy); matmul is tiny (dout=128).
            y = jnp.dot(x, w.astype(jnp.float32),
                        preferred_element_type=jnp.float32) + b
            x = jnp.tanh(y)
    out_ref[...] = x.astype(out_ref.dtype)


# ----------------------------------------------------------------------------
# Wrapper: one pallas_call for gather + user_net + item_net.
# ----------------------------------------------------------------------------
def fused_encoder_forward(u_idx, i_idx, user_tbl, item_tbl, mlp_w, mlp_b,
                          max_batch_tile=256):
    """user_net(user_tbl[u_idx]) and item_net(item_tbl[i_idx]) in one kernel.

    mlp_w[l]: [2, Din_l, Dout_l] bf16   (index 0 = user net, 1 = item net)
    mlp_b[l]: [2, 1,     Dout_l] f32
    """
    B = u_idx.shape[0]
    d0 = user_tbl.shape[1]
    num_layers = len(mlp_w)
    d_final = mlp_w[-1].shape[-1]

    # bf16 LHS packs two rows per sublane -> pad batch to a multiple of 16.
    bp = max(16, _round_up(B, 16))
    tm = min(max_batch_tile, bp)            # rows per batch tile (MXU feed)
    bp = _round_up(bp, tm)
    nbt = bp // tm
    pad = bp - B

    u_pad = jnp.pad(u_idx.astype(jnp.int32), (0, pad))
    i_pad = jnp.pad(i_idx.astype(jnp.int32), (0, pad))

    # One packed bias input instead of n_layers tiny DMAs.
    bias_packed = jnp.concatenate(mlp_b, axis=-1)         # [2, 1, sum(dout)]

    in_specs = [
        pl.BlockSpec(memory_space=pl.ANY),                # user table (HBM)
        pl.BlockSpec(memory_space=pl.ANY),                # item table (HBM)
    ]
    for w in mlp_w:
        _, din, dout = w.shape
        # index_map ignores the batch-tile axis -> weight block stays resident
        # in VMEM across every batch tile of one net (fetched once per net).
        in_specs.append(pl.BlockSpec((None, din, dout),
                                     lambda nn, tt, *_: (nn, 0, 0)))
    in_specs.append(pl.BlockSpec((None, 1, bias_packed.shape[-1]),
                                 lambda nn, tt, *_: (nn, 0, 0)))

    out_spec = pl.BlockSpec((None, tm, d_final), lambda nn, tt, *_: (nn, tt, 0))

    grid_spec = pltpu.PrefetchScalarGridSpec(
        num_scalar_prefetch=2,              # u / i land in SMEM before the grid
        grid=(2, nbt),                      # (net, batch tile)
        in_specs=in_specs,
        out_specs=out_spec,
        scratch_shapes=[
            pltpu.VMEM((tm, d0), jnp.float32),            # gathered input tile
            pltpu.SemaphoreType.DMA(()),                  # row-gather semaphore
        ],
    )

    out = pl.pallas_call(
        functools.partial(_encoder_kernel, num_layers=num_layers),
        out_shape=jax.ShapeDtypeStruct((2, bp, d_final), jnp.float32),
        grid_spec=grid_spec,
        compiler_params=pltpu.CompilerParams(
            dimension_semantics=("parallel", "arbitrary")),
    )(u_pad, i_pad, user_tbl, item_tbl, *mlp_w, bias_packed)

    # Padded rows (gathered row 0) produce bounded garbage; sliced off here.
    return out[0, :B], out[1, :B]


# ----------------------------------------------------------------------------
# Parameters (deterministic synthetic init mirroring DNNEncoder.build_mlp)
# ----------------------------------------------------------------------------
def xavier_uniform(key, shape, dtype=jnp.float32):
    fan_in, fan_out = shape[-2], shape[-1]
    bound = math.sqrt(6.0 / (fan_in + fan_out))
    return jax.random.uniform(key, shape, dtype, minval=-bound, maxval=bound)


def make_encoder_params(key, user_num, item_num, emb_size, n_layers,
                        hidden_dim=1024, out_final=128):
    k_u, k_i, k_net = jax.random.split(key, 3)
    mlp_w, mlp_b = [], []
    din = emb_size
    for l in range(n_layers):
        dout = hidden_dim if l < n_layers - 1 else out_final
        k_net, kw, kb = jax.random.split(k_net, 3)
        # Stacked [user, item] weights; bf16 storage halves the dominant DMA.
        w = xavier_uniform(kw, (2, din, dout)).astype(jnp.bfloat16)
        b = jax.random.uniform(kb, (2, 1, dout), jnp.float32,
                               minval=-0.01, maxval=0.01)
        mlp_w.append(w)
        mlp_b.append(b)
        din = dout
    return {
        "initial_user": xavier_uniform(k_u, (user_num, emb_size)),
        "initial_item": xavier_uniform(k_i, (item_num, emb_size)),
        "mlp_w": mlp_w,
        "mlp_b": mlp_b,
    }


@functools.partial(jax.jit, static_argnames=("max_batch_tile",))
def dnn_encoder_forward(params, u, i, max_batch_tile=256):
    """Equivalent of DNNEncoder.forward(u, i) (gather fused into the kernel)."""
    return fused_encoder_forward(u, i,
                                 params["initial_user"], params["initial_item"],
                                 params["mlp_w"], params["mlp_b"],
                                 max_batch_tile=max_batch_tile)


if __name__ == "__main__":
    user_num, item_num = 50, 60
    emb_size = 32
    n_layers = 3   # Linear(32,1024)+ReLU, Linear(1024,1024)+ReLU, Linear(1024,128)+Tanh

    key = jax.random.PRNGKey(0)
    k_params, k_u, k_i, k_u2, k_i2 = jax.random.split(key, 5)
    params = make_encoder_params(k_params, user_num, item_num, emb_size, n_layers)

    # Plain-JAX f32 reference (weights are the exact bf16 values promoted to f32).
    def ref_mlp(x, net_idx):
        nl = len(params["mlp_w"])
        for l in range(nl):
            w = params["mlp_w"][l][net_idx].astype(jnp.float32)
            b = params["mlp_b"][l][net_idx].reshape(-1)
            x = jnp.dot(x, w, precision=lax.Precision.HIGHEST) + b
            x = jnp.maximum(x, 0.0) if l < nl - 1 else jnp.tanh(x)
        return x

    def check(batch, max_batch_tile, k_uu, k_ii):
        u = jax.random.randint(k_uu, (batch,), 0, user_num, dtype=jnp.int32)
        i = jax.random.randint(k_ii, (batch,), 0, item_num, dtype=jnp.int32)
        user_out, item_out = dnn_encoder_forward(params, u, i,
                                                 max_batch_tile=max_batch_tile)
        jax.block_until_ready((user_out, item_out))
        assert user_out.shape == (batch, 128)
        assert item_out.shape == (batch, 128)
        ref_user = ref_mlp(params["initial_user"][u], 0)
        ref_item = ref_mlp(params["initial_item"][i], 1)
        # bf16 hidden-layer LHS (f32 accumulation) -> loosened tolerance.
        assert jnp.allclose(user_out, ref_user, atol=2e-2, rtol=2e-2), \
            float(jnp.max(jnp.abs(user_out - ref_user)))
        assert jnp.allclose(item_out, ref_item, atol=2e-2, rtol=2e-2), \
            float(jnp.max(jnp.abs(item_out - ref_item)))

    # Small batch: pads 6 -> 16, single batch tile.
    check(6, 256, k_u, k_i)
    # Larger batch with a small tile cap: exercises the multi-batch-tile path
    # (grid = (2, 3)) where weights stay VMEM-resident across tiles.
    check(40, 16, k_u2, k_i2)

    print("KERNEL_OK")
</pallas_src>

<mosaic_0001>
module attributes {stable_mosaic.version = 11 : i64} {
  func.func @_encoder_kernel(%arg0: i32, %arg1: i32, %arg2: memref<16xi32, #tpu.memory_space<smem>>, %arg3: memref<16xi32, #tpu.memory_space<smem>>, %arg4: memref<50x32xf32, #tpu.memory_space<any>>, %arg5: memref<60x32xf32, #tpu.memory_space<any>>, %arg6: memref<1x32x1024xbf16, #tpu.memory_space<vmem>>, %arg7: memref<1x1024x1024xbf16, #tpu.memory_space<vmem>>, %arg8: memref<1x1024x128xbf16, #tpu.memory_space<vmem>>, %arg9: memref<1x1x2176xf32, #tpu.memory_space<vmem>>, %arg10: memref<1x16x128xf32, #tpu.memory_space<vmem>>, %arg11: memref<16x32xf32, #tpu.memory_space<vmem>>, %arg12: memref<!tpu.dma_semaphore, #tpu.memory_space<semaphore_mem>>) attributes {dimension_semantics = [#tpu.dimension_semantics<parallel>, #tpu.dimension_semantics<arbitrary>], iteration_bounds = array<i64: 2, 1>, scalar_prefetch = 2 : i64, scratch_operands = 2 : i64, tpu.core_type = #tpu.core_type<tc>, window_params = [{}, {}, {transform_indices = @transform_2, window_bounds = array<i64: 1, 32, 1024>}, {transform_indices = @transform_3, window_bounds = array<i64: 1, 1024, 1024>}, {transform_indices = @transform_4, window_bounds = array<i64: 1, 1024, 128>}, {transform_indices = @transform_5, window_bounds = array<i64: 1, 1, 2176>}, {transform_indices = @transform_6, window_bounds = array<i64: 1, 16, 128>}]} {
    %c16_i32 = arith.constant 16 : i32
    %0 = arith.muli %arg1, %c16_i32 : i32
    %c0_i32 = arith.constant 0 : i32
    %1 = arith.cmpi eq, %arg0, %c0_i32 : i32
    %2 = arith.extui %1 : i1 to i32
    %c0_i32_0 = arith.constant 0 : i32
    %3 = arith.cmpi ne, %2, %c0_i32_0 : i32
    scf.if %3 {
      %c0_i32_30 = arith.constant 0 : i32
      %c16_i32_31 = arith.constant 16 : i32
      %41 = arith.addi %c0_i32_30, %c16_i32_31 : i32
      %c1_i32_32 = arith.constant 1 : i32
      scf.for %arg13 = %c0_i32_30 to %41 step %c1_i32_32  : i32 {
        %42 = arith.addi %0, %arg13 : i32
        %43 = arith.index_cast %42 : i32 to index
        %44 = memref.load %arg2[%43] : memref<16xi32, #tpu.memory_space<smem>>
        %c0_i32_34 = arith.constant 0 : i32
        %45 = tpu.memref_slice %arg4[%44, %c0_i32_34] : memref<50x32xf32, #tpu.memory_space<any>> -> memref<1x32xf32, #tpu.memory_space<any>>
        %c0_i32_35 = arith.constant 0 : i32
        %46 = tpu.memref_slice %arg11[%arg13, %c0_i32_35] : memref<16x32xf32, #tpu.memory_space<vmem>> -> memref<1x32xf32, #tpu.memory_space<vmem>>
        tpu.enqueue_dma source(%45 : memref<1x32xf32, #tpu.memory_space<any>>) target(%46 : memref<1x32xf32, #tpu.memory_space<vmem>>) target_semaphore(%arg12 : memref<!tpu.dma_semaphore, #tpu.memory_space<semaphore_mem>>)
      }
      %c16_i32_33 = arith.constant 16 : i32
    } else {
    }
    %c1_i32 = arith.constant 1 : i32
    %4 = arith.cmpi eq, %arg0, %c1_i32 : i32
    %5 = arith.extui %4 : i1 to i32
    %c0_i32_1 = arith.constant 0 : i32
    %6 = arith.cmpi ne, %5, %c0_i32_1 : i32
    scf.if %6 {
      %c0_i32_30 = arith.constant 0 : i32
      %c16_i32_31 = arith.constant 16 : i32
      %41 = arith.addi %c0_i32_30, %c16_i32_31 : i32
      %c1_i32_32 = arith.constant 1 : i32
      scf.for %arg13 = %c0_i32_30 to %41 step %c1_i32_32  : i32 {
        %42 = arith.addi %0, %arg13 : i32
        %43 = arith.index_cast %42 : i32 to index
        %44 = memref.load %arg3[%43] : memref<16xi32, #tpu.memory_space<smem>>
        %c0_i32_34 = arith.constant 0 : i32
        %45 = tpu.memref_slice %arg5[%44, %c0_i32_34] : memref<60x32xf32, #tpu.memory_space<any>> -> memref<1x32xf32, #tpu.memory_space<any>>
        %c0_i32_35 = arith.constant 0 : i32
        %46 = tpu.memref_slice %arg11[%arg13, %c0_i32_35] : memref<16x32xf32, #tpu.memory_space<vmem>> -> memref<1x32xf32, #tpu.memory_space<vmem>>
        tpu.enqueue_dma source(%45 : memref<1x32xf32, #tpu.memory_space<any>>) target(%46 : memref<1x32xf32, #tpu.memory_space<vmem>>) target_semaphore(%arg12 : memref<!tpu.dma_semaphore, #tpu.memory_space<semaphore_mem>>)
      }
      %c16_i32_33 = arith.constant 16 : i32
    } else {
    }
    %c0_i32_2 = arith.constant 0 : i32
    %c16_i32_3 = arith.constant 16 : i32
    %7 = arith.addi %c0_i32_2, %c16_i32_3 : i32
    %c1_i32_4 = arith.constant 1 : i32
    scf.for %arg13 = %c0_i32_2 to %7 step %c1_i32_4  : i32 {
      %c0_i32_30 = arith.constant 0 : i32
      %c0_i32_31 = arith.constant 0 : i32
      %41 = tpu.memref_slice %arg4[%c0_i32_30, %c0_i32_31] : memref<50x32xf32, #tpu.memory_space<any>> -> memref<1x32xf32, #tpu.memory_space<any>>
      %c0_i32_32 = arith.constant 0 : i32
      %42 = tpu.memref_slice %arg11[%arg13, %c0_i32_32] : memref<16x32xf32, #tpu.memory_space<vmem>> -> memref<1x32xf32, #tpu.memory_space<vmem>>
      tpu.wait_dma2 semaphore(%arg12 : memref<!tpu.dma_semaphore, #tpu.memory_space<semaphore_mem>>) src(%41 : memref<1x32xf32, #tpu.memory_space<any>>) dst(%42 : memref<1x32xf32, #tpu.memory_space<vmem>>)
    }
    %c16_i32_5 = arith.constant 16 : i32
    %c0 = arith.constant 0 : index
    %c0_6 = arith.constant 0 : index
    %8 = vector.load %arg11[%c0, %c0_6] : memref<16x32xf32, #tpu.memory_space<vmem>>, vector<16x32xf32>
    %c0_7 = arith.constant 0 : index
    %c0_8 = arith.constant 0 : index
    %c0_9 = arith.constant 0 : index
    %9 = vector.load %arg6[%c0_7, %c0_8, %c0_9] : memref<1x32x1024xbf16, #tpu.memory_space<vmem>>, vector<1x32x1024xbf16>
    %10 = vector.shape_cast %9 : vector<1x32x1024xbf16> to vector<32x1024xbf16>
    %c0_10 = arith.constant 0 : index
    %c0_11 = arith.constant 0 : index
    %c0_12 = arith.constant 0 : index
    %11 = vector.load %arg9[%c0_10, %c0_11, %c0_12] : memref<1x1x2176xf32, #tpu.memory_space<vmem>>, vector<1x1x1024xf32>
    %12 = vector.shape_cast %11 : vector<1x1x1024xf32> to vector<1x1024xf32>
    %13 = arith.truncf %8 : vector<16x32xf32> to vector<16x32xbf16>
    %cst = arith.constant dense<0.000000e+00> : vector<16x1024xf32>
    %14 = tpu.matmul %13, %10, %cst {dimension_numbers = #tpu.dot_dimension_numbers<[1], [0], [0], [1], [0, 0, 1, 1], [], []>} : vector<16x32xbf16>, vector<32x1024xbf16>, vector<16x1024xf32> -> vector<16x1024xf32>
    %15 = vector.broadcast %12 : vector<1x1024xf32> to vector<16x1024xf32>
    %16 = arith.addf %14, %15 : vector<16x1024xf32>
    %cst_13 = arith.constant 0.000000e+00 : f32
    %17 = vector.broadcast %cst_13 : f32 to vector<16x1024xf32>
    %18 = arith.maximumf %16, %17 : vector<16x1024xf32>
    %c0_14 = arith.constant 0 : index
    %c0_15 = arith.constant 0 : index
    %c0_16 = arith.constant 0 : index
    %19 = vector.load %arg7[%c0_14, %c0_15, %c0_16] : memref<1x1024x1024xbf16, #tpu.memory_space<vmem>>, vector<1x1024x1024xbf16>
    %20 = vector.shape_cast %19 : vector<1x1024x1024xbf16> to vector<1024x1024xbf16>
    %c0_17 = arith.constant 0 : index
    %c0_18 = arith.constant 0 : index
    %c1024 = arith.constant 1024 : index
    %21 = vector.load %arg9[%c0_17, %c0_18, %c1024] : memref<1x1x2176xf32, #tpu.memory_space<vmem>>, vector<1x1x1024xf32>
    %22 = vector.shape_cast %21 : vector<1x1x1024xf32> to vector<1x1024xf32>
    %23 = arith.truncf %18 : vector<16x1024xf32> to vector<16x1024xbf16>
    %cst_19 = arith.constant dense<0.000000e+00> : vector<16x1024xf32>
    %24 = tpu.matmul %23, %20, %cst_19 {dimension_numbers = #tpu.dot_dimension_numbers<[1], [0], [0], [1], [0, 0, 1, 1], [], []>} : vector<16x1024xbf16>, vector<1024x1024xbf16>, vector<16x1024xf32> -> vector<16x1024xf32>
    %25 = vector.broadcast %22 : vector<1x1024xf32> to vector<16x1024xf32>
    %26 = arith.addf %24, %25 : vector<16x1024xf32>
    %cst_20 = arith.constant 0.000000e+00 : f32
    %27 = vector.broadcast %cst_20 : f32 to vector<16x1024xf32>
    %28 = arith.maximumf %26, %27 : vector<16x1024xf32>
    %c0_21 = arith.constant 0 : index
    %c0_22 = arith.constant 0 : index
    %c0_23 = arith.constant 0 : index
    %29 = vector.load %arg8[%c0_21, %c0_22, %c0_23] : memref<1x1024x128xbf16, #tpu.memory_space<vmem>>, vector<1x1024x128xbf16>
    %30 = vector.shape_cast %29 : vector<1x1024x128xbf16> to vector<1024x128xbf16>
    %c0_24 = arith.constant 0 : index
    %c0_25 = arith.constant 0 : index
    %c2048 = arith.constant 2048 : index
    %31 = vector.load %arg9[%c0_24, %c0_25, %c2048] : memref<1x1x2176xf32, #tpu.memory_space<vmem>>, vector<1x1x128xf32>
    %32 = vector.shape_cast %31 : vector<1x1x128xf32> to vector<1x128xf32>
    %33 = arith.extf %30 : vector<1024x128xbf16> to vector<1024x128xf32>
    %cst_26 = arith.constant dense<0.000000e+00> : vector<16x128xf32>
    %34 = tpu.matmul %28, %33, %cst_26 {dimension_numbers = #tpu.dot_dimension_numbers<[1], [0], [0], [1], [0, 0, 1, 1], [], []>} : vector<16x1024xf32>, vector<1024x128xf32>, vector<16x128xf32> -> vector<16x128xf32>
    %35 = vector.broadcast %32 : vector<1x128xf32> to vector<16x128xf32>
    %36 = arith.addf %34, %35 : vector<16x128xf32>
    %37 = math.tanh %36 : vector<16x128xf32>
    %c0_27 = arith.constant 0 : index
    %c0_28 = arith.constant 0 : index
    %c0_29 = arith.constant 0 : index
    %38 = vector.load %arg10[%c0_27, %c0_28, %c0_29] : memref<1x16x128xf32, #tpu.memory_space<vmem>>, vector<1x16x128xf32>
    %39 = vector.shape_cast %38 : vector<1x16x128xf32> to vector<16x128xf32>
    %40 = vector.shape_cast %37 : vector<16x128xf32> to vector<1x16x128xf32>
    tpu.vector_store %arg10[%c0_27, %c0_28, %c0_29], %40 {strides = array<i32>} : memref<1x16x128xf32, #tpu.memory_space<vmem>>, vector<1x16x128xf32>,
    return
  }
  func.func @transform_2(%arg0: i32, %arg1: i32, %arg2: memref<16xi32, #tpu.memory_space<smem>>, %arg3: memref<16xi32, #tpu.memory_space<smem>>) -> (i32, i32, i32) {
    %c0_i32 = arith.constant 0 : i32
    %c0_i32_0 = arith.constant 0 : i32
    %c0_i32_1 = arith.constant 0 : i32
    return %arg0, %c0_i32, %c0_i32_0 : i32, i32, i32
  }
  func.func @transform_3(%arg0: i32, %arg1: i32, %arg2: memref<16xi32, #tpu.memory_space<smem>>, %arg3: memref<16xi32, #tpu.memory_space<smem>>) -> (i32, i32, i32) {
    %c0_i32 = arith.constant 0 : i32
    %c0_i32_0 = arith.constant 0 : i32
    %c0_i32_1 = arith.constant 0 : i32
    return %arg0, %c0_i32, %c0_i32_0 : i32, i32, i32
  }
  func.func @transform_4(%arg0: i32, %arg1: i32, %arg2: memref<16xi32, #tpu.memory_space<smem>>, %arg3: memref<16xi32, #tpu.memory_space<smem>>) -> (i32, i32, i32) {
    %c0_i32 = arith.constant 0 : i32
    %c0_i32_0 = arith.constant 0 : i32
    %c0_i32_1 = arith.constant 0 : i32
    return %arg0, %c0_i32, %c0_i32_0 : i32, i32, i32
  }
  func.func @transform_5(%arg0: i32, %arg1: i32, %arg2: memref<16xi32, #tpu.memory_space<smem>>, %arg3: memref<16xi32, #tpu.memory_space<smem>>) -> (i32, i32, i32) {
    %c0_i32 = arith.constant 0 : i32
    %c0_i32_0 = arith.constant 0 : i32
    %c0_i32_1 = arith.constant 0 : i32
    return %arg0, %c0_i32, %c0_i32_0 : i32, i32, i32
  }
  func.func @transform_6(%arg0: i32, %arg1: i32, %arg2: memref<16xi32, #tpu.memory_space<smem>>, %arg3: memref<16xi32, #tpu.memory_space<smem>>) -> (i32, i32, i32) {
    %c0_i32 = arith.constant 0 : i32
    %c0_i32_0 = arith.constant 0 : i32
    return %arg0, %arg1, %c0_i32 : i32, i32, i32
  }
}

</mosaic_0001>

<bundles_post_ra>
// kernel: dnn_encoder_forward.1
= control target key start
LH: loop header
LB: loop body
LE: loop exit
PB: predicated region body
PF: predicated region fallthrough
CT: control target
= control target key end

     0   :  { %s7785_s0 = inlined_call_operand.vmem [shape: s32[16], index: 0, kind: input, shape index: {}]   ;;  %s7786_s2 = inlined_call_operand.vmem [shape: f32[50,32], index: 2, kind: input, shape index: {}]   ;;  %s7787_s3 = inlined_call_operand.vmem [shape: f32[60,32], index: 3, kind: input, shape index: {}]   ;;  %s7788_s4 = inlined_call_operand.hbm [shape: bf16[2,32,1024], index: 4, kind: input, shape index: {}]   ;;  %s7789_s5 = inlined_call_operand.hbm [shape: bf16[2,1024,1024], index: 5, kind: input, shape index: {}]   ;;  %s7790_s6 = inlined_call_operand.hbm [shape: bf16[2,1024,128], index: 6, kind: input, shape index: {}]   ;;  %s7791_s7 = inlined_call_operand.vmem [shape: f32[2,1,2176], index: 7, kind: input, shape index: {}]   ;;  %s7792_s8 = inlined_call_operand.vmem [shape: f32[2,16,128], index: 8, kind: output, shape index: {}]   ;;  %s7793_s1 = inlined_call_operand.vmem [shape: s32[16], index: 1, kind: input, shape index: {}]  }
   0x1   :  { %7797 = sst [smem:[#allocation19_spill]] %s7788_s4  ;;  %s13_s29 = sshll.u32 %s7785_s0, 4  ;;  %s14_s29 = int_to_ptr.vmem [resolvable:$true] %s13_s29 }
   0x2   :  { %7798 = sst [smem:[#allocation20_spill]] %s7789_s5  ;;  %s17_s10 = sshll.u32 %s7793_s1, 4  ;;  %s18_s10 = int_to_ptr.vmem [resolvable:$true] %s17_s10 }
   0x3   :  { %s6531_s11 = scalar_lea.vmem %s14_s29, 16  ;;  %p6536_p1 = scmp.lt.s32.totalorder %s14_s29, %s14_s29 }
   0x4   :  { %p6532_p0 = scmp.ne.s32.totalorder %s14_s29, %s6531_s11  ;;  %p6537_p2 = scmp.lt.s32.totalorder %s6531_s11, %s6531_s11 }
   0x6   :  { %p6538_p3 = por %p6537_p2, %p6536_p1 }
   0x8   :  { %p6539_p4 = pnand %p6538_p3, %p6532_p0 }
   0xa   :  { %6542 = shalt.err (!%p6539_p4)  }
   0xb   :  { %s6723_s12 = smov [#allocation5]   ;;  %s6543_s13 = scalar_lea.vmem %s18_s10, 16 }
   0xc   :  { %16 = dma.vmem_to_smem %s14_s29, 16, %s6723_s12, [#allocation4] }
   0xd   :  { %p6544_p5 = scmp.ne.s32.totalorder %s18_s10, %s6543_s13  ;;  %p6548_p6 = scmp.lt.s32.totalorder %s18_s10, %s18_s10 }
   0xe   :  { %p6549_p7 = scmp.lt.s32.totalorder %s6543_s13, %s6543_s13 }
  0x10   :  { %p6550_p8 = por %p6549_p7, %p6548_p6 }
  0x12   :  { %p6551_p9 = pnand %p6550_p8, %p6544_p5 }
  0x14   :  { %6554 = shalt.err (!%p6551_p9)  }
  0x15   :  { %s6724_s0 = smov [#allocation6]  }
  0x16   :  { %20 = dma.vmem_to_smem %s18_s10, 16, %s6724_s0, [#allocation4] }
  0x17   :  { %6675 = dma.done.wait [#allocation4], 32 }
  0x18   :  { %6676 = vsyncadd [#allocation4], 4294967264 }
  0x19   :  { %22 = sfence }
  0x1a   :  { %23 = vsyncpa [#allocation8], 0 }
  0x1b   :  { %25 = vsyncpa [#allocation8 + $0x1], 0 }
  0x1c   :  { %26 = vsyncpa [#allocation10], 0 }
  0x1d   :  { %28 = vsyncpa [#allocation10 + $0x1], 0  ;;  %s6784_s1 = smov 0   ;;  %s6786_s14 = smov 0  }
  0x1e   :  { %s6788_s15 = smov 0   ;;  %s6790_s16 = smov 0  }
  0x1f   :  { %s6792_s17 = smov 0   ;;  %s6794_s18 = smov 0  }
  0x20 LB: > { %s7794_s19 = sadd.s32 4294967295, %s6709_s18   ;;  %s46_s20 = sadd.s32 1, %s6705_s17  ;;  %s6709_s18 = sphi %s6794_s18, %s34_s18   ;;  %s6705_s17 = sphi %s6792_s17, %s7812_s17   ;;  %s6701_s16 = sphi %s6790_s16, %s7811_s16   ;;  %s6697_s15 = sphi %s6788_s15, %s7810_s15   ;;  %s6693_s14 = sphi %s6786_s14, %s7809_s14   ;;  %s6689_s1 = sphi %s6784_s1, %s7808_s1  }
  0x21   : > { %p48_p10 = scmp.ge.s32.totalorder %s46_s20, 2  ;;  %s53_s21 = sadd.s32 1, %s6697_s15 }
  0x22   : > { %p60_p11 = scmp.ne.s32.totalorder %s6697_s15, %s6693_s14  ;;  %p61_p12 = scmp.eq.s32.totalorder %s6709_s18, 0 }
  0x23   : > { %s7814_s20 = smov (%p48_p10, %s46_s20), 0  ;;  %p66_p0 = scmp.ne.s32.totalorder %s6693_s14, %s6689_s1 }
  0x24   : > { %7799 = sst [smem:[#allocation18_spill]] %s7814_s20  ;;  %p62_p13 = por %p61_p12, %p60_p11 }
  0x25   : > { %s50_s22 = ssub.s32 %s6705_s17, %s7814_s20  ;;  %p67_p1 = scmp.eq.s32.totalorder %s7794_s19, 0 }
  0x26   : > { %p51_p2 = scmp.eq.s32.totalorder %s50_s22, 0  ;;  %p6447_p4 = scmp.lt.s32.totalorder %s6709_s18, 2 }
  0x27   : > { %p6825_p3 = por %p67_p1, %p66_p0  ;;  %s6834_s25 = sand.u32 1, %s6697_s15  }
  0x28   : > { %s6831_s24 = scalar_select %p51_p2, %s6697_s15, %s53_s21  }
  0x29   : > { %p6836_p5 = pnand %p6447_p4, %p62_p13  ;;  %s217_s27 = sand.u32 1, %s6709_s18  }
  0x2a   : > { %s5405_s28 = sshll.u32 %s6834_s25, 12  ;;  %s5956_s29 = sshll.u32 %s6705_s17, 16 }
  0x2b   : > { %s7802_s5 = sld [smem:[#allocation20_spill]]  ;;  %s221_s11 = scalar_lea.vmem [#allocation9], %s5405_s28 }
  0x2c   : > { %s228_s12 = sshll.u32 %s221_s11, 4  ;;  %p5411_p6 = scmp.ge.s32.totalorder %s6709_s18, 1  ;;  %s229_s12 = int_to_ptr.vmem [resolvable:$true] %s228_s12 }
  0x2d   : > { %s6847_s13 = scalar_lea.sflag [#allocation10], %s217_s27  ;;  %p6557_p7 = pneg %p6836_p5 }
  0x2e   : > { %s6568_s0 = scalar_lea.vmem %s229_s12, 65536  ;;  %s6725_s1 = smov [#allocation9]  }
  0x2f   : > { %p6569_p8 = scmp.ne.s32.totalorder %s229_s12, %s6568_s0  ;;  %s6573_s21 = sshll.u32 %s6725_s1, 4  ;;  %s6574_s21 = int_to_ptr.vmem [resolvable:$false] %s6573_s21 }
  0x30   : > { %s6575_s22 = scalar_lea.vmem %s6574_s21, 131072  ;;  %p6576_p11 = scmp.lt.s32.totalorder %s229_s12, %s6574_s21 }
  0x31   : > { %s227_s10 = scalar_lea.hbm %s7802_s5, %s5956_s29  ;;  %p6571_p9 = pnand %p6569_p8, %p6557_p7 }
  0x32   : > { %p6577_p12 = scmp.lt.s32.totalorder %s6575_s22, %s6568_s0 }
  0x33   : > { %p6572_p10 = pneg %p6571_p9 }
  0x34   : > { %p6578_p13 = por %p6577_p12, %p6576_p11 }
  0x36   : > { %p6579_p0 = pnand %p6578_p13, %p6572_p10 }
  0x38   : > { %6582 = shalt.err (!%p6579_p0)
}
  0x39   : > { %s7796_s28 = smov 512   ;;  %s6727_s27 = smov 32  }
  0x3a   : > { %6443 = dma.hbm_to_vmem [thread:$0]  (!%p6836_p5), %s227_s10, 65536, %s229_s12, %s6847_s13, %s7796_s28, %s7796_s28, %s6727_s27  }
  0x3b   : > { %p264_p1 = scmp.lt.s32.totalorder %s6709_s18, 3  ;;  %s5402_s30 = sshll.u32 %s6834_s25, 7 }
  0x3c   : > { %s5955_s9 = sshll.u32 %s6705_s17, 11  ;;  %s7804_s4 = sld [smem:[#allocation19_spill]] }
  0x3d   : > { %p6863_p2 = pnand %p5411_p6, %p264_p1  ;;  %s200_s21 = scalar_lea.vmem [#allocation7], %s5402_s30 }
  0x3e   : > { %s207_s22 = sshll.u32 %s200_s21, 4  ;;  %s5408_s19 = sshll.u32 %s6834_s25, 9  ;;  %s208_s22 = int_to_ptr.vmem [resolvable:$true] %s207_s22 }
  0x3f   : > { %s197_s5 = scalar_lea.sflag [#allocation8], %s6834_s25  ;;  %s6596_s20 = scalar_lea.vmem %s208_s22, 2048 }
  0x40   : > { %p6597_p4 = scmp.ne.s32.totalorder %s208_s22, %s6596_s20  ;;  %s6728_s10 = smov [#allocation7]  }
  0x41   : > { %s6601_s12 = sshll.u32 %s6728_s10, 4  ;;  %s6602_s12 = int_to_ptr.vmem [resolvable:$false] %s6601_s12 }
  0x42   : > { %s206_s1 = scalar_lea.hbm %s7804_s4, %s5955_s9  ;;  %p6599_p8 = pnand %p6597_p4, %p6557_p7 }
  0x43   : > { %s6603_s28 = scalar_lea.vmem %s6602_s12, 4096  ;;  %p6604_p9 = scmp.lt.s32.totalorder %s208_s22, %s6602_s12 }
  0x44   : > { %p6600_p6 = pneg %p6599_p8  ;;  %p6605_p10 = scmp.lt.s32.totalorder %s6603_s28, %s6596_s20 }
  0x46   : > { %p6606_p11 = por %p6605_p10, %p6604_p9 }
  0x48   : > { %p6607_p12 = pnand %p6606_p11, %p6600_p6 }
  0x4a   : > { %6610 = shalt.err (!%p6607_p12)
}
  0x4b   : > { %s7805_s30 = smov 512   ;;  %s5957_s25 = sshll.u32 %s6705_s17, 13 }
  0x4c   : > { %6440 = dma.hbm_to_vmem [thread:$0]  (!%p6836_p5), %s206_s1, 2048, %s208_s22, %s197_s5, %s7805_s30, %s7805_s30, %s6727_s27  }
  0x4d   : > { %s248_s0 = scalar_lea.hbm %s7790_s6, %s5957_s25  ;;  %s242_s21 = scalar_lea.vmem [#allocation11], %s5408_s19 }
  0x4e   : > { %s249_s10 = sshll.u32 %s242_s21, 4  ;;  %s6729_s28 = smov [#allocation11]   ;;  %s250_s10 = int_to_ptr.vmem [resolvable:$true] %s249_s10 }
  0x4f   : > { %s6624_s20 = scalar_lea.vmem %s250_s10, 8192  ;;  %s6629_s12 = sshll.u32 %s6729_s28, 4  ;;  %s6630_s12 = int_to_ptr.vmem [resolvable:$false] %s6629_s12 }
  0x50   : > { %p6625_p13 = scmp.ne.s32.totalorder %s250_s10, %s6624_s20  ;;  %s6631_s4 = scalar_lea.vmem %s6630_s12, 16384 }
  0x51   : > { %p6632_p4 = scmp.lt.s32.totalorder %s250_s10, %s6630_s12  ;;  %p6633_p8 = scmp.lt.s32.totalorder %s6631_s4, %s6624_s20 }
  0x52   : > { %p6627_p0 = pnand %p6625_p13, %p6557_p7 }
  0x53   : > { %p6634_p6 = por %p6633_p8, %p6632_p4 }
  0x54   : > { %p6628_p1 = pneg %p6627_p0 }
  0x56   : > { %p6635_p9 = pnand %p6634_p6, %p6628_p1 }
  0x58   : > { %6638 = shalt.err (!%p6635_p9)
}
  0x59   : > { %s6730_s5 = smov 64   ;;  %s6731_s19 = smov 4  }
  0x5a   : > { %6446 = dma.hbm_to_vmem [thread:$0]  (!%p6836_p5), %s248_s0, 8192, %s250_s10, %s6847_s13, %s6730_s5, %s6730_s5, %s6731_s19  }
  0x5b   : > { %268 = sbr.rel (%p6863_p2) target bundleno = 1240 (0x4d8), region = 36  ;;  %s270_s27 = sand.u32 (!%p6863_p2), 1, %s6693_s14  }
  0x5c   : > { %s5412_s1 = sshll.u32 (!%p6863_p2), %s270_s27, 7  ;;  %s271_s22 = scalar_lea.sflag (!%p6863_p2), [#allocation8], %s270_s27 }
  0x5d   : > { %s6895_s30 = scalar_lea.vmem (!%p6863_p2), [#allocation7], %s5412_s1 }
  0x60   : > { %6678 = dma.done.wait (%p6825_p3), %s271_s22, 2048  }
  0x61   : > { %6680 = vsyncadd (%p6825_p3), %s271_s22, 4294965248  ;;  %s7806_s4 = sadd.s32 4294967295, %s6709_s18   ;;  %s5413_s13 = sshll.u32 %s270_s27, 12 }
  0x62   : > { %s279_s26 = sand.u32 1, %s7806_s4   ;;  %s6903_s29 = scalar_lea.vmem [#allocation9], %s5413_s13 }
  0x63   : > { %s280_s25 = scalar_lea.sflag [#allocation10], %s279_s26 }
  0x64   : > { %6682 = dma.done.wait (%p6825_p3), %s280_s25, 73728  }
  0x65   : > { %6684 = vsyncadd (%p6825_p3), %s280_s25, 4294893568  ;;  %s5414_s9 = sshll.u32 %s270_s27, 9  ;;  %p335_p5 = scmp.lt.s32.totalorder %s6701_s16, 1 }
  0x66   : > { %s6921_s1 = scalar_lea.vmem [#allocation11], %s5414_s9  ;;  %p5417_p3 = scmp.ne.s32.totalorder %s6701_s16, 0 }
  0x67   : > { %s336_s11 = scalar_select %p335_p5, %s6701_s16, 1 }
  0x68   : > { %354 = sbr.rel (%p5417_p3) target bundleno = 126 (0x7e), region = 52  ;;  %s6711_s23 = smov (!%p5417_p3), 0  }
  0x69   : > { %s6430_s0 = smul.u32 17, %s336_s11  ;;  %s5958_s21 = sshll.u32 %s336_s11, 4 }
  0x6a   : > { %s6914_s28 = scalar_lea.vmem %s7792_s8, %s5958_s21 }
  0x6b   : > { %s6919_s19 = scalar_lea.vmem %s7791_s7, %s6430_s0 }
  0x6d LB: >> { %s362_s27 = sld [smem:[#allocation5 + %s6713_s23]]  ;;  %s364_s13 = scalar_lea.vmem [#allocation2], %s6713_s23  ;;  %s6713_s23 = sphi %s6711_s23, %s360_s23  }
  0x73   : >> { %s363_s26 = scalar_lea.vmem %s7786_s2, %s362_s27 }
  0x74   : >> { %v383_v0 = vld [vmem:[%s363_s26] sm:$0x1] }
  0x75   : >> { %384 = vst [vmem:[%s364_s13] sm:$0x1] %v383_v0 }
  0x76   : >> { %410 = vsyncadd [#allocation3], 16  ;;  %s360_s23 = sadd.s32 1, %s6713_s23  }
  0x77   : >> { %p357_p7 = scmp.ge.s32.totalorder %s360_s23, 16  }
  0x79   : > { %359 = sbr.rel (!%p357_p7) target bundleno = 109 (0x6d), region = 216 }
  0x7e PF: > { %p5418_p2 = scmp.ne.s32.totalorder %s6701_s16, 1 }
  0x7f   : > { %s6715_s25 = smov (!%p5418_p2), 0  }
  0x80   : > { %414 = sbr.rel (%p5418_p2) target bundleno = 150 (0x96), region = 93 }
  0x85 LB: >> { %s422_s9 = sld [smem:[#allocation6 + %s6717_s25]]  ;;  %s424_s10 = scalar_lea.vmem [#allocation2], %s6717_s25  ;;  %s6717_s25 = sphi %s6715_s25, %s420_s25  }
  0x8b   : >> { %s423_s21 = scalar_lea.vmem %s7787_s3, %s422_s9 }
  0x8c   : >> { %v443_v1 = vld [vmem:[%s423_s21] sm:$0x1] }
  0x8d   : >> { %444 = vst [vmem:[%s424_s10] sm:$0x1] %v443_v1 }
  0x8e   : >> { %470 = vsyncadd [#allocation3], 16  ;;  %s420_s25 = sadd.s32 1, %s6717_s25  }
  0x8f   : >> { %p417_p10 = scmp.ge.s32.totalorder %s420_s25, 16  }
  0x91   : > { %419 = sbr.rel (!%p417_p10) target bundleno = 133 (0x85), region = 227 }
  0x96 PF: > { %s6719_s16 = smov 0  }
  0x97 LB: >> { %6685 = dma.done.wait [#allocation3], 16  ;;  %s6721_s16 = sphi %s6719_s16, %s476_s16  }
  0x98   : >> { %6686 = vsyncadd [#allocation3], 4294967280  ;;  %s476_s16 = sadd.s32 1, %s6721_s16  }
  0x99   : >> { %p473_p11 = scmp.ge.s32.totalorder %s476_s16, 16  }
  0x9a   : > { %v490_v2 = vld [vmem:[%s6895_s30 + $0x40] sm:$0xff] (%p473_p11)  ;;  %v491_v4 = vld [vmem:[%s6895_s30 + $0x48] sm:$0xff] (%p473_p11)  ;;  %v6732_v10 = vmov (%p473_p11), 0   ;;  %v480_v17 = vld [vmem:[#allocation2] sm:$0xff] (%p473_p11)  ;;  %vm621_vm0 = vcmask (%p473_p11), 261120  }
  0x9b   : > { %475 = sbr.rel (!%p473_p11) target bundleno = 151 (0x97), region = 238  ;;  %v494_v3 = vld [vmem:[%s6895_s30 + $0x60] sm:$0xff] (%p473_p11)  ;;  %v495_v6 = vld [vmem:[%s6895_s30 + $0x68] sm:$0xff] (%p473_p11)  ;;  %657 = vmatprep.mubr.bf16.mxu0 (%p473_p11), %v6732_v10  ;;  %700 = vmatprep.mubr.bf16.mxu1 (%p473_p11), %v6732_v10  ;;  %v492_v18 = vld [vmem:[%s6895_s30 + $0x50] sm:$0xff] (%p473_p11) }
  0x9c   : > { %v5428_v5 = vcombine.high (%p473_p11), %v490_v2, %v494_v3  ;;  %v5427_v7 = vcombine.low (%p473_p11), %v490_v2, %v494_v3  ;;  %v482_v8 = vld [vmem:[%s6895_s30] sm:$0xff] (%p473_p11)  ;;  %v5430_v11 = vcombine.high (%p473_p11), %v491_v4, %v495_v6  ;;  %v5429_v12 = vcombine.low (%p473_p11), %v491_v4, %v495_v6  ;;  %v483_v14 = vld [vmem:[%s6895_s30 + $0x8] sm:$0xff] (%p473_p11)  ;;  %v496_v19 = vld [vmem:[%s6895_s30 + $0x70] sm:$0xff] (%p473_p11) }
  0x9d   : > { %v486_v9 = vld [vmem:[%s6895_s30 + $0x20] sm:$0xff] (%p473_p11)  ;;  %v487_v15 = vld [vmem:[%s6895_s30 + $0x28] sm:$0xff] (%p473_p11)  ;;  %v481_v21 = vld [vmem:[#allocation2 + $0x8] sm:$0xff] (%p473_p11)  ;;  %v5432_v25 = vcombine.high (%p473_p11), %v492_v18, %v496_v19  ;;  %v5431_v32 = vcombine.low (%p473_p11), %v492_v18, %v496_v19 }
  0x9e   : > { %v5420_v13 = vcombine.high (%p473_p11), %v482_v8, %v486_v9  ;;  %637 = vmatprep.subr.bf16.mxu0 (%p473_p11), %v5428_v5  ;;  %v5422_v16 = vcombine.high (%p473_p11), %v483_v14, %v487_v15  ;;  %680 = vmatprep.subr.bf16.mxu1 (%p473_p11), %v5430_v11  ;;  %v5419_v20 = vcombine.low (%p473_p11), %v482_v8, %v486_v9  ;;  %v493_v22 = vld [vmem:[%s6895_s30 + $0x58] sm:$0xff] (%p473_p11)  ;;  %v484_v27 = vld [vmem:[%s6895_s30 + $0x10] sm:$0xff] (%p473_p11)  ;;  %v869_v36 = vld [vmem:[%s6903_s29 + $0x1c0] sm:$0xff] (%p473_p11) }
  0x9f   : > { %638 = vmatpush1.bf16.msra.mxu0 (%p473_p11), %v5427_v7  ;;  %v497_v23 = vld [vmem:[%s6895_s30 + $0x78] sm:$0xff] (%p473_p11)  ;;  %681 = vmatpush1.bf16.msra.mxu1 (%p473_p11), %v5429_v12  ;;  %v5421_v24 = vcombine.low (%p473_p11), %v483_v14, %v487_v15  ;;  %v488_v28 = vld [vmem:[%s6895_s30 + $0x30] sm:$0xff] (%p473_p11)  ;;  %v499_v29 = vpack.c.bf16 (%p473_p11), %v481_v21, %v480_v17  ;;  %v873_v37 = vld [vmem:[%s6903_s29 + $0x1e0] sm:$0xff] (%p473_p11) }
  0xa0   : > { %639 = vmatprep.subr.bf16.mxu0 %v5420_v13  ;;  %682 = vmatprep.subr.bf16.mxu1 %v5422_v16  ;;  %v5434_v26 = vcombine.high %v493_v22, %v497_v23  ;;  %v485_v30 = vld [vmem:[%s6895_s30 + $0x18] sm:$0xff]  ;;  %v5433_v33 = vcombine.low %v493_v22, %v497_v23  ;;  %v5424_v34 = vcombine.high %v484_v27, %v488_v28  ;;  %v997_v38 = vld [vmem:[%s6903_s29 + $0x5c0] sm:$0xff] }
  0xa1   : > { %v489_v31 = vld [vmem:[%s6895_s30 + $0x38] sm:$0xff]  ;;  %v1001_v39 = vld [vmem:[%s6903_s29 + $0x5e0] sm:$0xff]  ;;  %v5423_v40 = vcombine.low %v484_v27, %v488_v28  ;;  %v5496_v42 = vcombine.high %v869_v36, %v873_v37  ;;  %v5495_v48 = vcombine.low %v869_v36, %v873_v37 }
  0xa2   : > { %v5426_v35 = vcombine.high %v485_v30, %v489_v31  ;;  %v5425_v41 = vcombine.low %v485_v30, %v489_v31  ;;  %v5624_v43 = vcombine.high %v997_v38, %v1001_v39  ;;  %v861_v44 = vld [vmem:[%s6903_s29 + $0x180] sm:$0xff]  ;;  %v5623_v49 = vcombine.low %v997_v38, %v1001_v39 }
  0xa3   : > { %640 = vmatpush1.bf16.msra.mxu0 %v5419_v20  ;;  %683 = vmatpush1.bf16.msra.mxu1 %v5421_v24  ;;  %v865_v45 = vld [vmem:[%s6903_s29 + $0x1a0] sm:$0xff] }
  0xa4   : > { %723 = vmatprep.subr.bf16.mxu0 %v5432_v25  ;;  %766 = vmatprep.subr.bf16.mxu1 %v5434_v26  ;;  %v989_v46 = vld [vmem:[%s6903_s29 + $0x580] sm:$0xff]  ;;  %v5488_v50 = vcombine.high %v861_v44, %v865_v45  ;;  %v5487_v56 = vcombine.low %v861_v44, %v865_v45 }
  0xa5   : > { %v993_v47 = vld [vmem:[%s6903_s29 + $0x5a0] sm:$0xff] }
  0xa6   : > { %5435 = vmatmul.mubr.msk.bf16.vlgmr.msra.gmra.mxu0 %vm621_vm0, %v499_v29  ;;  %5436 = vmatmul.mubr.msk.bf16.vlgmr.msra.gmra.mxu1 %vm621_vm0, %v499_v29  ;;  %v5616_v51 = vcombine.high %v989_v46, %v993_v47  ;;  %v853_v52 = vld [vmem:[%s6903_s29 + $0x140] sm:$0xff]  ;;  %v5615_v57 = vcombine.low %v989_v46, %v993_v47 }
  0xa7   : > { %724 = vmatpush1.bf16.msra.mxu0 %v5431_v32  ;;  %767 = vmatpush1.bf16.msra.mxu1 %v5433_v33  ;;  %v857_v53 = vld [vmem:[%s6903_s29 + $0x160] sm:$0xff] }
  0xa8   : > { %725 = vmatprep.subr.bf16.mxu0 %v5424_v34  ;;  %768 = vmatprep.subr.bf16.mxu1 %v5426_v35  ;;  %v981_v54 = vld [vmem:[%s6903_s29 + $0x540] sm:$0xff]  ;;  %v5480_v58 = vcombine.high %v853_v52, %v857_v53  ;;  %v5479_v0 = vcombine.low %v853_v52, %v857_v53 }
  0xa9   : > { %743 = vmatprep.mubr.bf16.mxu0 %v6732_v10  ;;  %786 = vmatprep.mubr.bf16.mxu1 %v6732_v10  ;;  %v985_v55 = vld [vmem:[%s6903_s29 + $0x560] sm:$0xff] }
  0xaa   : > { %v5608_v59 = vcombine.high %v981_v54, %v985_v55  ;;  %v845_v60 = vld [vmem:[%s6903_s29 + $0x100] sm:$0xff]  ;;  %v5607_v1 = vcombine.low %v981_v54, %v985_v55 }
  0xab   : > { %726 = vmatpush1.bf16.msra.mxu0 %v5423_v40  ;;  %769 = vmatpush1.bf16.msra.mxu1 %v5425_v41  ;;  %v849_v61 = vld [vmem:[%s6903_s29 + $0x120] sm:$0xff] }
  0xac   : > { %3935 = vmatprep.subr.bf16.mxu0 %v5496_v42  ;;  %3978 = vmatprep.subr.bf16.mxu1 %v5624_v43  ;;  %v973_v62 = vld [vmem:[%s6903_s29 + $0x500] sm:$0xff]  ;;  %v5472_v2 = vcombine.high %v845_v60, %v849_v61  ;;  %v5471_v8 = vcombine.low %v845_v60, %v849_v61 }
  0xad   : > { %v977_v63 = vld [vmem:[%s6903_s29 + $0x520] sm:$0xff] }
  0xae   : > { %5437 = vmatmul.mubr.msk.bf16.vlgmr.msra.gmra.mxu0 %vm621_vm0, %v499_v29  ;;  %5438 = vmatmul.mubr.msk.bf16.vlgmr.msra.gmra.mxu1 %vm621_vm0, %v499_v29  ;;  %v5600_v3 = vcombine.high %v973_v62, %v977_v63  ;;  %v837_v4 = vld [vmem:[%s6903_s29 + $0xc0] sm:$0xff]  ;;  %v5599_v9 = vcombine.low %v973_v62, %v977_v63 }
  0xaf   : > { %3936 = vmatpush1.bf16.msra.mxu0 %v5495_v48  ;;  %3979 = vmatpush1.bf16.msra.mxu1 %v5623_v49  ;;  %v841_v5 = vld [vmem:[%s6903_s29 + $0xe0] sm:$0xff] }
  0xb0   : > { %3937 = vmatprep.subr.bf16.mxu0 %v5488_v50  ;;  %3980 = vmatprep.subr.bf16.mxu1 %v5616_v51  ;;  %v965_v6 = vld [vmem:[%s6903_s29 + $0x4c0] sm:$0xff]  ;;  %v5464_v10 = vcombine.high %v837_v4, %v841_v5  ;;  %v5463_v16 = vcombine.low %v837_v4, %v841_v5 }
  0xb1   : > { %v969_v7 = vld [vmem:[%s6903_s29 + $0x4e0] sm:$0xff] }
  0xb2   : > { %v5592_v11 = vcombine.high %v965_v6, %v969_v7  ;;  %v829_v12 = vld [vmem:[%s6903_s29 + $0x80] sm:$0xff]  ;;  %v5591_v17 = vcombine.low %v965_v6, %v969_v7 }
  0xb3   : > { %3938 = vmatpush1.bf16.msra.mxu0 %v5487_v56  ;;  %3981 = vmatpush1.bf16.msra.mxu1 %v5615_v57  ;;  %v833_v13 = vld [vmem:[%s6903_s29 + $0xa0] sm:$0xff] }
  0xb4   : > { %3939 = vmatprep.subr.bf16.mxu0 %v5480_v58  ;;  %3982 = vmatprep.subr.bf16.mxu1 %v5608_v59  ;;  %v957_v14 = vld [vmem:[%s6903_s29 + $0x480] sm:$0xff]  ;;  %v5456_v18 = vcombine.high %v829_v12, %v833_v13  ;;  %v5455_v24 = vcombine.low %v829_v12, %v833_v13 }
  0xb5   : > { %v961_v15 = vld [vmem:[%s6903_s29 + $0x4a0] sm:$0xff] }
  0xb6   : > { %v5584_v19 = vcombine.high %v957_v14, %v961_v15  ;;  %v821_v20 = vld [vmem:[%s6903_s29 + $0x40] sm:$0xff]  ;;  %v5583_v25 = vcombine.low %v957_v14, %v961_v15 }
  0xb7   : > { %3940 = vmatpush1.bf16.msra.mxu0 %v5479_v0  ;;  %3983 = vmatpush1.bf16.msra.mxu1 %v5607_v1  ;;  %v825_v21 = vld [vmem:[%s6903_s29 + $0x60] sm:$0xff] }
  0xb8   : > { %3941 = vmatprep.subr.bf16.mxu0 %v5472_v2  ;;  %3984 = vmatprep.subr.bf16.mxu1 %v5600_v3  ;;  %v949_v22 = vld [vmem:[%s6903_s29 + $0x440] sm:$0xff]  ;;  %v5448_v26 = vcombine.high %v821_v20, %v825_v21  ;;  %v5447_v32 = vcombine.low %v821_v20, %v825_v21 }
  0xb9   : > { %v953_v23 = vld [vmem:[%s6903_s29 + $0x460] sm:$0xff] }
  0xba   : > { %v5576_v27 = vcombine.high %v949_v22, %v953_v23  ;;  %v813_v28 = vld [vmem:[%s6903_s29] sm:$0xff]  ;;  %v5575_v33 = vcombine.low %v949_v22, %v953_v23 }
  0xbb   : > { %3942 = vmatpush1.bf16.msra.mxu0 %v5471_v8  ;;  %3985 = vmatpush1.bf16.msra.mxu1 %v5599_v9  ;;  %v817_v29 = vld [vmem:[%s6903_s29 + $0x20] sm:$0xff] }
  0xbc   : > { %3943 = vmatprep.subr.bf16.mxu0 %v5464_v10  ;;  %3986 = vmatprep.subr.bf16.mxu1 %v5592_v11  ;;  %v941_v30 = vld [vmem:[%s6903_s29 + $0x400] sm:$0xff]  ;;  %v5440_v34 = vcombine.high %v813_v28, %v817_v29  ;;  %v5439_v40 = vcombine.low %v813_v28, %v817_v29 }
  0xbd   : > { %v945_v31 = vld [vmem:[%s6903_s29 + $0x420] sm:$0xff] }
  0xbe   : > { %v5568_v35 = vcombine.high %v941_v30, %v945_v31  ;;  %v933_v36 = vld [vmem:[%s6903_s29 + $0x3c0] sm:$0xff]  ;;  %v5567_v41 = vcombine.low %v941_v30, %v945_v31 }
  0xbf   : > { %3944 = vmatpush1.bf16.msra.mxu0 %v5463_v16  ;;  %3987 = vmatpush1.bf16.msra.mxu1 %v5591_v17  ;;  %v937_v37 = vld [vmem:[%s6903_s29 + $0x3e0] sm:$0xff] }
  0xc0   : > { %3945 = vmatprep.subr.bf16.mxu0 %v5456_v18  ;;  %3988 = vmatprep.subr.bf16.mxu1 %v5584_v19  ;;  %v1061_v38 = vld [vmem:[%s6903_s29 + $0x7c0] sm:$0xff]  ;;  %v5560_v42 = vcombine.high %v933_v36, %v937_v37  ;;  %v5559_v48 = vcombine.low %v933_v36, %v937_v37 }
  0xc1   : > { %v1065_v39 = vld [vmem:[%s6903_s29 + $0x7e0] sm:$0xff] }
  0xc2   : > { %v5688_v43 = vcombine.high %v1061_v38, %v1065_v39  ;;  %v925_v44 = vld [vmem:[%s6903_s29 + $0x380] sm:$0xff]  ;;  %v5687_v49 = vcombine.low %v1061_v38, %v1065_v39 }
  0xc3   : > { %3946 = vmatpush1.bf16.msra.mxu0 %v5455_v24  ;;  %3989 = vmatpush1.bf16.msra.mxu1 %v5583_v25  ;;  %v929_v45 = vld [vmem:[%s6903_s29 + $0x3a0] sm:$0xff] }
  0xc4   : > { %3947 = vmatprep.subr.bf16.mxu0 %v5448_v26  ;;  %3990 = vmatprep.subr.bf16.mxu1 %v5576_v27  ;;  %v1053_v46 = vld [vmem:[%s6903_s29 + $0x780] sm:$0xff]  ;;  %v5552_v50 = vcombine.high %v925_v44, %v929_v45  ;;  %v5551_v56 = vcombine.low %v925_v44, %v929_v45 }
  0xc5   : > { %v1057_v47 = vld [vmem:[%s6903_s29 + $0x7a0] sm:$0xff] }
  0xc6   : > { %v5680_v51 = vcombine.high %v1053_v46, %v1057_v47  ;;  %v917_v52 = vld [vmem:[%s6903_s29 + $0x340] sm:$0xff]  ;;  %v5679_v57 = vcombine.low %v1053_v46, %v1057_v47  ;;  %v501_v46 = vlaneseq }
  0xc7   : > { %3948 = vmatpush1.bf16.msra.mxu0 %v5447_v32  ;;  %3991 = vmatpush1.bf16.msra.mxu1 %v5575_v33  ;;  %v921_v53 = vld [vmem:[%s6903_s29 + $0x360] sm:$0xff] }
  0xc8   : > { %3949 = vmatprep.subr.bf16.mxu0 %v5440_v34  ;;  %3992 = vmatprep.subr.bf16.mxu1 %v5568_v35  ;;  %v1045_v54 = vld [vmem:[%s6903_s29 + $0x740] sm:$0xff]  ;;  %v5544_v58 = vcombine.high %v917_v52, %v921_v53  ;;  %v5543_v0 = vcombine.low %v917_v52, %v921_v53  ;;  %v7035_v47 = vshrl.u32 %v501_v46, 7 }
  0xc9   : > { %v1049_v55 = vld [vmem:[%s6903_s29 + $0x760] sm:$0xff] }
  0xca   : > { %v5672_v59 = vcombine.high %v1045_v54, %v1049_v55  ;;  %v909_v60 = vld [vmem:[%s6903_s29 + $0x300] sm:$0xff]  ;;  %v5671_v1 = vcombine.low %v1045_v54, %v1049_v55  ;;  %v511_v52 = vsub.s32 2, %v7035_v47 }
  0xcb   : > { %3950 = vmatpush1.bf16.msra.mxu0 %v5439_v40  ;;  %3993 = vmatpush1.bf16.msra.mxu1 %v5567_v41  ;;  %v913_v61 = vld [vmem:[%s6903_s29 + $0x320] sm:$0xff] }
  0xcc   : > { %3951 = vmatprep.subr.bf16.mxu0 %v5560_v42  ;;  %3994 = vmatprep.subr.bf16.mxu1 %v5688_v43  ;;  %v1037_v62 = vld [vmem:[%s6903_s29 + $0x700] sm:$0xff]  ;;  %v5536_v2 = vcombine.high %v909_v60, %v913_v61  ;;  %v5535_v8 = vcombine.low %v909_v60, %v913_v61  ;;  %v523_v61 = vsub.s32 5, %v7035_v47 }
  0xcd   : > { %v1041_v63 = vld [vmem:[%s6903_s29 + $0x720] sm:$0xff] }
  0xce   : > { %v5664_v3 = vcombine.high %v1037_v62, %v1041_v63  ;;  %v901_v4 = vld [vmem:[%s6903_s29 + $0x2c0] sm:$0xff]  ;;  %v5663_v9 = vcombine.low %v1037_v62, %v1041_v63  ;;  %v531_v63 = vsub.s32 7, %v7035_v47 }
  0xcf   : > { %3952 = vmatpush2.bf16.msra.mxu0 %v5559_v48  ;;  %3995 = vmatpush2.bf16.msra.mxu1 %v5687_v49  ;;  %v905_v5 = vld [vmem:[%s6903_s29 + $0x2e0] sm:$0xff]  ;;  %v507_v48 = vsub.s32 1, %v7035_v47  ;;  %v503_v49 = vsub.s32 0, %v7035_v47 }
  0xd0   : > { %3953 = vmatprep.subr.bf16.mxu0 %v5552_v50  ;;  %3996 = vmatprep.subr.bf16.mxu1 %v5680_v51  ;;  %v1029_v6 = vld [vmem:[%s6903_s29 + $0x6c0] sm:$0xff]  ;;  %v5528_v10 = vcombine.high %v901_v4, %v905_v5  ;;  %v5527_v12 = vcombine.low %v901_v4, %v905_v5  ;;  %v515_v50 = vsub.s32 3, %v7035_v47  ;;  %v7041_v51 = vld [vmem:[%s6919_s19] sm:$0xff] }
  0xd1   : > { %v1033_v7 = vld [vmem:[%s6903_s29 + $0x6e0] sm:$0xff]  ;;  %v508_v55 = vrot.slane %v7041_v51, %v507_v48 }
  0xd2   : > { %v5656_v11 = vcombine.high %v1029_v6, %v1033_v7  ;;  %v5655_v13 = vcombine.low %v1029_v6, %v1033_v7  ;;  %v893_v14 = vld [vmem:[%s6903_s29 + $0x280] sm:$0xff] }
  0xd3   : > { %3954 = vmatpush2.bf16.msra.mxu0 %v5551_v56  ;;  %3997 = vmatpush2.bf16.msra.mxu1 %v5679_v57  ;;  %v897_v15 = vld [vmem:[%s6903_s29 + $0x2a0] sm:$0xff]  ;;  %v504_v56 = vrot.slane %v7041_v51, %v503_v49 }
  0xd4   : > { %3955 = vmatprep.subr.bf16.mxu0 %v5544_v58  ;;  %3998 = vmatprep.subr.bf16.mxu1 %v5672_v59  ;;  %v1021_v16 = vld [vmem:[%s6903_s29 + $0x680] sm:$0xff]  ;;  %v5520_v17 = vcombine.high %v893_v14, %v897_v15  ;;  %v5519_v19 = vcombine.low %v893_v14, %v897_v15  ;;  %v516_v58 = vrot.slane %v7041_v51, %v515_v50 }
  0xd5   : > { %v1025_v18 = vld [vmem:[%s6903_s29 + $0x6a0] sm:$0xff]  ;;  %v512_v59 = vrot.slane %v7041_v51, %v511_v52  ;;  %v532_v14 = vrot.slane %v7041_v51, %v531_v63 }
  0xd6   : > { %v5647_v20 = vcombine.low %v1021_v16, %v1025_v18  ;;  %v5648_v21 = vcombine.high %v1021_v16, %v1025_v18  ;;  %v885_v22 = vld [vmem:[%s6903_s29 + $0x240] sm:$0xff] }
  0xd7   : > { %3956 = vmatpush2.bf16.msra.mxu0 %v5543_v0  ;;  %3999 = vmatpush2.bf16.msra.mxu1 %v5671_v1  ;;  %v889_v23 = vld [vmem:[%s6903_s29 + $0x260] sm:$0xff] }
  0xd8   : > { %3957 = vmatprep.subr.bf16.mxu0 %v5536_v2  ;;  %4000 = vmatprep.subr.bf16.mxu1 %v5664_v3  ;;  %v1013_v24 = vld [vmem:[%s6903_s29 + $0x640] sm:$0xff]  ;;  %v5512_v25 = vcombine.high %v885_v22, %v889_v23  ;;  %v5511_v27 = vcombine.low %v885_v22, %v889_v23 }
  0xd9   : > { %v1017_v26 = vld [vmem:[%s6903_s29 + $0x660] sm:$0xff] }
  0xda   : > { %v5639_v28 = vcombine.low %v1013_v24, %v1017_v26  ;;  %v5640_v29 = vcombine.high %v1013_v24, %v1017_v26  ;;  %v877_v30 = vld [vmem:[%s6903_s29 + $0x200] sm:$0xff] }
  0xdb   : > { %3958 = vmatpush2.bf16.msra.mxu0 %v5535_v8  ;;  %4001 = vmatpush2.bf16.msra.mxu1 %v5663_v9  ;;  %v881_v31 = vld [vmem:[%s6903_s29 + $0x220] sm:$0xff] }
  0xdc   : > { %3959 = vmatprep.subr.bf16.mxu0 %v5528_v10  ;;  %4002 = vmatprep.subr.bf16.mxu1 %v5656_v11  ;;  %v1005_v32 = vld [vmem:[%s6903_s29 + $0x600] sm:$0xff]  ;;  %v5504_v33 = vcombine.high %v877_v30, %v881_v31  ;;  %v5503_v35 = vcombine.low %v877_v30, %v881_v31  ;;  %v524_v10 = vrot.slane %v7041_v51, %v523_v61 }
  0xdd   : > { %v1009_v34 = vld [vmem:[%s6903_s29 + $0x620] sm:$0xff] }
  0xde   : > { %v5631_v36 = vcombine.low %v1005_v32, %v1009_v34  ;;  %v5632_v37 = vcombine.high %v1005_v32, %v1009_v34  ;;  %v7016_v38 = vld [vmem:[%s6903_s29 + $0x9c0] sm:$0xff] }
  0xdf   : > { %3960 = vmatpush2.bf16.msra.mxu0 %v5527_v12  ;;  %4003 = vmatpush2.bf16.msra.mxu1 %v5655_v13  ;;  %v7019_v39 = vld [vmem:[%s6903_s29 + $0x9e0] sm:$0xff] }
  0xe0   : > { %3961 = vmatprep.subr.bf16.mxu0 %v5520_v17  ;;  %4004 = vmatprep.subr.bf16.mxu1 %v5648_v21  ;;  %v7022_v40 = vld [vmem:[%s6903_s29 + $0xdc0] sm:$0xff]  ;;  %v5752_v41 = vcombine.high %v7016_v38, %v7019_v39  ;;  %v5751_v43 = vcombine.low %v7016_v38, %v7019_v39 }
  0xe1   : > { %v7027_v42 = vld [vmem:[%s6903_s29 + $0xde0] sm:$0xff] }
  0xe2   : > { %v5879_v44 = vcombine.low %v7022_v40, %v7027_v42  ;;  %v5880_v45 = vcombine.high %v7022_v40, %v7027_v42  ;;  %v1117_v18 = vld [vmem:[%s6903_s29 + $0x980] sm:$0xff] }
  0xe3   : > { %3962 = vmatpush2.bf16.msra.mxu0 %v5519_v19  ;;  %4005 = vmatpush2.bf16.msra.mxu1 %v5647_v20  ;;  %v1121_v19 = vld [vmem:[%s6903_s29 + $0x9a0] sm:$0xff] }
  0xe4   : > { %3963 = vmatprep.subr.bf16.mxu0 %v5512_v25  ;;  %4006 = vmatprep.subr.bf16.mxu1 %v5640_v29  ;;  %v1245_v24 = vld [vmem:[%s6903_s29 + $0xd80] sm:$0xff] }
  0xe5   : > { %v1249_v25 = vld [vmem:[%s6903_s29 + $0xda0] sm:$0xff] }
  0xe6   : > { %v1105_v38 = vld [vmem:[%s6903_s29 + $0x920] sm:$0xff] }
  0xe7   : > { %3964 = vmatpush2.bf16.msra.mxu0 %v5511_v27  ;;  %4007 = vmatpush2.bf16.msra.mxu1 %v5639_v28 }
  0xe8   : > { %3965 = vmatprep.subr.bf16.mxu0 %v5504_v33  ;;  %4008 = vmatprep.subr.bf16.mxu1 %v5632_v37  ;;  %v5744_v33 = vcombine.high %v1117_v18, %v1121_v19  ;;  %v5872_v37 = vcombine.high %v1245_v24, %v1249_v25 }
  0xeb   : > { %3966 = vmatpush2.bf16.msra.mxu0 %v5503_v35  ;;  %4009 = vmatpush2.bf16.msra.mxu1 %v5631_v36 }
  0xec   : > { %4021 = vmatprep.subr.bf16.mxu0 %v5752_v41  ;;  %4064 = vmatprep.subr.bf16.mxu1 %v5880_v45  ;;  %v1109_v41 = vld [vmem:[%s6903_s29 + $0x940] sm:$0xff] }
  0xed   : > { %v1113_v45 = vld [vmem:[%s6903_s29 + $0x960] sm:$0xff] }
  0xee   : > { %v5735_v40 = vcombine.low %v1109_v41, %v1113_v45 }
 0x166   : > { %v659_v53 = vpop.f32.mrf.mxu0  ;;  %v702_v54 = vpop.f32.mrf.mxu1 }
 0x167   : > { %v660_v3 = vadd.f32 %v659_v53, %v504_v56  ;;  %v703_v7 = vadd.f32 %v702_v54, %v512_v59  ;;  %v1237_v53 = vld [vmem:[%s6903_s29 + $0xd40] sm:$0xff] }
 0x168   : > { %v661_v57 = vpop.f32.mrf.mxu0  ;;  %v704_v60 = vpop.f32.mrf.mxu1  ;;  %v1241_v54 = vld [vmem:[%s6903_s29 + $0xd60] sm:$0xff] }
 0x169   : > { %v662_v0 = vadd.f32 %v661_v57, %v508_v55  ;;  %v705_v4 = vadd.f32 %v704_v60, %v516_v58  ;;  %v797_v21 = vmax.f32 %v660_v3, 0.0  ;;  %v799_v27 = vmax.f32 %v703_v7, 0.0  ;;  %v1101_v3 = vld [vmem:[%s6903_s29 + $0x900] sm:$0xff] }
 0x16a   : > { %v663_v62 = vpop.f32.mrf.mxu0  ;;  %v706_v2 = vpop.f32.mrf.mxu1  ;;  %v5871_v60 = vcombine.low %v1245_v24, %v1249_v25 }
 0x16b   : > { %v664_v1 = vadd.f32 %v663_v62, %v504_v56  ;;  %v707_v5 = vadd.f32 %v706_v2, %v512_v59  ;;  %v798_v15 = vmax.f32 %v662_v0, 0.0  ;;  %v800_v22 = vmax.f32 %v705_v4, 0.0  ;;  %v1233_v4 = vld [vmem:[%s6903_s29 + $0xd20] sm:$0xff] }
 0x16c   : > { %v665_v6 = vpop.f32.mrf.mxu0  ;;  %v708_v9 = vpop.f32.mrf.mxu1  ;;  %v5743_v56 = vcombine.low %v1117_v18, %v1121_v19  ;;  %v5736_v62 = vcombine.high %v1109_v41, %v1113_v45  ;;  %v5864_v2 = vcombine.high %v1237_v53, %v1241_v54  ;;  %v1085_v18 = vld [vmem:[%s6903_s29 + $0x880] sm:$0xff] }
 0x16d   : > { %v666_v8 = vadd.f32 %v665_v6, %v508_v55  ;;  %v805_v11 = vmax.f32 %v664_v1, 0.0  ;;  %v709_v12 = vadd.f32 %v708_v9, %v516_v58  ;;  %v807_v16 = vmax.f32 %v707_v5, 0.0  ;;  %v1093_v9 = vld [vmem:[%s6903_s29 + $0x8c0] sm:$0xff] }
 0x16e   : > { %v7061_v13 = vpop.f32.mrf.mxu0  ;;  %v7068_v20 = vpop.f32.mrf.mxu1  ;;  %v5728_v6 = vcombine.high %v1101_v3, %v1105_v38  ;;  %v1089_v19 = vld [vmem:[%s6903_s29 + $0x8a0] sm:$0xff] }
 0x16f   : > { %v806_v17 = vmax.f32 %v666_v8, 0.0  ;;  %v808_v23 = vmax.f32 %v709_v12, 0.0  ;;  %v7074_v31 = vpack.c.bf16 %v805_v11, %v797_v21  ;;  %v7080_v36 = vpack.c.bf16 %v807_v16, %v799_v27  ;;  %v1221_v11 = vld [vmem:[%s6903_s29 + $0xcc0] sm:$0xff] }
 0x170   : > { %v747_v26 = vpop.f32.mrf.mxu0  ;;  %v790_v30 = vpop.f32.mrf.mxu1  ;;  %v1225_v12 = vld [vmem:[%s6903_s29 + $0xce0] sm:$0xff]  ;;  %v5712_v25 = vcombine.high %v1085_v18, %v1089_v19 }
 0x171   : > { %v7072_v28 = vpack.c.bf16 %v806_v17, %v798_v15  ;;  %v748_v29 = vadd.f32 %v747_v26, %v524_v10  ;;  %v7076_v32 = vpack.c.bf16 %v808_v23, %v800_v22  ;;  %v791_v35 = vadd.f32 %v790_v30, %v532_v14  ;;  %v1213_v21 = vld [vmem:[%s6903_s29 + $0xc80] sm:$0xff] }
 0x172   : > { %v7078_v34 = vpop.f32.mrf.mxu0  ;;  %v7085_v46 = vpop.f32.mrf.mxu1  ;;  %v5848_v17 = vcombine.high %v1221_v11, %v1225_v12  ;;  %v1217_v22 = vld [vmem:[%s6903_s29 + $0xca0] sm:$0xff]  ;;  %v5847_v24 = vcombine.low %v1221_v11, %v1225_v12 }
 0x173   : > { %3967 = vmatprep.mubr.bf16.mxu0 %v7072_v28  ;;  %4010 = vmatprep.mubr.bf16.mxu1 %v7076_v32  ;;  %v802_v57 = vmax.f32 %v748_v29, 0.0  ;;  %v804_v0 = vmax.f32 %v791_v35, 0.0  ;;  %v5840_v26 = vcombine.high %v1213_v21, %v1217_v22  ;;  %v1077_v27 = vld [vmem:[%s6903_s29 + $0x840] sm:$0xff]  ;;  %v5711_v35 = vcombine.low %v1085_v18, %v1089_v19 }
 0x174   : > { %3968 = vmatmul.mubr.bf16.vlgmr.msra.gmra.mxu0 %v7074_v31  ;;  %v751_v55 = vpop.f32.mrf.mxu0  ;;  %4011 = vmatmul.mubr.bf16.vlgmr.msra.gmra.mxu1 %v7080_v36  ;;  %v794_v59 = vpop.f32.mrf.mxu1  ;;  %v1081_v29 = vld [vmem:[%s6903_s29 + $0x860] sm:$0xff] }
 0x175   : > { %4022 = vmatpush1.bf16.msra.mxu0 %v5751_v43  ;;  %v752_v58 = vadd.f32 %v751_v55, %v524_v10  ;;  %4065 = vmatpush1.bf16.msra.mxu1 %v5879_v44  ;;  %v795_v1 = vadd.f32 %v794_v59, %v532_v14  ;;  %v1229_v43 = vld [vmem:[%s6903_s29 + $0xd00] sm:$0xff]  ;;  %v5863_v44 = vcombine.low %v1237_v53, %v1241_v54 }
 0x176   : > { %4023 = vmatprep.subr.bf16.mxu0 %v5744_v33  ;;  %4066 = vmatprep.subr.bf16.mxu1 %v5872_v37  ;;  %v5856_v8 = vcombine.high %v1229_v43, %v1233_v4  ;;  %v1097_v10 = vld [vmem:[%s6903_s29 + $0x8e0] sm:$0xff]  ;;  %v5727_v14 = vcombine.low %v1101_v3, %v1105_v38  ;;  %v5855_v15 = vcombine.low %v1229_v43, %v1233_v4 }
 0x177   : > { %v810_v39 = vmax.f32 %v752_v58, 0.0  ;;  %v812_v5 = vmax.f32 %v795_v1, 0.0  ;;  %v5720_v16 = vcombine.high %v1093_v9, %v1097_v10  ;;  %v5719_v23 = vcombine.low %v1093_v9, %v1097_v10  ;;  %v1205_v30 = vld [vmem:[%s6903_s29 + $0xc40] sm:$0xff] }
 0x178   : > { %v1209_v33 = vld [vmem:[%s6903_s29 + $0xc60] sm:$0xff]  ;;  %v5839_v37 = vcombine.low %v1213_v21, %v1217_v22  ;;  %v5704_v41 = vcombine.high %v1077_v27, %v1081_v29 }
 0x179   : > { %4024 = vmatpush1.bf16.msra.mxu0 %v5743_v56  ;;  %v7102_v42 = vpack.c.bf16 %v810_v39, %v802_v57  ;;  %4067 = vmatpush1.bf16.msra.mxu1 %v5871_v60  ;;  %v7104_v7 = vpack.c.bf16 %v812_v5, %v804_v0  ;;  %v5832_v45 = vcombine.high %v1205_v30, %v1209_v33  ;;  %v1069_v53 = vld [vmem:[%s6903_s29 + $0x800] sm:$0xff] }
 0x17a   : > { %4025 = vmatprep.subr.bf16.mxu0 %v5736_v62  ;;  %4068 = vmatprep.subr.bf16.mxu1 %v5864_v2  ;;  %v1073_v54 = vld [vmem:[%s6903_s29 + $0x820] sm:$0xff]  ;;  %v5703_v57 = vcombine.low %v1077_v27, %v1081_v29  ;;  %v5831_v58 = vcombine.low %v1205_v30, %v1209_v33 }
 0x17b   : > { %4053 = vmatprep.mubr.bf16.mxu0 %v7102_v42  ;;  %4096 = vmatprep.mubr.bf16.mxu1 %v7104_v7  ;;  %v1197_v55 = vld [vmem:[%s6903_s29 + $0xc00] sm:$0xff]  ;;  %v5696_v59 = vcombine.high %v1069_v53, %v1073_v54  ;;  %v5695_v3 = vcombine.low %v1069_v53, %v1073_v54 }
 0x17c   : > { %v1201_v56 = vld [vmem:[%s6903_s29 + $0xc20] sm:$0xff] }
 0x17d   : > { %4026 = vmatpush1.bf16.msra.mxu0 %v5735_v40  ;;  %4069 = vmatpush1.bf16.msra.mxu1 %v5863_v44  ;;  %v5824_v60 = vcombine.high %v1197_v55, %v1201_v56  ;;  %v1189_v62 = vld [vmem:[%s6903_s29 + $0xbc0] sm:$0xff]  ;;  %v5823_v38 = vcombine.low %v1197_v55, %v1201_v56 }
 0x17e   : > { %4027 = vmatprep.subr.bf16.mxu0 %v5728_v6  ;;  %4070 = vmatprep.subr.bf16.mxu1 %v5856_v8  ;;  %v1193_v0 = vld [vmem:[%s6903_s29 + $0xbe0] sm:$0xff] }
 0x17f   : > { %v1317_v1 = vld [vmem:[%s6903_s29 + $0xfc0] sm:$0xff]  ;;  %v5816_v39 = vcombine.high %v1189_v62, %v1193_v0  ;;  %v5815_v6 = vcombine.low %v1189_v62, %v1193_v0 }
 0x180   : > { %v1321_v2 = vld [vmem:[%s6903_s29 + $0xfe0] sm:$0xff] }
 0x181   : > { %4028 = vmatpush1.bf16.msra.mxu0 %v5727_v14  ;;  %4071 = vmatpush1.bf16.msra.mxu1 %v5855_v15  ;;  %v5944_v43 = vcombine.high %v1317_v1, %v1321_v2  ;;  %v1181_v4 = vld [vmem:[%s6903_s29 + $0xb80] sm:$0xff]  ;;  %v5943_v8 = vcombine.low %v1317_v1, %v1321_v2  ;;  %v527_v1 = vsub.s32 6, %v7035_v47 }
 0x182   : > { %4029 = vmatprep.subr.bf16.mxu0 %v5720_v16  ;;  %4072 = vmatprep.subr.bf16.mxu1 %v5848_v17  ;;  %v1185_v5 = vld [vmem:[%s6903_s29 + $0xba0] sm:$0xff] }
 0x183   : > { %v1309_v40 = vld [vmem:[%s6903_s29 + $0xf80] sm:$0xff]  ;;  %v5808_v9 = vcombine.high %v1181_v4, %v1185_v5  ;;  %v5807_v16 = vcombine.low %v1181_v4, %v1185_v5 }
 0x184   : > { %v1313_v44 = vld [vmem:[%s6903_s29 + $0xfa0] sm:$0xff] }
 0x185   : > { %4030 = vmatpush1.bf16.msra.mxu0 %v5719_v23  ;;  %4073 = vmatpush1.bf16.msra.mxu1 %v5847_v24  ;;  %v5936_v10 = vcombine.high %v1309_v40, %v1313_v44  ;;  %v1173_v11 = vld [vmem:[%s6903_s29 + $0xb40] sm:$0xff]  ;;  %v5935_v17 = vcombine.low %v1309_v40, %v1313_v44 }
 0x186   : > { %4031 = vmatprep.subr.bf16.mxu0 %v5712_v25  ;;  %4074 = vmatprep.subr.bf16.mxu1 %v5840_v26  ;;  %v1177_v12 = vld [vmem:[%s6903_s29 + $0xb60] sm:$0xff] }
 0x187   : > { %v1301_v14 = vld [vmem:[%s6903_s29 + $0xf40] sm:$0xff]  ;;  %v5800_v18 = vcombine.high %v1173_v11, %v1177_v12  ;;  %v5799_v25 = vcombine.low %v1173_v11, %v1177_v12 }
 0x188   : > { %v1305_v15 = vld [vmem:[%s6903_s29 + $0xf60] sm:$0xff] }
 0x189   : > { %4032 = vmatpush1.bf16.msra.mxu0 %v5711_v35  ;;  %4075 = vmatpush1.bf16.msra.mxu1 %v5839_v37  ;;  %v5928_v19 = vcombine.high %v1301_v14, %v1305_v15  ;;  %v1165_v21 = vld [vmem:[%s6903_s29 + $0xb00] sm:$0xff]  ;;  %v5927_v26 = vcombine.low %v1301_v14, %v1305_v15 }
 0x18a   : > { %4033 = vmatprep.subr.bf16.mxu0 %v5704_v41  ;;  %4076 = vmatprep.subr.bf16.mxu1 %v5832_v45  ;;  %v1169_v22 = vld [vmem:[%s6903_s29 + $0xb20] sm:$0xff] }
 0x18b   : > { %v1293_v23 = vld [vmem:[%s6903_s29 + $0xf00] sm:$0xff]  ;;  %v5792_v27 = vcombine.high %v1165_v21, %v1169_v22  ;;  %v5791_v41 = vcombine.low %v1165_v21, %v1169_v22  ;;  %v870_v22 = vld [vmem:[%s6903_s29 + $0x1c8] sm:$0xff] }
 0x18c   : > { %v1297_v24 = vld [vmem:[%s6903_s29 + $0xf20] sm:$0xff] }
 0x18d   : > { %4034 = vmatpush1.bf16.msra.mxu0 %v5703_v57  ;;  %4077 = vmatpush1.bf16.msra.mxu1 %v5831_v58  ;;  %v5920_v29 = vcombine.high %v1293_v23, %v1297_v24  ;;  %v1157_v30 = vld [vmem:[%s6903_s29 + $0xac0] sm:$0xff]  ;;  %v5919_v45 = vcombine.low %v1293_v23, %v1297_v24  ;;  %v874_v23 = vld [vmem:[%s6903_s29 + $0x1e8] sm:$0xff] }
 0x18e   : > { %4035 = vmatprep.subr.bf16.mxu0 %v5696_v59  ;;  %4078 = vmatprep.subr.bf16.mxu1 %v5824_v60  ;;  %v1161_v33 = vld [vmem:[%s6903_s29 + $0xae0] sm:$0xff]  ;;  %v519_v60 = vsub.s32 4, %v7035_v47  ;;  %v998_v24 = vld [vmem:[%s6903_s29 + $0x5c8] sm:$0xff] }
 0x18f   : > { %v1285_v35 = vld [vmem:[%s6903_s29 + $0xec0] sm:$0xff]  ;;  %v5784_v53 = vcombine.high %v1157_v30, %v1161_v33  ;;  %v5783_v59 = vcombine.low %v1157_v30, %v1161_v33  ;;  %v862_v33 = vld [vmem:[%s6903_s29 + $0x188] sm:$0xff] }
 0x190   : > { %v1289_v37 = vld [vmem:[%s6903_s29 + $0xee0] sm:$0xff]  ;;  %v520_v5 = vrot.slane %v7041_v51, %v519_v60 }
 0x191   : > { %4036 = vmatpush1.bf16.msra.mxu0 %v5695_v3  ;;  %4079 = vmatpush1.bf16.msra.mxu1 %v5823_v38  ;;  %v5912_v54 = vcombine.high %v1285_v35, %v1289_v37  ;;  %v1149_v55 = vld [vmem:[%s6903_s29 + $0xa80] sm:$0xff]  ;;  %v5911_v62 = vcombine.low %v1285_v35, %v1289_v37  ;;  %v866_v35 = vld [vmem:[%s6903_s29 + $0x1a8] sm:$0xff]  ;;  %v5497_v37 = vcombine.low %v870_v22, %v874_v23 }
 0x192   : > { %4037 = vmatprep.subr.bf16.mxu0 %v5816_v39  ;;  %4080 = vmatprep.subr.bf16.mxu1 %v5944_v43  ;;  %v1153_v56 = vld [vmem:[%s6903_s29 + $0xaa0] sm:$0xff] }
 0x193   : > { %v1277_v57 = vld [vmem:[%s6903_s29 + $0xe80] sm:$0xff]  ;;  %v5776_v0 = vcombine.high %v1149_v55, %v1153_v56  ;;  %v5775_v4 = vcombine.low %v1149_v55, %v1153_v56  ;;  %v5490_v56 = vcombine.high %v862_v33, %v866_v35 }
 0x194   : > { %v1281_v58 = vld [vmem:[%s6903_s29 + $0xea0] sm:$0xff] }
 0x195   : > { %4038 = vmatpush2.bf16.msra.mxu0 %v5815_v6  ;;  %4081 = vmatpush2.bf16.msra.mxu1 %v5943_v8  ;;  %v5904_v2 = vcombine.high %v1277_v57, %v1281_v58  ;;  %v1141_v3 = vld [vmem:[%s6903_s29 + $0xa40] sm:$0xff]  ;;  %v5903_v40 = vcombine.low %v1277_v57, %v1281_v58  ;;  %v528_v6 = vrot.slane %v7041_v51, %v527_v1  ;;  %v854_v57 = vld [vmem:[%s6903_s29 + $0x148] sm:$0xff] }
 0x196   : > { %4039 = vmatprep.subr.bf16.mxu0 %v5808_v9  ;;  %4082 = vmatprep.subr.bf16.mxu1 %v5936_v10  ;;  %v1145_v38 = vld [vmem:[%s6903_s29 + $0xa60] sm:$0xff]  ;;  %v858_v58 = vld [vmem:[%s6903_s29 + $0x168] sm:$0xff] }
 0x197   : > { %v1269_v39 = vld [vmem:[%s6903_s29 + $0xe40] sm:$0xff]  ;;  %v5768_v44 = vcombine.high %v1141_v3, %v1145_v38  ;;  %v5767_v14 = vcombine.low %v1141_v3, %v1145_v38  ;;  %v5482_v38 = vcombine.high %v854_v57, %v858_v58 }
 0x198   : > { %v1273_v43 = vld [vmem:[%s6903_s29 + $0xe60] sm:$0xff] }
 0x199   : > { %4040 = vmatpush2.bf16.msra.mxu0 %v5807_v16  ;;  %4083 = vmatpush2.bf16.msra.mxu1 %v5935_v17  ;;  %v5896_v8 = vcombine.high %v1269_v39, %v1273_v43  ;;  %v1133_v9 = vld [vmem:[%s6903_s29 + $0xa00] sm:$0xff]  ;;  %v5895_v15 = vcombine.low %v1269_v39, %v1273_v43  ;;  %v746_v16 = vadd.f32 %v7061_v13, %v520_v5  ;;  %v846_v43 = vld [vmem:[%s6903_s29 + $0x108] sm:$0xff] }
 0x19a   : > { %4041 = vmatprep.subr.bf16.mxu0 %v5800_v18  ;;  %4084 = vmatprep.subr.bf16.mxu1 %v5928_v19  ;;  %v1137_v10 = vld [vmem:[%s6903_s29 + $0xa20] sm:$0xff]  ;;  %v750_v17 = vadd.f32 %v7078_v34, %v520_v5  ;;  %v789_v18 = vadd.f32 %v7068_v20, %v528_v6  ;;  %v793_v19 = vadd.f32 %v7085_v46, %v528_v6  ;;  %v974_v5 = vld [vmem:[%s6903_s29 + $0x508] sm:$0xff] }
 0x19b   : > { %v1261_v11 = vld [vmem:[%s6903_s29 + $0xe00] sm:$0xff]  ;;  %v5760_v51 = vcombine.high %v1133_v9, %v1137_v10  ;;  %v5759_v13 = vcombine.low %v1133_v9, %v1137_v10  ;;  %v801_v34 = vmax.f32 %v746_v16, 0.0  ;;  %v5498_v20 = vcombine.high %v870_v22, %v874_v23  ;;  %v838_v10 = vld [vmem:[%s6903_s29 + $0xc8] sm:$0xff] }
 0x19c   : > { %v1265_v12 = vld [vmem:[%s6903_s29 + $0xe20] sm:$0xff]  ;;  %v811_v46 = vmax.f32 %v793_v19, 0.0  ;;  %v834_v19 = vld [vmem:[%s6903_s29 + $0xa8] sm:$0xff] }
 0x19d   : > { %4042 = vmatpush2.bf16.msra.mxu0 %v5799_v25  ;;  %4085 = vmatpush2.bf16.msra.mxu1 %v5927_v26  ;;  %v5888_v21 = vcombine.high %v1261_v11, %v1265_v12  ;;  %v1002_v25 = vld [vmem:[%s6903_s29 + $0x5e8] sm:$0xff]  ;;  %v809_v26 = vmax.f32 %v750_v17, 0.0 }
 0x19e   : > { %4043 = vmatprep.subr.bf16.mxu0 %v5792_v27  ;;  %4086 = vmatprep.subr.bf16.mxu1 %v5920_v29  ;;  %v5887_v27 = vcombine.low %v1261_v11, %v1265_v12  ;;  %v803_v29 = vmax.f32 %v789_v18, 0.0  ;;  %v5626_v30 = vcombine.high %v998_v24, %v1002_v25  ;;  %v842_v11 = vld [vmem:[%s6903_s29 + $0xe8] sm:$0xff] }
 0x19f   : > { %v966_v12 = vld [vmem:[%s6903_s29 + $0x4c8] sm:$0xff]  ;;  %v5466_v17 = vcombine.high %v838_v10, %v842_v11  ;;  %v5465_v23 = vcombine.low %v838_v10, %v842_v11 }
 0x1a0   : > { %v7178_v55 = vpack.c.bf16 %v811_v46, %v803_v29  ;;  %v830_v18 = vld [vmem:[%s6903_s29 + $0x88] sm:$0xff] }
 0x1a1   : > { %4044 = vmatpush2.bf16.msra.mxu0 %v5791_v41  ;;  %4087 = vmatpush2.bf16.msra.mxu1 %v5919_v45  ;;  %v990_v41 = vld [vmem:[%s6903_s29 + $0x588] sm:$0xff]  ;;  %v5457_v29 = vcombine.low %v830_v18, %v834_v19 }
 0x1a2   : > { %4045 = vmatprep.subr.bf16.mxu0 %v5784_v53  ;;  %4088 = vmatprep.subr.bf16.mxu1 %v5912_v54  ;;  %v994_v45 = vld [vmem:[%s6903_s29 + $0x5a8] sm:$0xff]  ;;  %v7176_v53 = vpack.c.bf16 %v809_v26, %v801_v34  ;;  %v5625_v54 = vcombine.low %v998_v24, %v1002_v25  ;;  %v5458_v25 = vcombine.high %v830_v18, %v834_v19 }
 0x1a3   : > { %v5617_v3 = vcombine.low %v990_v41, %v994_v45  ;;  %v962_v22 = vld [vmem:[%s6903_s29 + $0x4a8] sm:$0xff] }
 0x1a4   : > { %v822_v34 = vld [vmem:[%s6903_s29 + $0x48] sm:$0xff] }
 0x1a5   : > { %4046 = vmatpush2.bf16.msra.mxu0 %v5783_v59  ;;  %4089 = vmatpush2.bf16.msra.mxu1 %v5911_v62  ;;  %v5618_v59 = vcombine.high %v990_v41, %v994_v45  ;;  %v982_v62 = vld [vmem:[%s6903_s29 + $0x548] sm:$0xff] }
 0x1a6   : > { %4047 = vmatprep.subr.bf16.mxu0 %v5776_v0  ;;  %4090 = vmatprep.subr.bf16.mxu1 %v5904_v2  ;;  %v986_v0 = vld [vmem:[%s6903_s29 + $0x568] sm:$0xff]  ;;  %v5489_v2 = vcombine.low %v862_v33, %v866_v35 }
 0x1a7   : > { %v5610_v39 = vcombine.high %v982_v62, %v986_v0  ;;  %v5609_v6 = vcombine.low %v982_v62, %v986_v0  ;;  %v826_v26 = vld [vmem:[%s6903_s29 + $0x68] sm:$0xff] }
 0x1a8   : > { %v814_v35 = vld [vmem:[%s6903_s29 + $0x8] sm:$0xff] }
 0x1a9   : > { %4048 = vmatpush2.bf16.msra.mxu0 %v5775_v4  ;;  %4091 = vmatpush2.bf16.msra.mxu1 %v5903_v40  ;;  %v850_v4 = vld [vmem:[%s6903_s29 + $0x128] sm:$0xff] }
 0x1aa   : > { %4049 = vmatprep.subr.bf16.mxu0 %v5768_v44  ;;  %4092 = vmatprep.subr.bf16.mxu1 %v5896_v8  ;;  %v978_v40 = vld [vmem:[%s6903_s29 + $0x528] sm:$0xff]  ;;  %v5481_v44 = vcombine.low %v854_v57, %v858_v58  ;;  %v5474_v8 = vcombine.high %v846_v43, %v850_v4 }
 0x1ab   : > { %v5602_v9 = vcombine.high %v974_v5, %v978_v40  ;;  %v5601_v16 = vcombine.low %v974_v5, %v978_v40  ;;  %v942_v41 = vld [vmem:[%s6903_s29 + $0x408] sm:$0xff] }
 0x1ac   : > { %v946_v45 = vld [vmem:[%s6903_s29 + $0x428] sm:$0xff] }
 0x1ad   : > { %4050 = vmatpush2.bf16.msra.mxu0 %v5767_v14  ;;  %4093 = vmatpush2.bf16.msra.mxu1 %v5895_v15  ;;  %v970_v14 = vld [vmem:[%s6903_s29 + $0x4e8] sm:$0xff]  ;;  %v5473_v15 = vcombine.low %v846_v43, %v850_v4  ;;  %v5570_v58 = vcombine.high %v942_v41, %v946_v45 }
 0x1ae   : > { %4051 = vmatprep.subr.bf16.mxu0 %v5760_v51  ;;  %4094 = vmatprep.subr.bf16.mxu1 %v5888_v21  ;;  %v5594_v51 = vcombine.high %v966_v12, %v970_v14  ;;  %v958_v21 = vld [vmem:[%s6903_s29 + $0x488] sm:$0xff]  ;;  %v5593_v24 = vcombine.low %v966_v12, %v970_v14 }
 0x1af   : > { %v5585_v46 = vcombine.low %v958_v21, %v962_v22  ;;  %v938_v62 = vld [vmem:[%s6903_s29 + $0x3e8] sm:$0xff] }
 0x1b0   : > { %v1062_v0 = vld [vmem:[%s6903_s29 + $0x7c8] sm:$0xff] }
 0x1b1   : > { %4052 = vmatpush2.bf16.msra.mxu0 %v5759_v13  ;;  %4095 = vmatpush2.bf16.msra.mxu1 %v5887_v27  ;;  %v5586_v13 = vcombine.high %v958_v21, %v962_v22  ;;  %v950_v27 = vld [vmem:[%s6903_s29 + $0x448] sm:$0xff] }
 0x1b2   : > { %4107 = vmatprep.subr.bf16.mxu0 %v5498_v20  ;;  %4150 = vmatprep.subr.bf16.mxu1 %v5626_v30  ;;  %v954_v20 = vld [vmem:[%s6903_s29 + $0x468] sm:$0xff]  ;;  %v5450_v30 = vcombine.high %v822_v34, %v826_v26 }
 0x1b3   : > { %v5578_v33 = vcombine.high %v950_v27, %v954_v20  ;;  %v926_v4 = vld [vmem:[%s6903_s29 + $0x388] sm:$0xff] }
 0x1b4   : > { %4054 = vmatmul.mubr.bf16.vlgmr.msra.gmra.mxu0 %v7176_v53  ;;  %4097 = vmatmul.mubr.bf16.vlgmr.msra.gmra.mxu1 %v7178_v55  ;;  %v930_v5 = vld [vmem:[%s6903_s29 + $0x3a8] sm:$0xff] }
 0x1b5   : > { %4108 = vmatpush1.bf16.msra.mxu0 %v5497_v37  ;;  %4139 = vmatprep.mubr.bf16.mxu0 %v7072_v28  ;;  %v818_v37 = vld [vmem:[%s6903_s29 + $0x28] sm:$0xff] }
 0x1b6   : > { %4151 = vmatpush1.bf16.msra.mxu1 %v5625_v54  ;;  %4182 = vmatprep.mubr.bf16.mxu1 %v7076_v32  ;;  %v5449_v54 = vcombine.low %v822_v34, %v826_v26  ;;  %v5442_v57 = vcombine.high %v814_v35, %v818_v37  ;;  %v1054_v40 = vld [vmem:[%s6903_s29 + $0x788] sm:$0xff] }
 0x1b7   : > { %4109 = vmatprep.subr.bf16.mxu0 %v5490_v56  ;;  %4152 = vmatprep.subr.bf16.mxu1 %v5618_v59  ;;  %v5577_v56 = vcombine.low %v950_v27, %v954_v20  ;;  %v934_v59 = vld [vmem:[%s6903_s29 + $0x3c8] sm:$0xff] }
 0x1b8   : > { %v918_v11 = vld [vmem:[%s6903_s29 + $0x348] sm:$0xff] }
 0x1b9   : > { %4110 = vmatpush1.bf16.msra.mxu0 %v5489_v2  ;;  %v1066_v2 = vld [vmem:[%s6903_s29 + $0x7e8] sm:$0xff] }
 0x1ba   : > { %4153 = vmatpush1.bf16.msra.mxu1 %v5617_v3  ;;  %4111 = vmatprep.subr.bf16.mxu0 %v5482_v38  ;;  %v5441_v3 = vcombine.low %v814_v35, %v818_v37  ;;  %v5569_v38 = vcombine.low %v942_v41, %v946_v45  ;;  %v5690_v43 = vcombine.high %v1062_v0, %v1066_v2  ;;  %v922_v12 = vld [vmem:[%s6903_s29 + $0x368] sm:$0xff] }
 0x1bb   : > { %4154 = vmatprep.subr.bf16.mxu1 %v5610_v39  ;;  %v5562_v39 = vcombine.high %v934_v59, %v938_v62  ;;  %v1046_v14 = vld [vmem:[%s6903_s29 + $0x748] sm:$0xff] }
 0x1bc   : > { %v910_v19 = vld [vmem:[%s6903_s29 + $0x308] sm:$0xff] }
 0x1bd   : > { %4112 = vmatpush1.bf16.msra.mxu0 %v5481_v44  ;;  %v1058_v44 = vld [vmem:[%s6903_s29 + $0x7a8] sm:$0xff] }
 0x1be   : > { %4155 = vmatpush1.bf16.msra.mxu1 %v5609_v6  ;;  %4113 = vmatprep.subr.bf16.mxu0 %v5474_v8  ;;  %v5561_v6 = vcombine.low %v934_v59, %v938_v62  ;;  %v5689_v8 = vcombine.low %v1062_v0, %v1066_v2  ;;  %v5682_v10 = vcombine.high %v1054_v40, %v1058_v44  ;;  %v914_v21 = vld [vmem:[%s6903_s29 + $0x328] sm:$0xff] }
 0x1bf   : > { %4156 = vmatprep.subr.bf16.mxu1 %v5602_v9  ;;  %v5554_v9 = vcombine.high %v926_v4, %v930_v5  ;;  %v1038_v22 = vld [vmem:[%s6903_s29 + $0x708] sm:$0xff] }
 0x1c0   : > { %v902_v26 = vld [vmem:[%s6903_s29 + $0x2c8] sm:$0xff] }
 0x1c1   : > { %4114 = vmatpush1.bf16.msra.mxu0 %v5473_v15  ;;  %v1050_v15 = vld [vmem:[%s6903_s29 + $0x768] sm:$0xff] }
 0x1c2   : > { %4157 = vmatpush1.bf16.msra.mxu1 %v5601_v16  ;;  %4115 = vmatprep.subr.bf16.mxu0 %v5466_v17  ;;  %v5553_v16 = vcombine.low %v926_v4, %v930_v5  ;;  %v5681_v17 = vcombine.low %v1054_v40, %v1058_v44  ;;  %v5674_v18 = vcombine.high %v1046_v14, %v1050_v15  ;;  %v906_v27 = vld [vmem:[%s6903_s29 + $0x2e8] sm:$0xff] }
 0x1c3   : > { %4158 = vmatprep.subr.bf16.mxu1 %v5594_v51  ;;  %v5546_v51 = vcombine.high %v918_v11, %v922_v12  ;;  %v1030_v20 = vld [vmem:[%s6903_s29 + $0x6c8] sm:$0xff] }
 0x1c4   : > { %v894_v37 = vld [vmem:[%s6903_s29 + $0x288] sm:$0xff] }
 0x1c5   : > { %4116 = vmatpush1.bf16.msra.mxu0 %v5465_v23  ;;  %v1042_v23 = vld [vmem:[%s6903_s29 + $0x728] sm:$0xff] }
 0x1c6   : > { %4159 = vmatpush1.bf16.msra.mxu1 %v5593_v24  ;;  %4117 = vmatprep.subr.bf16.mxu0 %v5458_v25  ;;  %v5545_v24 = vcombine.low %v918_v11, %v922_v12  ;;  %v5673_v25 = vcombine.low %v1046_v14, %v1050_v15  ;;  %v5666_v34 = vcombine.high %v1038_v22, %v1042_v23  ;;  %v898_v41 = vld [vmem:[%s6903_s29 + $0x2a8] sm:$0xff] }
 0x1c7   : > { %4160 = vmatprep.subr.bf16.mxu1 %v5586_v13  ;;  %v5538_v13 = vcombine.high %v910_v19, %v914_v21  ;;  %v1022_v45 = vld [vmem:[%s6903_s29 + $0x688] sm:$0xff] }
 0x1c8   : > { %v886_v62 = vld [vmem:[%s6903_s29 + $0x248] sm:$0xff] }
 0x1c9   : > { %4118 = vmatpush1.bf16.msra.mxu0 %v5457_v29  ;;  %v1034_v29 = vld [vmem:[%s6903_s29 + $0x6e8] sm:$0xff] }
 0x1ca   : > { %4161 = vmatpush1.bf16.msra.mxu1 %v5585_v46  ;;  %4119 = vmatprep.subr.bf16.mxu0 %v5450_v30  ;;  %v5537_v46 = vcombine.low %v910_v19, %v914_v21  ;;  %v5665_v30 = vcombine.low %v1038_v22, %v1042_v23  ;;  %v5658_v35 = vcombine.high %v1030_v20, %v1034_v29  ;;  %v890_v0 = vld [vmem:[%s6903_s29 + $0x268] sm:$0xff] }
 0x1cb   : > { %4162 = vmatprep.subr.bf16.mxu1 %v5578_v33  ;;  %v5530_v33 = vcombine.high %v902_v26, %v906_v27  ;;  %v1014_v2 = vld [vmem:[%s6903_s29 + $0x648] sm:$0xff] }
 0x1cc   : > { %v878_v5 = vld [vmem:[%s6903_s29 + $0x208] sm:$0xff] }
 0x1cd   : > { %4120 = vmatpush1.bf16.msra.mxu0 %v5449_v54  ;;  %v1026_v54 = vld [vmem:[%s6903_s29 + $0x6a8] sm:$0xff] }
 0x1ce   : > { %4163 = vmatpush1.bf16.msra.mxu1 %v5577_v56  ;;  %4121 = vmatprep.subr.bf16.mxu0 %v5442_v57  ;;  %v5529_v56 = vcombine.low %v902_v26, %v906_v27  ;;  %v5657_v57 = vcombine.low %v1030_v20, %v1034_v29  ;;  %v5650_v59 = vcombine.high %v1022_v45, %v1026_v54  ;;  %v882_v40 = vld [vmem:[%s6903_s29 + $0x228] sm:$0xff] }
 0x1cf   : > { %4164 = vmatprep.subr.bf16.mxu1 %v5570_v58  ;;  %v5522_v58 = vcombine.high %v894_v37, %v898_v41  ;;  %v1006_v44 = vld [vmem:[%s6903_s29 + $0x608] sm:$0xff] }
 0x1d0   : > { %v1126_v12 = vld [vmem:[%s6903_s29 + $0x9c8] sm:$0xff] }
 0x1d1   : > { %4122 = vmatpush1.bf16.msra.mxu0 %v5441_v3  ;;  %v1018_v3 = vld [vmem:[%s6903_s29 + $0x668] sm:$0xff] }
 0x1d2   : > { %4165 = vmatpush1.bf16.msra.mxu1 %v5569_v38  ;;  %4123 = vmatprep.subr.bf16.mxu0 %v5562_v39  ;;  %v5521_v38 = vcombine.low %v894_v37, %v898_v41  ;;  %v5649_v39 = vcombine.low %v1022_v45, %v1026_v54  ;;  %v5642_v4 = vcombine.high %v1014_v2, %v1018_v3  ;;  %v1130_v14 = vld [vmem:[%s6903_s29 + $0x9e8] sm:$0xff] }
 0x1d3   : > { %4166 = vmatprep.subr.bf16.mxu1 %v5690_v43  ;;  %v5514_v43 = vcombine.high %v886_v62, %v890_v0  ;;  %v1254_v15 = vld [vmem:[%s6903_s29 + $0xdc8] sm:$0xff]  ;;  %v5753_v23 = vcombine.low %v1126_v12, %v1130_v14 }
 0x1d4   : > { %v1118_v21 = vld [vmem:[%s6903_s29 + $0x988] sm:$0xff] }
 0x1d5   : > { %4124 = vmatpush2.bf16.msra.mxu0 %v5561_v6  ;;  %v1010_v6 = vld [vmem:[%s6903_s29 + $0x628] sm:$0xff] }
 0x1d6   : > { %4167 = vmatpush2.bf16.msra.mxu1 %v5689_v8  ;;  %4125 = vmatprep.subr.bf16.mxu0 %v5554_v9  ;;  %v5513_v8 = vcombine.low %v886_v62, %v890_v0  ;;  %v5641_v9 = vcombine.low %v1014_v2, %v1018_v3  ;;  %v5634_v11 = vcombine.high %v1006_v44, %v1010_v6  ;;  %v1122_v22 = vld [vmem:[%s6903_s29 + $0x9a8] sm:$0xff] }
 0x1d7   : > { %4168 = vmatprep.subr.bf16.mxu1 %v5682_v10  ;;  %v5506_v10 = vcombine.high %v878_v5, %v882_v40  ;;  %v1110_v26 = vld [vmem:[%s6903_s29 + $0x948] sm:$0xff] }
 0x1d8   : > { %v1114_v27 = vld [vmem:[%s6903_s29 + $0x968] sm:$0xff] }
 0x1d9   : > { %4126 = vmatpush2.bf16.msra.mxu0 %v5553_v16  ;;  %v1258_v16 = vld [vmem:[%s6903_s29 + $0xde8] sm:$0xff] }
 0x1da   : > { %4169 = vmatpush2.bf16.msra.mxu1 %v5681_v17  ;;  %4127 = vmatprep.subr.bf16.mxu0 %v5546_v51  ;;  %v5505_v17 = vcombine.low %v878_v5, %v882_v40  ;;  %v5633_v51 = vcombine.low %v1006_v44, %v1010_v6  ;;  %v5882_v19 = vcombine.high %v1254_v15, %v1258_v16  ;;  %v1238_v29 = vld [vmem:[%s6903_s29 + $0xd48] sm:$0xff] }
 0x1db   : > { %4170 = vmatprep.subr.bf16.mxu1 %v5674_v18  ;;  %v5754_v18 = vcombine.high %v1126_v12, %v1130_v14  ;;  %v1102_v41 = vld [vmem:[%s6903_s29 + $0x908] sm:$0xff] }
 0x1dc   : > { %v1106_v45 = vld [vmem:[%s6903_s29 + $0x928] sm:$0xff] }
 0x1dd   : > { %4128 = vmatpush2.bf16.msra.mxu0 %v5545_v24  ;;  %v1246_v24 = vld [vmem:[%s6903_s29 + $0xd88] sm:$0xff] }
 0x1de   : > { %4171 = vmatpush2.bf16.msra.mxu1 %v5673_v25  ;;  %4129 = vmatprep.subr.bf16.mxu0 %v5538_v13  ;;  %v1250_v25 = vld [vmem:[%s6903_s29 + $0xda8] sm:$0xff]  ;;  %v5881_v13 = vcombine.low %v1254_v15, %v1258_v16 }
 0x1df   : > { %4172 = vmatprep.subr.bf16.mxu1 %v5666_v34  ;;  %v5746_v34 = vcombine.high %v1118_v21, %v1122_v22  ;;  %v5874_v20 = vcombine.high %v1246_v24, %v1250_v25  ;;  %v1230_v54 = vld [vmem:[%s6903_s29 + $0xd08] sm:$0xff] }
 0x1e0   : > { %v1094_v0 = vld [vmem:[%s6903_s29 + $0x8c8] sm:$0xff] }
 0x1e1   : > { %4130 = vmatpush2.bf16.msra.mxu0 %v5537_v46  ;;  %v1242_v46 = vld [vmem:[%s6903_s29 + $0xd68] sm:$0xff] }
 0x1e2   : > { %4173 = vmatpush2.bf16.msra.mxu1 %v5665_v30  ;;  %4131 = vmatprep.subr.bf16.mxu0 %v5530_v33  ;;  %v5745_v30 = vcombine.low %v1118_v21, %v1122_v22  ;;  %v5873_v33 = vcombine.low %v1246_v24, %v1250_v25  ;;  %v5866_v37 = vcombine.high %v1238_v29, %v1242_v46  ;;  %v1098_v2 = vld [vmem:[%s6903_s29 + $0x8e8] sm:$0xff] }
 0x1e3   : > { %4174 = vmatprep.subr.bf16.mxu1 %v5658_v35  ;;  %v5738_v35 = vcombine.high %v1110_v26, %v1114_v27  ;;  %v1222_v3 = vld [vmem:[%s6903_s29 + $0xcc8] sm:$0xff] }
 0x1e4   : > { %v1086_v40 = vld [vmem:[%s6903_s29 + $0x888] sm:$0xff] }
 0x1e5   : > { %4132 = vmatpush2.bf16.msra.mxu0 %v5529_v56  ;;  %v1234_v56 = vld [vmem:[%s6903_s29 + $0xd28] sm:$0xff] }
 0x1e6   : > { %4175 = vmatpush2.bf16.msra.mxu1 %v5657_v57  ;;  %4133 = vmatprep.subr.bf16.mxu0 %v5522_v58  ;;  %v5737_v57 = vcombine.low %v1110_v26, %v1114_v27  ;;  %v5865_v58 = vcombine.low %v1238_v29, %v1242_v46  ;;  %v5858_v62 = vcombine.high %v1230_v54, %v1234_v56  ;;  %v1090_v44 = vld [vmem:[%s6903_s29 + $0x8a8] sm:$0xff] }
 0x1e7   : > { %4176 = vmatprep.subr.bf16.mxu1 %v5650_v59  ;;  %v5730_v59 = vcombine.high %v1102_v41, %v1106_v45  ;;  %v1214_v6 = vld [vmem:[%s6903_s29 + $0xc88] sm:$0xff] }
 0x1e8   : > { %v1078_v14 = vld [vmem:[%s6903_s29 + $0x848] sm:$0xff] }
 0x1e9   : > { %4134 = vmatpush2.bf16.msra.mxu0 %v5521_v38  ;;  %v1226_v38 = vld [vmem:[%s6903_s29 + $0xce8] sm:$0xff] }
 0x1ea   : > { %4177 = vmatpush2.bf16.msra.mxu1 %v5649_v39  ;;  %4135 = vmatprep.subr.bf16.mxu0 %v5514_v43  ;;  %v5729_v39 = vcombine.low %v1102_v41, %v1106_v45  ;;  %v5857_v43 = vcombine.low %v1230_v54, %v1234_v56  ;;  %v5850_v5 = vcombine.high %v1222_v3, %v1226_v38  ;;  %v1082_v15 = vld [vmem:[%s6903_s29 + $0x868] sm:$0xff] }
 0x1eb   : > { %4178 = vmatprep.subr.bf16.mxu1 %v5642_v4  ;;  %v5722_v4 = vcombine.high %v1094_v0, %v1098_v2  ;;  %v1206_v16 = vld [vmem:[%s6903_s29 + $0xc48] sm:$0xff] }
 0x1ec   : > { %v1070_v22 = vld [vmem:[%s6903_s29 + $0x808] sm:$0xff] }
 0x1ed   : > { %4136 = vmatpush2.bf16.msra.mxu0 %v5513_v8  ;;  %v1218_v8 = vld [vmem:[%s6903_s29 + $0xca8] sm:$0xff] }
 0x1ee   : > { %4179 = vmatpush2.bf16.msra.mxu1 %v5641_v9  ;;  %4137 = vmatprep.subr.bf16.mxu0 %v5506_v10  ;;  %v5721_v9 = vcombine.low %v1094_v0, %v1098_v2  ;;  %v5849_v10 = vcombine.low %v1222_v3, %v1226_v38  ;;  %v5842_v12 = vcombine.high %v1214_v6, %v1218_v8  ;;  %v1198_v24 = vld [vmem:[%s6903_s29 + $0xc08] sm:$0xff] }
 0x1ef   : > { %4180 = vmatprep.subr.bf16.mxu1 %v5634_v11  ;;  %v5714_v11 = vcombine.high %v1086_v40, %v1090_v44  ;;  %v1202_v25 = vld [vmem:[%s6903_s29 + $0xc28] sm:$0xff] }
 0x1f0   : > { %v5826_v27 = vcombine.high %v1198_v24, %v1202_v25  ;;  %v1194_v29 = vld [vmem:[%s6903_s29 + $0xbe8] sm:$0xff] }
 0x1f1   : > { %4138 = vmatpush2.bf16.msra.mxu0 %v5505_v17  ;;  %v1210_v17 = vld [vmem:[%s6903_s29 + $0xc68] sm:$0xff] }
 0x1f2   : > { %4181 = vmatpush2.bf16.msra.mxu1 %v5633_v51  ;;  %4193 = vmatprep.subr.bf16.mxu0 %v5754_v18  ;;  %v5713_v51 = vcombine.low %v1086_v40, %v1090_v44  ;;  %v5841_v18 = vcombine.low %v1214_v6, %v1218_v8  ;;  %v5834_v21 = vcombine.high %v1206_v16, %v1210_v17  ;;  %v1318_v46 = vld [vmem:[%s6903_s29 + $0xfc8] sm:$0xff] }
 0x1f3   : > { %4236 = vmatprep.subr.bf16.mxu1 %v5882_v19  ;;  %v5706_v19 = vcombine.high %v1078_v14, %v1082_v15  ;;  %v1182_v45 = vld [vmem:[%s6903_s29 + $0xb88] sm:$0xff] }
 0x1f4   : > { %4140 = vmatmul.mubr.bf16.vlgmr.msra.gmra.mxu0 %v7074_v31  ;;  %v1186_v54 = vld [vmem:[%s6903_s29 + $0xba8] sm:$0xff] }
 0x1f5   : > { %4183 = vmatmul.mubr.bf16.vlgmr.msra.gmra.mxu1 %v7080_v36  ;;  %4194 = vmatpush1.bf16.msra.mxu0 %v5753_v23  ;;  %v1074_v23 = vld [vmem:[%s6903_s29 + $0x828] sm:$0xff] }
 0x1f6   : > { %4225 = vmatprep.mubr.bf16.mxu0 %v7102_v42  ;;  %4237 = vmatpush1.bf16.msra.mxu1 %v5881_v13  ;;  %v5705_v13 = vcombine.low %v1078_v14, %v1082_v15  ;;  %v5698_v26 = vcombine.high %v1070_v22, %v1074_v23  ;;  %v1310_v56 = vld [vmem:[%s6903_s29 + $0xf88] sm:$0xff] }
 0x1f7   : > { %4268 = vmatprep.mubr.bf16.mxu1 %v7104_v7  ;;  %4195 = vmatprep.subr.bf16.mxu0 %v5746_v34  ;;  %v5833_v34 = vcombine.low %v1206_v16, %v1210_v17  ;;  %v1174_v2 = vld [vmem:[%s6903_s29 + $0xb48] sm:$0xff] }
 0x1f8   : > { %4238 = vmatprep.subr.bf16.mxu1 %v5874_v20  ;;  %v1190_v20 = vld [vmem:[%s6903_s29 + $0xbc8] sm:$0xff] }
 0x1f9   : > { %4196 = vmatpush1.bf16.msra.mxu0 %v5745_v30  ;;  %v1322_v30 = vld [vmem:[%s6903_s29 + $0xfe8] sm:$0xff] }
 0x1fa   : > { %4239 = vmatpush1.bf16.msra.mxu1 %v5873_v33  ;;  %4197 = vmatprep.subr.bf16.mxu0 %v5738_v35  ;;  %v5697_v33 = vcombine.low %v1070_v22, %v1074_v23  ;;  %v5825_v35 = vcombine.low %v1198_v24, %v1202_v25  ;;  %v5946_v41 = vcombine.high %v1318_v46, %v1322_v30  ;;  %v1178_v3 = vld [vmem:[%s6903_s29 + $0xb68] sm:$0xff] }
 0x1fb   : > { %4240 = vmatprep.subr.bf16.mxu1 %v5866_v37  ;;  %v5818_v37 = vcombine.high %v1190_v20, %v1194_v29  ;;  %v1302_v38 = vld [vmem:[%s6903_s29 + $0xf48] sm:$0xff] }
 0x1fc   : > { %v1166_v44 = vld [vmem:[%s6903_s29 + $0xb08] sm:$0xff] }
 0x1fd   : > { %4198 = vmatpush1.bf16.msra.mxu0 %v5737_v57  ;;  %v1314_v57 = vld [vmem:[%s6903_s29 + $0xfa8] sm:$0xff] }
 0x1fe   : > { %4241 = vmatpush1.bf16.msra.mxu1 %v5865_v58  ;;  %4199 = vmatprep.subr.bf16.mxu0 %v5730_v59  ;;  %v5817_v58 = vcombine.low %v1190_v20, %v1194_v29  ;;  %v5945_v59 = vcombine.low %v1318_v46, %v1322_v30  ;;  %v5938_v0 = vcombine.high %v1310_v56, %v1314_v57  ;;  %v1170_v6 = vld [vmem:[%s6903_s29 + $0xb28] sm:$0xff] }
 0x1ff   : > { %4242 = vmatprep.subr.bf16.mxu1 %v5858_v62  ;;  %v5810_v62 = vcombine.high %v1182_v45, %v1186_v54  ;;  %v1294_v8 = vld [vmem:[%s6903_s29 + $0xf08] sm:$0xff] }
 0x200   : > { %v1158_v15 = vld [vmem:[%s6903_s29 + $0xac8] sm:$0xff] }
 0x201   : > { %4200 = vmatpush1.bf16.msra.mxu0 %v5729_v39  ;;  %v1306_v39 = vld [vmem:[%s6903_s29 + $0xf68] sm:$0xff] }
 0x202   : > { %4243 = vmatpush1.bf16.msra.mxu1 %v5857_v43  ;;  %4201 = vmatprep.subr.bf16.mxu0 %v5722_v4  ;;  %v5809_v43 = vcombine.low %v1182_v45, %v1186_v54  ;;  %v5937_v4 = vcombine.low %v1310_v56, %v1314_v57  ;;  %v5930_v40 = vcombine.high %v1302_v38, %v1306_v39  ;;  %v1162_v16 = vld [vmem:[%s6903_s29 + $0xae8] sm:$0xff] }
 0x203   : > { %4244 = vmatprep.subr.bf16.mxu1 %v5850_v5  ;;  %v5802_v5 = vcombine.high %v1174_v2, %v1178_v3  ;;  %v1286_v17 = vld [vmem:[%s6903_s29 + $0xec8] sm:$0xff] }
 0x204   : > { %v1150_v23 = vld [vmem:[%s6903_s29 + $0xa88] sm:$0xff] }
 0x205   : > { %4202 = vmatpush1.bf16.msra.mxu0 %v5721_v9  ;;  %v1298_v9 = vld [vmem:[%s6903_s29 + $0xf28] sm:$0xff] }
 0x206   : > { %4245 = vmatpush1.bf16.msra.mxu1 %v5849_v10  ;;  %4203 = vmatprep.subr.bf16.mxu0 %v5714_v11  ;;  %v5801_v10 = vcombine.low %v1174_v2, %v1178_v3  ;;  %v5929_v11 = vcombine.low %v1302_v38, %v1306_v39  ;;  %v5922_v14 = vcombine.high %v1294_v8, %v1298_v9  ;;  %v1154_v24 = vld [vmem:[%s6903_s29 + $0xaa8] sm:$0xff]  ;;  %v871_v3 = vld [vmem:[%s6903_s29 + $0x1d0] sm:$0xff] }
 0x207   : > { %4246 = vmatprep.subr.bf16.mxu1 %v5842_v12  ;;  %v5794_v12 = vcombine.high %v1166_v44, %v1170_v6  ;;  %v1278_v25 = vld [vmem:[%s6903_s29 + $0xe88] sm:$0xff]  ;;  %v875_v38 = vld [vmem:[%s6903_s29 + $0x1f0] sm:$0xff] }
 0x208   : > { %v1142_v29 = vld [vmem:[%s6903_s29 + $0xa48] sm:$0xff]  ;;  %v999_v39 = vld [vmem:[%s6903_s29 + $0x5d0] sm:$0xff] }
 0x209   : > { %4204 = vmatpush1.bf16.msra.mxu0 %v5713_v51  ;;  %v1290_v51 = vld [vmem:[%s6903_s29 + $0xee8] sm:$0xff] }
 0x20a   : > { %4247 = vmatpush1.bf16.msra.mxu1 %v5841_v18  ;;  %4205 = vmatprep.subr.bf16.mxu0 %v5706_v19  ;;  %v5793_v18 = vcombine.low %v1166_v44, %v1170_v6  ;;  %v5921_v19 = vcombine.low %v1294_v8, %v1298_v9  ;;  %v5914_v22 = vcombine.high %v1286_v17, %v1290_v51  ;;  %v1146_v46 = vld [vmem:[%s6903_s29 + $0xa68] sm:$0xff]  ;;  %v863_v6 = vld [vmem:[%s6903_s29 + $0x190] sm:$0xff] }
 0x20b   : > { %4248 = vmatprep.subr.bf16.mxu1 %v5834_v21  ;;  %v5786_v21 = vcombine.high %v1158_v15, %v1162_v16  ;;  %v1270_v30 = vld [vmem:[%s6903_s29 + $0xe48] sm:$0xff]  ;;  %v867_v8 = vld [vmem:[%s6903_s29 + $0x1b0] sm:$0xff]  ;;  %v5499_v9 = vcombine.low %v871_v3, %v875_v38 }
 0x20c   : > { %v1134_v54 = vld [vmem:[%s6903_s29 + $0xa08] sm:$0xff] }
 0x20d   : > { %4206 = vmatpush1.bf16.msra.mxu0 %v5705_v13  ;;  %v1282_v13 = vld [vmem:[%s6903_s29 + $0xea8] sm:$0xff] }
 0x20e   : > { %4249 = vmatpush1.bf16.msra.mxu1 %v5833_v34  ;;  %4207 = vmatprep.subr.bf16.mxu0 %v5698_v26  ;;  %v5785_v34 = vcombine.low %v1158_v15, %v1162_v16  ;;  %v5913_v26 = vcombine.low %v1286_v17, %v1290_v51  ;;  %v5906_v20 = vcombine.high %v1278_v25, %v1282_v13  ;;  %v1138_v56 = vld [vmem:[%s6903_s29 + $0xa28] sm:$0xff]  ;;  %v855_v15 = vld [vmem:[%s6903_s29 + $0x150] sm:$0xff] }
 0x20f   : > { %4250 = vmatprep.subr.bf16.mxu1 %v5826_v27  ;;  %v5778_v27 = vcombine.high %v1150_v23, %v1154_v24  ;;  %v1262_v57 = vld [vmem:[%s6903_s29 + $0xe08] sm:$0xff]  ;;  %v859_v16 = vld [vmem:[%s6903_s29 + $0x170] sm:$0xff] }
 0x210   : > { %v983_v51 = vld [vmem:[%s6903_s29 + $0x550] sm:$0xff] }
 0x211   : > { %4208 = vmatpush1.bf16.msra.mxu0 %v5697_v33  ;;  %v1274_v33 = vld [vmem:[%s6903_s29 + $0xe68] sm:$0xff] }
 0x212   : > { %4251 = vmatpush1.bf16.msra.mxu1 %v5825_v35  ;;  %4209 = vmatprep.subr.bf16.mxu0 %v5818_v37  ;;  %v5777_v35 = vcombine.low %v1150_v23, %v1154_v24  ;;  %v5905_v37 = vcombine.low %v1278_v25, %v1282_v13  ;;  %v5898_v45 = vcombine.high %v1270_v30, %v1274_v33  ;;  %v847_v24 = vld [vmem:[%s6903_s29 + $0x110] sm:$0xff] }
 0x213   : > { %4252 = vmatprep.subr.bf16.mxu1 %v5946_v41  ;;  %v5770_v41 = vcombine.high %v1142_v29, %v1146_v46  ;;  %v851_v25 = vld [vmem:[%s6903_s29 + $0x130] sm:$0xff] }
 0x214   : > { %v975_v13 = vld [vmem:[%s6903_s29 + $0x510] sm:$0xff] }
 0x215   : > { %4210 = vmatpush2.bf16.msra.mxu0 %v5817_v58  ;;  %v1266_v58 = vld [vmem:[%s6903_s29 + $0xe28] sm:$0xff] }
 0x216   : > { %4253 = vmatpush2.bf16.msra.mxu1 %v5945_v59  ;;  %4211 = vmatprep.subr.bf16.mxu0 %v5810_v62  ;;  %v5769_v59 = vcombine.low %v1142_v29, %v1146_v46  ;;  %v5897_v62 = vcombine.low %v1270_v30, %v1274_v33  ;;  %v5890_v2 = vcombine.high %v1262_v57, %v1266_v58  ;;  %v839_v46 = vld [vmem:[%s6903_s29 + $0xd0] sm:$0xff] }
 0x217   : > { %4254 = vmatprep.subr.bf16.mxu1 %v5938_v0  ;;  %v5762_v0 = vcombine.high %v1134_v54, %v1138_v56  ;;  %v843_v30 = vld [vmem:[%s6903_s29 + $0xf0] sm:$0xff] }
 0x218   : > { %v967_v33 = vld [vmem:[%s6903_s29 + $0x4d0] sm:$0xff] }
 0x219   : > { %4212 = vmatpush2.bf16.msra.mxu0 %v5809_v43  ;;  %v1003_v43 = vld [vmem:[%s6903_s29 + $0x5f0] sm:$0xff] }
 0x21a   : > { %4255 = vmatpush2.bf16.msra.mxu1 %v5937_v4  ;;  %4213 = vmatprep.subr.bf16.mxu0 %v5802_v5  ;;  %v5761_v4 = vcombine.low %v1134_v54, %v1138_v56  ;;  %v5889_v5 = vcombine.low %v1262_v57, %v1266_v58  ;;  %v5628_v44 = vcombine.high %v999_v39, %v1003_v43  ;;  %v831_v56 = vld [vmem:[%s6903_s29 + $0x90] sm:$0xff] }
 0x21b   : > { %4256 = vmatprep.subr.bf16.mxu1 %v5930_v40  ;;  %v5500_v40 = vcombine.high %v871_v3, %v875_v38  ;;  %v835_v57 = vld [vmem:[%s6903_s29 + $0xb0] sm:$0xff] }
 0x21c   : > { %v959_v58 = vld [vmem:[%s6903_s29 + $0x490] sm:$0xff] }
 0x21d   : > { %4214 = vmatpush2.bf16.msra.mxu0 %v5801_v10  ;;  %v991_v10 = vld [vmem:[%s6903_s29 + $0x590] sm:$0xff] }
 0x21e   : > { %4257 = vmatpush2.bf16.msra.mxu1 %v5929_v11  ;;  %4215 = vmatprep.subr.bf16.mxu0 %v5794_v12  ;;  %v995_v11 = vld [vmem:[%s6903_s29 + $0x5b0] sm:$0xff]  ;;  %v5627_v12 = vcombine.low %v999_v39, %v1003_v43 }
 0x21f   : > { %4258 = vmatprep.subr.bf16.mxu1 %v5922_v14  ;;  %v5492_v14 = vcombine.high %v863_v6, %v867_v8  ;;  %v5620_v17 = vcombine.high %v991_v10, %v995_v11  ;;  %v823_v38 = vld [vmem:[%s6903_s29 + $0x50] sm:$0xff] }
 0x220   : > { %v827_v39 = vld [vmem:[%s6903_s29 + $0x70] sm:$0xff] }
 0x221   : > { %4216 = vmatpush2.bf16.msra.mxu0 %v5793_v18  ;;  %v987_v18 = vld [vmem:[%s6903_s29 + $0x570] sm:$0xff] }
 0x222   : > { %4259 = vmatpush2.bf16.msra.mxu1 %v5921_v19  ;;  %4217 = vmatprep.subr.bf16.mxu0 %v5786_v21  ;;  %v5491_v19 = vcombine.low %v863_v6, %v867_v8  ;;  %v5619_v21 = vcombine.low %v991_v10, %v995_v11  ;;  %v5612_v23 = vcombine.high %v983_v51, %v987_v18  ;;  %v951_v43 = vld [vmem:[%s6903_s29 + $0x450] sm:$0xff] }
 0x223   : > { %4260 = vmatprep.subr.bf16.mxu1 %v5914_v22  ;;  %v5484_v22 = vcombine.high %v855_v15, %v859_v16  ;;  %v815_v8 = vld [vmem:[%s6903_s29 + $0x10] sm:$0xff] }
 0x224   : > { %v943_v10 = vld [vmem:[%s6903_s29 + $0x410] sm:$0xff] }
 0x225   : > { %4218 = vmatpush2.bf16.msra.mxu0 %v5785_v34  ;;  %v979_v34 = vld [vmem:[%s6903_s29 + $0x530] sm:$0xff] }
 0x226   : > { %4261 = vmatpush2.bf16.msra.mxu1 %v5913_v26  ;;  %4219 = vmatprep.subr.bf16.mxu0 %v5778_v27  ;;  %v5483_v26 = vcombine.low %v855_v15, %v859_v16  ;;  %v5611_v27 = vcombine.low %v983_v51, %v987_v18  ;;  %v5604_v29 = vcombine.high %v975_v13, %v979_v34  ;;  %v947_v11 = vld [vmem:[%s6903_s29 + $0x430] sm:$0xff] }
 0x227   : > { %4262 = vmatprep.subr.bf16.mxu1 %v5906_v20  ;;  %v5476_v20 = vcombine.high %v847_v24, %v851_v25  ;;  %v5572_v16 = vcombine.high %v943_v10, %v947_v11  ;;  %v939_v51 = vld [vmem:[%s6903_s29 + $0x3f0] sm:$0xff] }
 0x228   : > { %v1063_v18 = vld [vmem:[%s6903_s29 + $0x7d0] sm:$0xff] }
 0x229   : > { %4220 = vmatpush2.bf16.msra.mxu0 %v5777_v35  ;;  %v971_v35 = vld [vmem:[%s6903_s29 + $0x4f0] sm:$0xff] }
 0x22a   : > { %4263 = vmatpush2.bf16.msra.mxu1 %v5905_v37  ;;  %4221 = vmatprep.subr.bf16.mxu0 %v5770_v41  ;;  %v5475_v37 = vcombine.low %v847_v24, %v851_v25  ;;  %v5603_v41 = vcombine.low %v975_v13, %v979_v34  ;;  %v5596_v54 = vcombine.high %v967_v33, %v971_v35  ;;  %v927_v25 = vld [vmem:[%s6903_s29 + $0x390] sm:$0xff] }
 0x22b   : > { %4264 = vmatprep.subr.bf16.mxu1 %v5898_v45  ;;  %v5468_v45 = vcombine.high %v839_v46, %v843_v30  ;;  %v931_v13 = vld [vmem:[%s6903_s29 + $0x3b0] sm:$0xff] }
 0x22c   : > { %v1055_v34 = vld [vmem:[%s6903_s29 + $0x790] sm:$0xff] }
 0x22d   : > { %4222 = vmatpush2.bf16.msra.mxu0 %v5769_v59  ;;  %v963_v59 = vld [vmem:[%s6903_s29 + $0x4b0] sm:$0xff] }
 0x22e   : > { %4265 = vmatpush2.bf16.msra.mxu1 %v5897_v62  ;;  %4223 = vmatprep.subr.bf16.mxu0 %v5762_v0  ;;  %v5467_v62 = vcombine.low %v839_v46, %v843_v30  ;;  %v5595_v0 = vcombine.low %v967_v33, %v971_v35  ;;  %v5588_v3 = vcombine.high %v959_v58, %v963_v59  ;;  %v919_v30 = vld [vmem:[%s6903_s29 + $0x350] sm:$0xff] }
 0x22f   : > { %4266 = vmatprep.subr.bf16.mxu1 %v5890_v2  ;;  %v5460_v2 = vcombine.high %v831_v56, %v835_v57  ;;  %v923_v33 = vld [vmem:[%s6903_s29 + $0x370] sm:$0xff] }
 0x230   : > { %v1047_v35 = vld [vmem:[%s6903_s29 + $0x750] sm:$0xff] }
 0x231   : > { %4224 = vmatpush2.bf16.msra.mxu0 %v5761_v4  ;;  %v955_v4 = vld [vmem:[%s6903_s29 + $0x470] sm:$0xff] }
 0x232   : > { %4267 = vmatpush2.bf16.msra.mxu1 %v5889_v5  ;;  %4279 = vmatprep.subr.bf16.mxu0 %v5500_v40  ;;  %v5459_v5 = vcombine.low %v831_v56, %v835_v57  ;;  %v5587_v40 = vcombine.low %v959_v58, %v963_v59  ;;  %v5580_v6 = vcombine.high %v951_v43, %v955_v4  ;;  %v911_v57 = vld [vmem:[%s6903_s29 + $0x310] sm:$0xff] }
 0x233   : > { %4322 = vmatprep.subr.bf16.mxu1 %v5628_v44  ;;  %v5452_v44 = vcombine.high %v823_v38, %v827_v39  ;;  %v915_v58 = vld [vmem:[%s6903_s29 + $0x330] sm:$0xff] }
 0x234   : > { %4226 = vmatmul.mubr.bf16.vlgmr.msra.gmra.mxu0 %v7176_v53  ;;  %v1039_v59 = vld [vmem:[%s6903_s29 + $0x710] sm:$0xff] }
 0x235   : > { %4269 = vmatmul.mubr.bf16.vlgmr.msra.gmra.mxu1 %v7178_v55  ;;  %4280 = vmatpush1.bf16.msra.mxu0 %v5499_v9  ;;  %v819_v9 = vld [vmem:[%s6903_s29 + $0x30] sm:$0xff] }
 0x236   : > { %4311 = vmatprep.mubr.bf16.mxu0 %v7072_v28  ;;  %4323 = vmatpush1.bf16.msra.mxu1 %v5627_v12  ;;  %v5451_v12 = vcombine.low %v823_v38, %v827_v39  ;;  %v5444_v15 = vcombine.high %v815_v8, %v819_v9  ;;  %v903_v39 = vld [vmem:[%s6903_s29 + $0x2d0] sm:$0xff] }
 0x237   : > { %4354 = vmatprep.mubr.bf16.mxu1 %v7076_v32  ;;  %4281 = vmatprep.subr.bf16.mxu0 %v5492_v14  ;;  %v5579_v14 = vcombine.low %v951_v43, %v955_v4  ;;  %v907_v43 = vld [vmem:[%s6903_s29 + $0x2f0] sm:$0xff] }
 0x238   : > { %4324 = vmatprep.subr.bf16.mxu1 %v5620_v17  ;;  %v935_v17 = vld [vmem:[%s6903_s29 + $0x3d0] sm:$0xff] }
 0x239   : > { %4282 = vmatpush1.bf16.msra.mxu0 %v5491_v19  ;;  %v1067_v19 = vld [vmem:[%s6903_s29 + $0x7f0] sm:$0xff] }
 0x23a   : > { %4325 = vmatpush1.bf16.msra.mxu1 %v5619_v21  ;;  %4283 = vmatprep.subr.bf16.mxu0 %v5484_v22  ;;  %v5443_v21 = vcombine.low %v815_v8, %v819_v9  ;;  %v5571_v22 = vcombine.low %v943_v10, %v947_v11  ;;  %v5692_v24 = vcombine.high %v1063_v18, %v1067_v19  ;;  %v1031_v4 = vld [vmem:[%s6903_s29 + $0x6d0] sm:$0xff] }
 0x23b   : > { %4326 = vmatprep.subr.bf16.mxu1 %v5612_v23  ;;  %v5564_v23 = vcombine.high %v935_v17, %v939_v51  ;;  %v895_v9 = vld [vmem:[%s6903_s29 + $0x290] sm:$0xff] }
 0x23c   : > { %v899_v10 = vld [vmem:[%s6903_s29 + $0x2b0] sm:$0xff] }
 0x23d   : > { %4284 = vmatpush1.bf16.msra.mxu0 %v5483_v26  ;;  %v1059_v26 = vld [vmem:[%s6903_s29 + $0x7b0] sm:$0xff] }
 0x23e   : > { %4327 = vmatpush1.bf16.msra.mxu1 %v5611_v27  ;;  %4285 = vmatprep.subr.bf16.mxu0 %v5476_v20  ;;  %v5563_v27 = vcombine.low %v935_v17, %v939_v51  ;;  %v5691_v20 = vcombine.low %v1063_v18, %v1067_v19  ;;  %v5684_v46 = vcombine.high %v1055_v34, %v1059_v26  ;;  %v1023_v11 = vld [vmem:[%s6903_s29 + $0x690] sm:$0xff] }
 0x23f   : > { %4328 = vmatprep.subr.bf16.mxu1 %v5604_v29  ;;  %v5556_v29 = vcombine.high %v927_v25, %v931_v13  ;;  %v887_v51 = vld [vmem:[%s6903_s29 + $0x250] sm:$0xff] }
 0x240   : > { %v891_v18 = vld [vmem:[%s6903_s29 + $0x270] sm:$0xff] }
 0x241   : > { %4286 = vmatpush1.bf16.msra.mxu0 %v5475_v37  ;;  %v1051_v37 = vld [vmem:[%s6903_s29 + $0x770] sm:$0xff] }
 0x242   : > { %4329 = vmatpush1.bf16.msra.mxu1 %v5603_v41  ;;  %4287 = vmatprep.subr.bf16.mxu0 %v5468_v45  ;;  %v5555_v41 = vcombine.low %v927_v25, %v931_v13  ;;  %v5683_v45 = vcombine.low %v1055_v34, %v1059_v26  ;;  %v5676_v56 = vcombine.high %v1047_v35, %v1051_v37  ;;  %v1015_v19 = vld [vmem:[%s6903_s29 + $0x650] sm:$0xff] }
 0x243   : > { %4330 = vmatprep.subr.bf16.mxu1 %v5596_v54  ;;  %v5548_v54 = vcombine.high %v919_v30, %v923_v33  ;;  %v879_v13 = vld [vmem:[%s6903_s29 + $0x210] sm:$0xff] }
 0x244   : > { %v883_v34 = vld [vmem:[%s6903_s29 + $0x230] sm:$0xff] }
 0x245   : > { %4288 = vmatpush1.bf16.msra.mxu0 %v5467_v62  ;;  %v1043_v62 = vld [vmem:[%s6903_s29 + $0x730] sm:$0xff] }
 0x246   : > { %4331 = vmatpush1.bf16.msra.mxu1 %v5595_v0  ;;  %4289 = vmatprep.subr.bf16.mxu0 %v5460_v2  ;;  %v5547_v0 = vcombine.low %v919_v30, %v923_v33  ;;  %v5675_v2 = vcombine.low %v1047_v35, %v1051_v37  ;;  %v5668_v38 = vcombine.high %v1039_v59, %v1043_v62  ;;  %v1007_v26 = vld [vmem:[%s6903_s29 + $0x610] sm:$0xff] }
 0x247   : > { %4332 = vmatprep.subr.bf16.mxu1 %v5588_v3  ;;  %v5540_v3 = vcombine.high %v911_v57, %v915_v58  ;;  %v1127_v33 = vld [vmem:[%s6903_s29 + $0x9d0] sm:$0xff] }
 0x248   : > { %v1131_v35 = vld [vmem:[%s6903_s29 + $0x9f0] sm:$0xff] }
 0x249   : > { %4290 = vmatpush1.bf16.msra.mxu0 %v5459_v5  ;;  %v1035_v5 = vld [vmem:[%s6903_s29 + $0x6f0] sm:$0xff] }
 0x24a   : > { %4333 = vmatpush1.bf16.msra.mxu1 %v5587_v40  ;;  %4291 = vmatprep.subr.bf16.mxu0 %v5452_v44  ;;  %v5539_v40 = vcombine.low %v911_v57, %v915_v58  ;;  %v5667_v44 = vcombine.low %v1039_v59, %v1043_v62  ;;  %v5660_v8 = vcombine.high %v1031_v4, %v1035_v5  ;;  %v1255_v37 = vld [vmem:[%s6903_s29 + $0xdd0] sm:$0xff] }
 0x24b   : > { %4334 = vmatprep.subr.bf16.mxu1 %v5580_v6  ;;  %v5532_v6 = vcombine.high %v903_v39, %v907_v43  ;;  %v1119_v58 = vld [vmem:[%s6903_s29 + $0x990] sm:$0xff]  ;;  %v5755_v62 = vcombine.low %v1127_v33, %v1131_v35 }
 0x24c   : > { %v1123_v59 = vld [vmem:[%s6903_s29 + $0x9b0] sm:$0xff] }
 0x24d   : > { %4292 = vmatpush1.bf16.msra.mxu0 %v5451_v12  ;;  %v1027_v12 = vld [vmem:[%s6903_s29 + $0x6b0] sm:$0xff] }
 0x24e   : > { %4335 = vmatpush1.bf16.msra.mxu1 %v5579_v14  ;;  %4293 = vmatprep.subr.bf16.mxu0 %v5444_v15  ;;  %v5531_v14 = vcombine.low %v903_v39, %v907_v43  ;;  %v5659_v15 = vcombine.low %v1031_v4, %v1035_v5  ;;  %v5652_v17 = vcombine.high %v1023_v11, %v1027_v12  ;;  %v1111_v39 = vld [vmem:[%s6903_s29 + $0x950] sm:$0xff] }
 0x24f   : > { %4336 = vmatprep.subr.bf16.mxu1 %v5572_v16  ;;  %v5524_v16 = vcombine.high %v895_v9, %v899_v10  ;;  %v1115_v43 = vld [vmem:[%s6903_s29 + $0x970] sm:$0xff] }
 0x250   : > { %v1239_v5 = vld [vmem:[%s6903_s29 + $0xd50] sm:$0xff] }
 0x251   : > { %4294 = vmatpush1.bf16.msra.mxu0 %v5443_v21  ;;  %v1019_v21 = vld [vmem:[%s6903_s29 + $0x670] sm:$0xff] }
 0x252   : > { %4337 = vmatpush1.bf16.msra.mxu1 %v5571_v22  ;;  %4295 = vmatprep.subr.bf16.mxu0 %v5564_v23  ;;  %v5523_v22 = vcombine.low %v895_v9, %v899_v10  ;;  %v5651_v23 = vcombine.low %v1023_v11, %v1027_v12  ;;  %v5644_v25 = vcombine.high %v1015_v19, %v1019_v21  ;;  %v1103_v10 = vld [vmem:[%s6903_s29 + $0x910] sm:$0xff] }
 0x253   : > { %4338 = vmatprep.subr.bf16.mxu1 %v5692_v24  ;;  %v5516_v24 = vcombine.high %v887_v51, %v891_v18  ;;  %v1107_v11 = vld [vmem:[%s6903_s29 + $0x930] sm:$0xff] }
 0x254   : > { %v1231_v12 = vld [vmem:[%s6903_s29 + $0xd10] sm:$0xff] }
 0x255   : > { %4296 = vmatpush2.bf16.msra.mxu0 %v5563_v27  ;;  %v1011_v27 = vld [vmem:[%s6903_s29 + $0x630] sm:$0xff] }
 0x256   : > { %4339 = vmatpush2.bf16.msra.mxu1 %v5691_v20  ;;  %4297 = vmatprep.subr.bf16.mxu0 %v5556_v29  ;;  %v5515_v20 = vcombine.low %v887_v51, %v891_v18  ;;  %v5643_v29 = vcombine.low %v1015_v19, %v1019_v21  ;;  %v5636_v30 = vcombine.high %v1007_v26, %v1011_v27  ;;  %v1095_v18 = vld [vmem:[%s6903_s29 + $0x8d0] sm:$0xff] }
 0x257   : > { %4340 = vmatprep.subr.bf16.mxu1 %v5684_v46  ;;  %v5508_v46 = vcombine.high %v879_v13, %v883_v34  ;;  %v1099_v19 = vld [vmem:[%s6903_s29 + $0x8f0] sm:$0xff] }
 0x258   : > { %v1223_v21 = vld [vmem:[%s6903_s29 + $0xcd0] sm:$0xff] }
 0x259   : > { %4298 = vmatpush2.bf16.msra.mxu0 %v5555_v41  ;;  %v1259_v41 = vld [vmem:[%s6903_s29 + $0xdf0] sm:$0xff] }
 0x25a   : > { %4341 = vmatpush2.bf16.msra.mxu1 %v5683_v45  ;;  %4299 = vmatprep.subr.bf16.mxu0 %v5548_v54  ;;  %v5507_v45 = vcombine.low %v879_v13, %v883_v34  ;;  %v5635_v54 = vcombine.low %v1007_v26, %v1011_v27  ;;  %v5884_v57 = vcombine.high %v1255_v37, %v1259_v41  ;;  %v1087_v34 = vld [vmem:[%s6903_s29 + $0x890] sm:$0xff] }
 0x25b   : > { %4342 = vmatprep.subr.bf16.mxu1 %v5676_v56  ;;  %v5756_v56 = vcombine.high %v1127_v33, %v1131_v35  ;;  %v1091_v26 = vld [vmem:[%s6903_s29 + $0x8b0] sm:$0xff] }
 0x25c   : > { %v1215_v27 = vld [vmem:[%s6903_s29 + $0xc90] sm:$0xff] }
 0x25d   : > { %4300 = vmatpush2.bf16.msra.mxu0 %v5547_v0  ;;  %v1247_v0 = vld [vmem:[%s6903_s29 + $0xd90] sm:$0xff] }
 0x25e   : > { %4343 = vmatpush2.bf16.msra.mxu1 %v5675_v2  ;;  %4301 = vmatprep.subr.bf16.mxu0 %v5540_v3  ;;  %v1251_v2 = vld [vmem:[%s6903_s29 + $0xdb0] sm:$0xff]  ;;  %v5883_v3 = vcombine.low %v1255_v37, %v1259_v41 }
 0x25f   : > { %4344 = vmatprep.subr.bf16.mxu1 %v5668_v38  ;;  %v5748_v38 = vcombine.high %v1119_v58, %v1123_v59  ;;  %v5876_v4 = vcombine.high %v1247_v0, %v1251_v2  ;;  %v1079_v35 = vld [vmem:[%s6903_s29 + $0x850] sm:$0xff] }
 0x260   : > { %v1083_v37 = vld [vmem:[%s6903_s29 + $0x870] sm:$0xff] }
 0x261   : > { %4302 = vmatpush2.bf16.msra.mxu0 %v5539_v40  ;;  %v1243_v40 = vld [vmem:[%s6903_s29 + $0xd70] sm:$0xff] }
 0x262   : > { %4345 = vmatpush2.bf16.msra.mxu1 %v5667_v44  ;;  %4303 = vmatprep.subr.bf16.mxu0 %v5532_v6  ;;  %v5747_v44 = vcombine.low %v1119_v58, %v1123_v59  ;;  %v5875_v6 = vcombine.low %v1247_v0, %v1251_v2  ;;  %v5868_v9 = vcombine.high %v1239_v5, %v1243_v40  ;;  %v1207_v41 = vld [vmem:[%s6903_s29 + $0xc50] sm:$0xff] }
 0x263   : > { %4346 = vmatprep.subr.bf16.mxu1 %v5660_v8  ;;  %v5740_v8 = vcombine.high %v1111_v39, %v1115_v43  ;;  %v1071_v59 = vld [vmem:[%s6903_s29 + $0x810] sm:$0xff] }
 0x264   : > { %v1199_v0 = vld [vmem:[%s6903_s29 + $0xc10] sm:$0xff] }
 0x265   : > { %4304 = vmatpush2.bf16.msra.mxu0 %v5531_v14  ;;  %v1235_v14 = vld [vmem:[%s6903_s29 + $0xd30] sm:$0xff] }
 0x266   : > { %4347 = vmatpush2.bf16.msra.mxu1 %v5659_v15  ;;  %4305 = vmatprep.subr.bf16.mxu0 %v5524_v16  ;;  %v5739_v15 = vcombine.low %v1111_v39, %v1115_v43  ;;  %v5867_v16 = vcombine.low %v1239_v5, %v1243_v40  ;;  %v5860_v51 = vcombine.high %v1231_v12, %v1235_v14  ;;  %v1203_v2 = vld [vmem:[%s6903_s29 + $0xc30] sm:$0xff] }
 0x267   : > { %4348 = vmatprep.subr.bf16.mxu1 %v5652_v17  ;;  %v5732_v17 = vcombine.high %v1103_v10, %v1107_v11  ;;  %v5828_v43 = vcombine.high %v1199_v0, %v1203_v2  ;;  %v1195_v5 = vld [vmem:[%s6903_s29 + $0xbf0] sm:$0xff] }
 0x268   : > { %v1319_v40 = vld [vmem:[%s6903_s29 + $0xfd0] sm:$0xff] }
 0x269   : > { %4306 = vmatpush2.bf16.msra.mxu0 %v5523_v22  ;;  %v1227_v22 = vld [vmem:[%s6903_s29 + $0xcf0] sm:$0xff] }
 0x26a   : > { %4349 = vmatpush2.bf16.msra.mxu1 %v5651_v23  ;;  %4307 = vmatprep.subr.bf16.mxu0 %v5516_v24  ;;  %v5731_v23 = vcombine.low %v1103_v10, %v1107_v11  ;;  %v5859_v24 = vcombine.low %v1231_v12, %v1235_v14  ;;  %v5852_v13 = vcombine.high %v1223_v21, %v1227_v22  ;;  %v1183_v11 = vld [vmem:[%s6903_s29 + $0xb90] sm:$0xff] }
 0x26b   : > { %4350 = vmatprep.subr.bf16.mxu1 %v5644_v25  ;;  %v5724_v25 = vcombine.high %v1095_v18, %v1099_v19  ;;  %v1187_v12 = vld [vmem:[%s6903_s29 + $0xbb0] sm:$0xff] }
 0x26c   : > { %v1311_v14 = vld [vmem:[%s6903_s29 + $0xf90] sm:$0xff] }
 0x26d   : > { %4308 = vmatpush2.bf16.msra.mxu0 %v5515_v20  ;;  %v1219_v20 = vld [vmem:[%s6903_s29 + $0xcb0] sm:$0xff] }
 0x26e   : > { %4351 = vmatpush2.bf16.msra.mxu1 %v5643_v29  ;;  %4309 = vmatprep.subr.bf16.mxu0 %v5508_v46  ;;  %v5723_v29 = vcombine.low %v1095_v18, %v1099_v19  ;;  %v5851_v46 = vcombine.low %v1223_v21, %v1227_v22  ;;  %v5844_v33 = vcombine.high %v1215_v27, %v1219_v20  ;;  %v1175_v19 = vld [vmem:[%s6903_s29 + $0xb50] sm:$0xff] }
 0x26f   : > { %4352 = vmatprep.subr.bf16.mxu1 %v5636_v30  ;;  %v5716_v30 = vcombine.high %v1087_v34, %v1091_v26  ;;  %v1179_v21 = vld [vmem:[%s6903_s29 + $0xb70] sm:$0xff] }
 0x270   : > { %v1303_v22 = vld [vmem:[%s6903_s29 + $0xf50] sm:$0xff] }
 0x271   : > { %4310 = vmatpush2.bf16.msra.mxu0 %v5507_v45  ;;  %v1211_v45 = vld [vmem:[%s6903_s29 + $0xc70] sm:$0xff] }
 0x272   : > { %4353 = vmatpush2.bf16.msra.mxu1 %v5635_v54  ;;  %4365 = vmatprep.subr.bf16.mxu0 %v5756_v56  ;;  %v5715_v54 = vcombine.low %v1087_v34, %v1091_v26  ;;  %v5843_v56 = vcombine.low %v1215_v27, %v1219_v20  ;;  %v5836_v58 = vcombine.high %v1207_v41, %v1211_v45  ;;  %v1167_v26 = vld [vmem:[%s6903_s29 + $0xb10] sm:$0xff] }
 0x273   : > { %4408 = vmatprep.subr.bf16.mxu1 %v5884_v57  ;;  %v5708_v57 = vcombine.high %v1079_v35, %v1083_v37  ;;  %v1171_v27 = vld [vmem:[%s6903_s29 + $0xb30] sm:$0xff] }
 0x274   : > { %4312 = vmatmul.mubr.bf16.vlgmr.msra.gmra.mxu0 %v7074_v31  ;;  %v1295_v20 = vld [vmem:[%s6903_s29 + $0xf10] sm:$0xff] }
 0x275   : > { %4355 = vmatmul.mubr.bf16.vlgmr.msra.gmra.mxu1 %v7080_v36  ;;  %4366 = vmatpush1.bf16.msra.mxu0 %v5755_v62  ;;  %v1075_v62 = vld [vmem:[%s6903_s29 + $0x830] sm:$0xff] }
 0x276   : > { %4397 = vmatprep.mubr.bf16.mxu0 %v7102_v42  ;;  %4409 = vmatpush1.bf16.msra.mxu1 %v5883_v3  ;;  %v5707_v3 = vcombine.low %v1079_v35, %v1083_v37  ;;  %v5700_v39 = vcombine.high %v1071_v59, %v1075_v62  ;;  %v1159_v37 = vld [vmem:[%s6903_s29 + $0xad0] sm:$0xff] }
 0x277   : > { %4440 = vmatprep.mubr.bf16.mxu1 %v7104_v7  ;;  %4367 = vmatprep.subr.bf16.mxu0 %v5748_v38  ;;  %v5835_v38 = vcombine.low %v1207_v41, %v1211_v45  ;;  %v1163_v41 = vld [vmem:[%s6903_s29 + $0xaf0] sm:$0xff] }
 0x278   : > { %4410 = vmatprep.subr.bf16.mxu1 %v5876_v4  ;;  %v1191_v4 = vld [vmem:[%s6903_s29 + $0xbd0] sm:$0xff] }
 0x279   : > { %4368 = vmatpush1.bf16.msra.mxu0 %v5747_v44  ;;  %v1323_v44 = vld [vmem:[%s6903_s29 + $0xff0] sm:$0xff] }
 0x27a   : > { %4411 = vmatpush1.bf16.msra.mxu1 %v5875_v6  ;;  %4369 = vmatprep.subr.bf16.mxu0 %v5740_v8  ;;  %v5699_v6 = vcombine.low %v1071_v59, %v1075_v62  ;;  %v5827_v8 = vcombine.low %v1199_v0, %v1203_v2  ;;  %v5948_v10 = vcombine.high %v1319_v40, %v1323_v44  ;;  %v1287_v45 = vld [vmem:[%s6903_s29 + $0xed0] sm:$0xff] }
 0x27b   : > { %4412 = vmatprep.subr.bf16.mxu1 %v5868_v9  ;;  %v5820_v9 = vcombine.high %v1191_v4, %v1195_v5  ;;  %v1151_v62 = vld [vmem:[%s6903_s29 + $0xa90] sm:$0xff] }
 0x27c   : > { %v1155_v0 = vld [vmem:[%s6903_s29 + $0xab0] sm:$0xff] }
 0x27d   : > { %4370 = vmatpush1.bf16.msra.mxu0 %v5739_v15  ;;  %v1315_v15 = vld [vmem:[%s6903_s29 + $0xfb0] sm:$0xff] }
 0x27e   : > { %4413 = vmatpush1.bf16.msra.mxu1 %v5867_v16  ;;  %4371 = vmatprep.subr.bf16.mxu0 %v5732_v17  ;;  %v5819_v16 = vcombine.low %v1191_v4, %v1195_v5  ;;  %v5947_v17 = vcombine.low %v1319_v40, %v1323_v44  ;;  %v5940_v18 = vcombine.high %v1311_v14, %v1315_v15  ;;  %v1279_v2 = vld [vmem:[%s6903_s29 + $0xe90] sm:$0xff] }
 0x27f   : > { %4414 = vmatprep.subr.bf16.mxu1 %v5860_v51  ;;  %v5812_v51 = vcombine.high %v1183_v11, %v1187_v12  ;;  %v1143_v5 = vld [vmem:[%s6903_s29 + $0xa50] sm:$0xff] }
 0x280   : > { %v1147_v40 = vld [vmem:[%s6903_s29 + $0xa70] sm:$0xff] }
 0x281   : > { %4372 = vmatpush1.bf16.msra.mxu0 %v5731_v23  ;;  %v1307_v23 = vld [vmem:[%s6903_s29 + $0xf70] sm:$0xff] }
 0x282   : > { %4415 = vmatpush1.bf16.msra.mxu1 %v5859_v24  ;;  %4373 = vmatprep.subr.bf16.mxu0 %v5724_v25  ;;  %v5811_v24 = vcombine.low %v1183_v11, %v1187_v12  ;;  %v5939_v25 = vcombine.low %v1311_v14, %v1315_v15  ;;  %v5932_v34 = vcombine.high %v1303_v22, %v1307_v23  ;;  %v1271_v44 = vld [vmem:[%s6903_s29 + $0xe50] sm:$0xff] }
 0x283   : > { %4416 = vmatprep.subr.bf16.mxu1 %v5852_v13  ;;  %v5804_v13 = vcombine.high %v1175_v19, %v1179_v21  ;;  %v1135_v12 = vld [vmem:[%s6903_s29 + $0xa10] sm:$0xff] }
 0x284   : > { %v1139_v14 = vld [vmem:[%s6903_s29 + $0xa30] sm:$0xff] }
 0x285   : > { %4374 = vmatpush1.bf16.msra.mxu0 %v5723_v29  ;;  %v1299_v29 = vld [vmem:[%s6903_s29 + $0xf30] sm:$0xff] }
 0x286   : > { %4417 = vmatpush1.bf16.msra.mxu1 %v5851_v46  ;;  %4375 = vmatprep.subr.bf16.mxu0 %v5716_v30  ;;  %v5803_v46 = vcombine.low %v1175_v19, %v1179_v21  ;;  %v5931_v30 = vcombine.low %v1303_v22, %v1307_v23  ;;  %v5924_v35 = vcombine.high %v1295_v20, %v1299_v29  ;;  %v1263_v15 = vld [vmem:[%s6903_s29 + $0xe10] sm:$0xff]  ;;  %v872_v21 = vld [vmem:[%s6903_s29 + $0x1d8] sm:$0xff] }
 0x287   : > { %4418 = vmatprep.subr.bf16.mxu1 %v5844_v33  ;;  %v5796_v33 = vcombine.high %v1167_v26, %v1171_v27  ;;  %v876_v22 = vld [vmem:[%s6903_s29 + $0x1f8] sm:$0xff] }
 0x288   : > { %v1000_v23 = vld [vmem:[%s6903_s29 + $0x5d8] sm:$0xff] }
 0x289   : > { %4376 = vmatpush1.bf16.msra.mxu0 %v5715_v54  ;;  %v1291_v54 = vld [vmem:[%s6903_s29 + $0xef0] sm:$0xff] }
 0x28a   : > { %4419 = vmatpush1.bf16.msra.mxu1 %v5843_v56  ;;  %4377 = vmatprep.subr.bf16.mxu0 %v5708_v57  ;;  %v5795_v56 = vcombine.low %v1167_v26, %v1171_v27  ;;  %v5923_v57 = vcombine.low %v1295_v20, %v1299_v29  ;;  %v5916_v59 = vcombine.high %v1287_v45, %v1291_v54  ;;  %v864_v27 = vld [vmem:[%s6903_s29 + $0x198] sm:$0xff] }
 0x28b   : > { %4420 = vmatprep.subr.bf16.mxu1 %v5836_v58  ;;  %v5788_v58 = vcombine.high %v1159_v37, %v1163_v41  ;;  %v868_v20 = vld [vmem:[%s6903_s29 + $0x1b8] sm:$0xff]  ;;  %v5501_v29 = vcombine.low %v872_v21, %v876_v22 }
 0x28d   : > { %4378 = vmatpush1.bf16.msra.mxu0 %v5707_v3  ;;  %v1283_v3 = vld [vmem:[%s6903_s29 + $0xeb0] sm:$0xff] }
 0x28e   : > { %4421 = vmatpush1.bf16.msra.mxu1 %v5835_v38  ;;  %4379 = vmatprep.subr.bf16.mxu0 %v5700_v39  ;;  %v5787_v38 = vcombine.low %v1159_v37, %v1163_v41  ;;  %v5915_v39 = vcombine.low %v1287_v45, %v1291_v54  ;;  %v5908_v4 = vcombine.high %v1279_v2, %v1283_v3  ;;  %v856_v37 = vld [vmem:[%s6903_s29 + $0x158] sm:$0xff] }
 0x28f   : > { %4422 = vmatprep.subr.bf16.mxu1 %v5828_v43  ;;  %v5780_v43 = vcombine.high %v1151_v62, %v1155_v0  ;;  %v860_v41 = vld [vmem:[%s6903_s29 + $0x178] sm:$0xff] }
 0x290   : > { %v984_v54 = vld [vmem:[%s6903_s29 + $0x558] sm:$0xff] }
 0x291   : > { %4380 = vmatpush1.bf16.msra.mxu0 %v5699_v6  ;;  %v1275_v6 = vld [vmem:[%s6903_s29 + $0xe70] sm:$0xff] }
 0x292   : > { %4423 = vmatpush1.bf16.msra.mxu1 %v5827_v8  ;;  %4381 = vmatprep.subr.bf16.mxu0 %v5820_v9  ;;  %v5779_v8 = vcombine.low %v1151_v62, %v1155_v0  ;;  %v5907_v9 = vcombine.low %v1279_v2, %v1283_v3  ;;  %v5900_v11 = vcombine.high %v1271_v44, %v1275_v6  ;;  %v848_v0 = vld [vmem:[%s6903_s29 + $0x118] sm:$0xff] }
 0x293   : > { %4424 = vmatprep.subr.bf16.mxu1 %v5948_v10  ;;  %v5772_v10 = vcombine.high %v1143_v5, %v1147_v40  ;;  %v852_v2 = vld [vmem:[%s6903_s29 + $0x138] sm:$0xff] }
 0x294   : > { %v976_v3 = vld [vmem:[%s6903_s29 + $0x518] sm:$0xff] }
 0x295   : > { %4382 = vmatpush2.bf16.msra.mxu0 %v5819_v16  ;;  %v1267_v16 = vld [vmem:[%s6903_s29 + $0xe30] sm:$0xff] }
 0x296   : > { %4425 = vmatpush2.bf16.msra.mxu1 %v5947_v17  ;;  %4383 = vmatprep.subr.bf16.mxu0 %v5812_v51  ;;  %v5771_v17 = vcombine.low %v1143_v5, %v1147_v40  ;;  %v5899_v51 = vcombine.low %v1271_v44, %v1275_v6  ;;  %v5892_v19 = vcombine.high %v1263_v15, %v1267_v16  ;;  %v844_v5 = vld [vmem:[%s6903_s29 + $0xf8] sm:$0xff] }
 0x297   : > { %4426 = vmatprep.subr.bf16.mxu1 %v5940_v18  ;;  %v5764_v18 = vcombine.high %v1135_v12, %v1139_v14  ;;  %v968_v40 = vld [vmem:[%s6903_s29 + $0x4d8] sm:$0xff]  ;;  %v5477_v6 = vcombine.low %v848_v0, %v852_v2 }
 0x298   : > { %v972_v44 = vld [vmem:[%s6903_s29 + $0x4f8] sm:$0xff] }
 0x299   : > { %4384 = vmatpush2.bf16.msra.mxu0 %v5811_v24  ;;  %v1004_v24 = vld [vmem:[%s6903_s29 + $0x5f8] sm:$0xff] }
 0x29a   : > { %4427 = vmatpush2.bf16.msra.mxu1 %v5939_v25  ;;  %4385 = vmatprep.subr.bf16.mxu0 %v5804_v13  ;;  %v5763_v25 = vcombine.low %v1135_v12, %v1139_v14  ;;  %v5891_v13 = vcombine.low %v1263_v15, %v1267_v16  ;;  %v5630_v26 = vcombine.high %v1000_v23, %v1004_v24  ;;  %v836_v12 = vld [vmem:[%s6903_s29 + $0xb8] sm:$0xff] }
 0x29b   : > { %4428 = vmatprep.subr.bf16.mxu1 %v5932_v34  ;;  %v5502_v34 = vcombine.high %v872_v21, %v876_v22  ;;  %v960_v14 = vld [vmem:[%s6903_s29 + $0x498] sm:$0xff] }
 0x29c   : > { %v964_v15 = vld [vmem:[%s6903_s29 + $0x4b8] sm:$0xff] }
 0x29d   : > { %4386 = vmatpush2.bf16.msra.mxu0 %v5803_v46  ;;  %v992_v46 = vld [vmem:[%s6903_s29 + $0x598] sm:$0xff] }
 0x29e   : > { %4429 = vmatpush2.bf16.msra.mxu1 %v5931_v30  ;;  %4387 = vmatprep.subr.bf16.mxu0 %v5796_v33  ;;  %v996_v30 = vld [vmem:[%s6903_s29 + $0x5b8] sm:$0xff]  ;;  %v5629_v33 = vcombine.low %v1000_v23, %v1004_v24 }
 0x29f   : > { %4430 = vmatprep.subr.bf16.mxu1 %v5924_v35  ;;  %v5494_v35 = vcombine.high %v864_v27, %v868_v20  ;;  %v5622_v45 = vcombine.high %v992_v46, %v996_v30  ;;  %v828_v21 = vld [vmem:[%s6903_s29 + $0x78] sm:$0xff] }
 0x2a0   : > { %v952_v22 = vld [vmem:[%s6903_s29 + $0x458] sm:$0xff] }
 0x2a1   : > { %4388 = vmatpush2.bf16.msra.mxu0 %v5795_v56  ;;  %v988_v56 = vld [vmem:[%s6903_s29 + $0x578] sm:$0xff] }
 0x2a2   : > { %4431 = vmatpush2.bf16.msra.mxu1 %v5923_v57  ;;  %4389 = vmatprep.subr.bf16.mxu0 %v5788_v58  ;;  %v5493_v57 = vcombine.low %v864_v27, %v868_v20  ;;  %v5621_v58 = vcombine.low %v992_v46, %v996_v30  ;;  %v5614_v62 = vcombine.high %v984_v54, %v988_v56  ;;  %v956_v23 = vld [vmem:[%s6903_s29 + $0x478] sm:$0xff] }
 0x2a3   : > { %4432 = vmatprep.subr.bf16.mxu1 %v5916_v59  ;;  %v5486_v59 = vcombine.high %v856_v37, %v860_v41  ;;  %v820_v27 = vld [vmem:[%s6903_s29 + $0x38] sm:$0xff]  ;;  %v5581_v30 = vcombine.low %v952_v22, %v956_v23 }
 0x2a4   : > { %v944_v20 = vld [vmem:[%s6903_s29 + $0x418] sm:$0xff] }
 0x2a5   : > { %4390 = vmatpush2.bf16.msra.mxu0 %v5787_v38  ;;  %v980_v38 = vld [vmem:[%s6903_s29 + $0x538] sm:$0xff] }
 0x2a6   : > { %4433 = vmatpush2.bf16.msra.mxu1 %v5915_v39  ;;  %4391 = vmatprep.subr.bf16.mxu0 %v5780_v43  ;;  %v5485_v39 = vcombine.low %v856_v37, %v860_v41  ;;  %v5478_v43 = vcombine.high %v848_v0, %v852_v2  ;;  %v936_v37 = vld [vmem:[%s6903_s29 + $0x3d8] sm:$0xff] }
 0x2a7   : > { %4434 = vmatprep.subr.bf16.mxu1 %v5908_v4  ;;  %v840_v4 = vld [vmem:[%s6903_s29 + $0xd8] sm:$0xff] }
 0x2a8   : > { %v5469_v16 = vcombine.low %v840_v4, %v844_v5  ;;  %v940_v41 = vld [vmem:[%s6903_s29 + $0x3f8] sm:$0xff] }
 0x2a9   : > { %4392 = vmatpush2.bf16.msra.mxu0 %v5779_v8  ;;  %v5605_v8 = vcombine.low %v976_v3, %v980_v38  ;;  %v932_v0 = vld [vmem:[%s6903_s29 + $0x3b8] sm:$0xff] }
 0x2aa   : > { %4435 = vmatpush2.bf16.msra.mxu1 %v5907_v9  ;;  %4393 = vmatprep.subr.bf16.mxu0 %v5772_v10  ;;  %v5470_v9 = vcombine.high %v840_v4, %v844_v5  ;;  %v5598_v10 = vcombine.high %v968_v40, %v972_v44  ;;  %v1056_v2 = vld [vmem:[%s6903_s29 + $0x798] sm:$0xff] }
 0x2ab   : > { %4436 = vmatprep.subr.bf16.mxu1 %v5900_v11  ;;  %v832_v11 = vld [vmem:[%s6903_s29 + $0x98] sm:$0xff] }
 0x2ac   : > { %v5461_v24 = vcombine.low %v832_v11, %v836_v12  ;;  %v924_v4 = vld [vmem:[%s6903_s29 + $0x378] sm:$0xff] }
 0x2ad   : > { %4394 = vmatpush2.bf16.msra.mxu0 %v5771_v17  ;;  %v5597_v17 = vcombine.low %v968_v40, %v972_v44  ;;  %v1048_v5 = vld [vmem:[%s6903_s29 + $0x758] sm:$0xff] }
 0x2ae   : > { %4437 = vmatpush2.bf16.msra.mxu1 %v5899_v51  ;;  %4395 = vmatprep.subr.bf16.mxu0 %v5764_v18  ;;  %v5462_v51 = vcombine.high %v832_v11, %v836_v12  ;;  %v5590_v18 = vcombine.high %v960_v14, %v964_v15  ;;  %v1052_v40 = vld [vmem:[%s6903_s29 + $0x778] sm:$0xff] }
 0x2af   : > { %4438 = vmatprep.subr.bf16.mxu1 %v5892_v19  ;;  %v824_v19 = vld [vmem:[%s6903_s29 + $0x58] sm:$0xff] }
 0x2b0   : > { %v5453_v46 = vcombine.low %v824_v19, %v828_v21  ;;  %v916_v11 = vld [vmem:[%s6903_s29 + $0x338] sm:$0xff] }
 0x2b1   : > { %4396 = vmatpush2.bf16.msra.mxu0 %v5763_v25  ;;  %v5589_v25 = vcombine.low %v960_v14, %v964_v15  ;;  %v1040_v12 = vld [vmem:[%s6903_s29 + $0x718] sm:$0xff] }
 0x2b2   : > { %4439 = vmatpush2.bf16.msra.mxu1 %v5891_v13  ;;  %4451 = vmatprep.subr.bf16.mxu0 %v5502_v34  ;;  %v5454_v13 = vcombine.high %v824_v19, %v828_v21  ;;  %v5582_v34 = vcombine.high %v952_v22, %v956_v23  ;;  %v1044_v14 = vld [vmem:[%s6903_s29 + $0x738] sm:$0xff] }
 0x2b3   : > { %4494 = vmatprep.subr.bf16.mxu1 %v5630_v26  ;;  %v816_v26 = vld [vmem:[%s6903_s29 + $0x18] sm:$0xff] }
 0x2b4   : > { %4398 = vmatmul.mubr.bf16.vlgmr.msra.gmra.mxu0 %v7176_v53  ;;  %v908_v19 = vld [vmem:[%s6903_s29 + $0x2f8] sm:$0xff] }
 0x2b5   : > { %4441 = vmatmul.mubr.bf16.vlgmr.msra.gmra.mxu1 %v7178_v55  ;;  %4452 = vmatpush1.bf16.msra.mxu0 %v5501_v29  ;;  %v948_v29 = vld [vmem:[%s6903_s29 + $0x438] sm:$0xff] }
 0x2b6   : > { %4483 = vmatprep.mubr.bf16.mxu0 %v7072_v28  ;;  %4495 = vmatpush1.bf16.msra.mxu1 %v5629_v33  ;;  %v5613_v28 = vcombine.low %v984_v54, %v988_v56  ;;  %v5446_v33 = vcombine.high %v816_v26, %v820_v27  ;;  %v1068_v54 = vld [vmem:[%s6903_s29 + $0x7f8] sm:$0xff]  ;;  %v5445_v56 = vcombine.low %v816_v26, %v820_v27 }
 0x2b7   : > { %4526 = vmatprep.mubr.bf16.mxu1 %v7076_v32  ;;  %4453 = vmatprep.subr.bf16.mxu0 %v5494_v35  ;;  %v5606_v32 = vcombine.high %v976_v3, %v980_v38  ;;  %v5574_v35 = vcombine.high %v944_v20, %v948_v29  ;;  %v1060_v3 = vld [vmem:[%s6903_s29 + $0x7b8] sm:$0xff]  ;;  %v5565_v38 = vcombine.low %v936_v37, %v940_v41 }
 0x2b8   : > { %4496 = vmatprep.subr.bf16.mxu1 %v5622_v45  ;;  %v1064_v45 = vld [vmem:[%s6903_s29 + $0x7d8] sm:$0xff] }
 0x2b9   : > { %4454 = vmatpush1.bf16.msra.mxu0 %v5493_v57  ;;  %v5573_v57 = vcombine.low %v944_v20, %v948_v29  ;;  %v1032_v21 = vld [vmem:[%s6903_s29 + $0x6d8] sm:$0xff] }
 0x2ba   : > { %4497 = vmatpush1.bf16.msra.mxu1 %v5621_v58  ;;  %4455 = vmatprep.subr.bf16.mxu0 %v5486_v59  ;;  %v5566_v58 = vcombine.high %v936_v37, %v940_v41  ;;  %v5694_v59 = vcombine.high %v1064_v45, %v1068_v54  ;;  %v1036_v22 = vld [vmem:[%s6903_s29 + $0x6f8] sm:$0xff] }
 0x2bb   : > { %4498 = vmatprep.subr.bf16.mxu1 %v5614_v62  ;;  %v928_v62 = vld [vmem:[%s6903_s29 + $0x398] sm:$0xff] }
 0x2bc   : > { %v5557_v44 = vcombine.low %v928_v62, %v932_v0  ;;  %v900_v26 = vld [vmem:[%s6903_s29 + $0x2b8] sm:$0xff] }
 0x2bd   : > { %4456 = vmatpush1.bf16.msra.mxu0 %v5485_v39  ;;  %v5693_v39 = vcombine.low %v1064_v45, %v1068_v54  ;;  %v1024_v27 = vld [vmem:[%s6903_s29 + $0x698] sm:$0xff] }
 0x2be   : > { %4499 = vmatpush1.bf16.msra.mxu1 %v5613_v28  ;;  %4457 = vmatprep.subr.bf16.mxu0 %v5478_v43  ;;  %v5558_v28 = vcombine.high %v928_v62, %v932_v0  ;;  %v5686_v43 = vcombine.high %v1056_v2, %v1060_v3  ;;  %v1028_v20 = vld [vmem:[%s6903_s29 + $0x6b8] sm:$0xff] }
 0x2bf   : > { %4500 = vmatprep.subr.bf16.mxu1 %v5606_v32  ;;  %v920_v32 = vld [vmem:[%s6903_s29 + $0x358] sm:$0xff] }
 0x2c0   : > { %v5549_v15 = vcombine.low %v920_v32, %v924_v4  ;;  %v892_v37 = vld [vmem:[%s6903_s29 + $0x278] sm:$0xff] }
 0x2c1   : > { %4458 = vmatpush1.bf16.msra.mxu0 %v5477_v6  ;;  %v5685_v6 = vcombine.low %v1056_v2, %v1060_v3  ;;  %v1016_v41 = vld [vmem:[%s6903_s29 + $0x658] sm:$0xff] }
 0x2c2   : > { %4501 = vmatpush1.bf16.msra.mxu1 %v5605_v8  ;;  %4459 = vmatprep.subr.bf16.mxu0 %v5470_v9  ;;  %v5550_v8 = vcombine.high %v920_v32, %v924_v4  ;;  %v5678_v9 = vcombine.high %v1048_v5, %v1052_v40  ;;  %v1020_v45 = vld [vmem:[%s6903_s29 + $0x678] sm:$0xff] }
 0x2c3   : > { %4502 = vmatprep.subr.bf16.mxu1 %v5598_v10  ;;  %v912_v10 = vld [vmem:[%s6903_s29 + $0x318] sm:$0xff] }
 0x2c4   : > { %v5541_v23 = vcombine.low %v912_v10, %v916_v11  ;;  %v884_v62 = vld [vmem:[%s6903_s29 + $0x238] sm:$0xff] }
 0x2c5   : > { %4460 = vmatpush1.bf16.msra.mxu0 %v5469_v16  ;;  %v5677_v16 = vcombine.low %v1048_v5, %v1052_v40  ;;  %v1008_v0 = vld [vmem:[%s6903_s29 + $0x618] sm:$0xff] }
 0x2c6   : > { %4503 = vmatpush1.bf16.msra.mxu1 %v5597_v17  ;;  %4461 = vmatprep.subr.bf16.mxu0 %v5462_v51  ;;  %v5542_v17 = vcombine.high %v912_v10, %v916_v11  ;;  %v5670_v51 = vcombine.high %v1040_v12, %v1044_v14  ;;  %v1012_v2 = vld [vmem:[%s6903_s29 + $0x638] sm:$0xff] }
 0x2c7   : > { %4504 = vmatprep.subr.bf16.mxu1 %v5590_v18  ;;  %v904_v18 = vld [vmem:[%s6903_s29 + $0x2d8] sm:$0xff] }
 0x2c8   : > { %v5533_v29 = vcombine.low %v904_v18, %v908_v19  ;;  %v1132_v32 = vld [vmem:[%s6903_s29 + $0x9f8] sm:$0xff] }
 0x2c9   : > { %4462 = vmatpush1.bf16.msra.mxu0 %v5461_v24  ;;  %v5669_v24 = vcombine.low %v1040_v12, %v1044_v14  ;;  %v1256_v4 = vld [vmem:[%s6903_s29 + $0xdd8] sm:$0xff] }
 0x2ca   : > { %4505 = vmatpush1.bf16.msra.mxu1 %v5589_v25  ;;  %4463 = vmatprep.subr.bf16.mxu0 %v5454_v13  ;;  %v5534_v25 = vcombine.high %v904_v18, %v908_v19  ;;  %v5662_v13 = vcombine.high %v1032_v21, %v1036_v22  ;;  %v1260_v5 = vld [vmem:[%s6903_s29 + $0xdf8] sm:$0xff] }
 0x2cb   : > { %4506 = vmatprep.subr.bf16.mxu1 %v5582_v34  ;;  %v896_v34 = vld [vmem:[%s6903_s29 + $0x298] sm:$0xff] }
 0x2cc   : > { %v5525_v54 = vcombine.low %v896_v34, %v900_v26  ;;  %v1124_v10 = vld [vmem:[%s6903_s29 + $0x9b8] sm:$0xff] }
 0x2cd   : > { %4464 = vmatpush1.bf16.msra.mxu0 %v5453_v46  ;;  %v5661_v46 = vcombine.low %v1032_v21, %v1036_v22  ;;  %v1248_v12 = vld [vmem:[%s6903_s29 + $0xd98] sm:$0xff] }
 0x2ce   : > { %4507 = vmatpush1.bf16.msra.mxu1 %v5581_v30  ;;  %4465 = vmatprep.subr.bf16.mxu0 %v5446_v33  ;;  %v5526_v30 = vcombine.high %v896_v34, %v900_v26  ;;  %v5654_v33 = vcombine.high %v1024_v27, %v1028_v20  ;;  %v1252_v14 = vld [vmem:[%s6903_s29 + $0xdb8] sm:$0xff] }
 0x2cf   : > { %4508 = vmatprep.subr.bf16.mxu1 %v5574_v35  ;;  %v888_v35 = vld [vmem:[%s6903_s29 + $0x258] sm:$0xff]  ;;  %v5878_v18 = vcombine.high %v1248_v12, %v1252_v14 }
 0x2d0   : > { %v5517_v3 = vcombine.low %v888_v35, %v892_v37  ;;  %v1240_v19 = vld [vmem:[%s6903_s29 + $0xd58] sm:$0xff] }
 0x2d1   : > { %4466 = vmatpush1.bf16.msra.mxu0 %v5445_v56  ;;  %v5653_v56 = vcombine.low %v1024_v27, %v1028_v20  ;;  %v1244_v21 = vld [vmem:[%s6903_s29 + $0xd78] sm:$0xff] }
 0x2d2   : > { %4509 = vmatpush1.bf16.msra.mxu1 %v5573_v57  ;;  %4467 = vmatprep.subr.bf16.mxu0 %v5566_v58  ;;  %v5518_v57 = vcombine.high %v888_v35, %v892_v37  ;;  %v5646_v58 = vcombine.high %v1016_v41, %v1020_v45  ;;  %v1232_v34 = vld [vmem:[%s6903_s29 + $0xd18] sm:$0xff] }
 0x2d3   : > { %4510 = vmatprep.subr.bf16.mxu1 %v5694_v59  ;;  %v880_v59 = vld [vmem:[%s6903_s29 + $0x218] sm:$0xff] }
 0x2d4   : > { %v5509_v40 = vcombine.low %v880_v59, %v884_v62  ;;  %v1096_v20 = vld [vmem:[%s6903_s29 + $0x8d8] sm:$0xff] }
 0x2d5   : > { %4468 = vmatpush2.bf16.msra.mxu0 %v5565_v38  ;;  %v5645_v38 = vcombine.low %v1016_v41, %v1020_v45 }
 0x2d6   : > { %4511 = vmatpush2.bf16.msra.mxu1 %v5693_v39  ;;  %4469 = vmatprep.subr.bf16.mxu0 %v5558_v28  ;;  %v5510_v39 = vcombine.high %v880_v59, %v884_v62  ;;  %v5638_v28 = vcombine.high %v1008_v0, %v1012_v2  ;;  %v1220_v59 = vld [vmem:[%s6903_s29 + $0xcb8] sm:$0xff] }
 0x2d7   : > { %4512 = vmatprep.subr.bf16.mxu1 %v5686_v43  ;;  %v1128_v43 = vld [vmem:[%s6903_s29 + $0x9d8] sm:$0xff] }
 0x2d8   : > { %v5757_v11 = vcombine.low %v1128_v43, %v1132_v32 }
 0x2d9   : > { %4470 = vmatpush2.bf16.msra.mxu0 %v5557_v44  ;;  %v5637_v44 = vcombine.low %v1008_v0, %v1012_v2  ;;  %v7544_v0 = vpop.f32.mrf.mxu1 }
 0x2da   : > { %4513 = vmatpush2.bf16.msra.mxu1 %v5685_v6  ;;  %4471 = vmatprep.subr.bf16.mxu0 %v5550_v8  ;;  %v5758_v6 = vcombine.high %v1128_v43, %v1132_v32  ;;  %v5886_v8 = vcombine.high %v1256_v4, %v1260_v5  ;;  %v1208_v32 = vld [vmem:[%s6903_s29 + $0xc58] sm:$0xff] }
 0x2db   : > { %4514 = vmatprep.subr.bf16.mxu1 %v5678_v9  ;;  %v1120_v9 = vld [vmem:[%s6903_s29 + $0x998] sm:$0xff] }
 0x2dc   : > { %v5749_v22 = vcombine.low %v1120_v9, %v1124_v10 }
 0x2dd   : > { %4472 = vmatpush2.bf16.msra.mxu0 %v5549_v15  ;;  %v5885_v15 = vcombine.low %v1256_v4, %v1260_v5  ;;  %v1212_v4 = vld [vmem:[%s6903_s29 + $0xc78] sm:$0xff] }
 0x2de   : > { %4515 = vmatpush2.bf16.msra.mxu1 %v5677_v16  ;;  %4473 = vmatprep.subr.bf16.mxu0 %v5542_v17  ;;  %v5750_v16 = vcombine.high %v1120_v9, %v1124_v10  ;;  %v1112_v17 = vld [vmem:[%s6903_s29 + $0x958] sm:$0xff] }
 0x2df   : > { %4516 = vmatprep.subr.bf16.mxu1 %v5670_v51  ;;  %v1116_v51 = vld [vmem:[%s6903_s29 + $0x978] sm:$0xff] }
 0x2e0   : > { %v5741_v26 = vcombine.low %v1112_v17, %v1116_v51  ;;  %v1072_v9 = vld [vmem:[%s6903_s29 + $0x818] sm:$0xff] }
 0x2e1   : > { %4474 = vmatpush2.bf16.msra.mxu0 %v5541_v23  ;;  %v5877_v23 = vcombine.low %v1248_v12, %v1252_v14  ;;  %v1076_v10 = vld [vmem:[%s6903_s29 + $0x838] sm:$0xff] }
 0x2e2   : > { %4517 = vmatpush2.bf16.msra.mxu1 %v5669_v24  ;;  %4475 = vmatprep.subr.bf16.mxu0 %v5534_v25  ;;  %v5742_v24 = vcombine.high %v1112_v17, %v1116_v51  ;;  %v1104_v25 = vld [vmem:[%s6903_s29 + $0x918] sm:$0xff]  ;;  %v5837_v51 = vcombine.low %v1208_v32, %v1212_v4 }
 0x2e3   : > { %4518 = vmatprep.subr.bf16.mxu1 %v5662_v13  ;;  %v1108_v13 = vld [vmem:[%s6903_s29 + $0x938] sm:$0xff] }
 0x2e4   : > { %v5734_v27 = vcombine.high %v1104_v25, %v1108_v13  ;;  %v5733_v35 = vcombine.low %v1104_v25, %v1108_v13  ;;  %v1200_v12 = vld [vmem:[%s6903_s29 + $0xc18] sm:$0xff] }
 0x2e5   : > { %4476 = vmatpush2.bf16.msra.mxu0 %v5533_v29  ;;  %v1100_v29 = vld [vmem:[%s6903_s29 + $0x8f8] sm:$0xff] }
 0x2e6   : > { %4519 = vmatpush2.bf16.msra.mxu1 %v5661_v46  ;;  %4477 = vmatprep.subr.bf16.mxu0 %v5526_v30  ;;  %v7534_v46 = vpop.f32.mrf.mxu0  ;;  %v1224_v30 = vld [vmem:[%s6903_s29 + $0xcd8] sm:$0xff]  ;;  %v5726_v41 = vcombine.high %v1096_v20, %v1100_v29  ;;  %v5725_v62 = vcombine.low %v1096_v20, %v1100_v29 }
 0x2e7   : > { %4520 = vmatprep.subr.bf16.mxu1 %v5654_v33  ;;  %v1228_v33 = vld [vmem:[%s6903_s29 + $0xcf8] sm:$0xff] }
 0x2e8   : > { %v5854_v45 = vcombine.high %v1224_v30, %v1228_v33  ;;  %v5853_v2 = vcombine.low %v1224_v30, %v1228_v33  ;;  %v1204_v14 = vld [vmem:[%s6903_s29 + $0xc38] sm:$0xff] }
 0x2e9   : > { %4478 = vmatpush2.bf16.msra.mxu0 %v5525_v54  ;;  %v1088_v54 = vld [vmem:[%s6903_s29 + $0x898] sm:$0xff] }
 0x2ea   : > { %4521 = vmatpush2.bf16.msra.mxu1 %v5653_v56  ;;  %4479 = vmatprep.subr.bf16.mxu0 %v5518_v57  ;;  %v1092_v56 = vld [vmem:[%s6903_s29 + $0x8b8] sm:$0xff]  ;;  %v7540_v57 = vpop.f32.mrf.mxu0 }
 0x2eb   : > { %4522 = vmatprep.subr.bf16.mxu1 %v5646_v58  ;;  %v1216_v58 = vld [vmem:[%s6903_s29 + $0xc98] sm:$0xff]  ;;  %v5717_v5 = vcombine.low %v1088_v54, %v1092_v56 }
 0x2ec   : > { %v7548_v43 = vpop.f32.mrf.mxu0  ;;  %v1312_v20 = vld [vmem:[%s6903_s29 + $0xf98] sm:$0xff] }
 0x2ed   : > { %4480 = vmatpush2.bf16.msra.mxu0 %v5517_v3  ;;  %v5718_v3 = vcombine.high %v1088_v54, %v1092_v56  ;;  %v1316_v29 = vld [vmem:[%s6903_s29 + $0xfb8] sm:$0xff] }
 0x2ee   : > { %4523 = vmatpush2.bf16.msra.mxu1 %v5645_v38  ;;  %4481 = vmatprep.subr.bf16.mxu0 %v5510_v39  ;;  %v5846_v38 = vcombine.high %v1216_v58, %v1220_v59  ;;  %v1080_v39 = vld [vmem:[%s6903_s29 + $0x858] sm:$0xff] }
 0x2ef   : > { %4524 = vmatprep.subr.bf16.mxu1 %v5638_v28  ;;  %v1084_v28 = vld [vmem:[%s6903_s29 + $0x878] sm:$0xff] }
 0x2f0   : > { %v1180_v54 = vld [vmem:[%s6903_s29 + $0xb78] sm:$0xff] }
 0x2f1   : > { %4482 = vmatpush2.bf16.msra.mxu0 %v5509_v40  ;;  %v7552_v40 = vpop.f32.mrf.mxu1 }
 0x2f2   : > { %4525 = vmatpush2.bf16.msra.mxu1 %v5637_v44  ;;  %4537 = vmatprep.subr.bf16.mxu0 %v5758_v6  ;;  %v5845_v44 = vcombine.low %v1216_v58, %v1220_v59  ;;  %v5710_v6 = vcombine.high %v1080_v39, %v1084_v28  ;;  %v1304_v58 = vld [vmem:[%s6903_s29 + $0xf58] sm:$0xff] }
 0x2f3   : > { %4580 = vmatprep.subr.bf16.mxu1 %v5886_v8  ;;  %v5838_v8 = vcombine.high %v1208_v32, %v1212_v4  ;;  %v1308_v59 = vld [vmem:[%s6903_s29 + $0xf78] sm:$0xff] }
 0x2f4   : > { %4484 = vmatmul.mubr.bf16.vlgmr.msra.gmra.mxu0 %v7074_v31  ;;  %v5870_v31 = vcombine.high %v1240_v19, %v1244_v21  ;;  %v1172_v32 = vld [vmem:[%s6903_s29 + $0xb38] sm:$0xff] }
 0x2f5   : > { %4527 = vmatmul.mubr.bf16.vlgmr.msra.gmra.mxu1 %v7080_v36  ;;  %4538 = vmatpush1.bf16.msra.mxu0 %v5757_v11  ;;  %v1236_v36 = vld [vmem:[%s6903_s29 + $0xd38] sm:$0xff]  ;;  %v7556_v11 = vpop.f32.mrf.mxu0 }
 0x2f6   : > { %4569 = vmatprep.mubr.bf16.mxu0 %v7102_v42  ;;  %4581 = vmatpush1.bf16.msra.mxu1 %v5885_v15  ;;  %v5869_v42 = vcombine.low %v1240_v19, %v1244_v21  ;;  %v5861_v37 = vcombine.low %v1232_v34, %v1236_v36  ;;  %v5709_v15 = vcombine.low %v1080_v39, %v1084_v28  ;;  %v1192_v21 = vld [vmem:[%s6903_s29 + $0xbd8] sm:$0xff] }
 0x2f7   : > { %4612 = vmatprep.mubr.bf16.mxu1 %v7104_v7  ;;  %4539 = vmatprep.subr.bf16.mxu0 %v5750_v16  ;;  %v5862_v7 = vcombine.high %v1232_v34, %v1236_v36  ;;  %v7560_v16 = vpop.f32.mrf.mxu1  ;;  %v7562_v17 = vpop.f32.mrf.mxu0  ;;  %v5830_v19 = vcombine.high %v1200_v12, %v1204_v14  ;;  %v5829_v34 = vcombine.low %v1200_v12, %v1204_v14  ;;  %v1168_v28 = vld [vmem:[%s6903_s29 + $0xb18] sm:$0xff] }
 0x2f8   : > { %4582 = vmatprep.subr.bf16.mxu1 %v5878_v18  ;;  %v5702_v18 = vcombine.high %v1072_v9, %v1076_v10  ;;  %v5934_v39 = vcombine.high %v1304_v58, %v1308_v59  ;;  %v1160_v14 = vld [vmem:[%s6903_s29 + $0xad8] sm:$0xff] }
 0x2f9   : > { %4540 = vmatpush1.bf16.msra.mxu0 %v5749_v22  ;;  %v1196_v22 = vld [vmem:[%s6903_s29 + $0xbf8] sm:$0xff]  ;;  %v7568_v25 = vpop.f32.mrf.mxu1  ;;  %v7570_v13 = vpop.f32.mrf.mxu0 }
 0x2fa   : > { %4583 = vmatpush1.bf16.msra.mxu1 %v5877_v23  ;;  %4541 = vmatprep.subr.bf16.mxu0 %v5742_v24  ;;  %v1320_v23 = vld [vmem:[%s6903_s29 + $0xfd8] sm:$0xff]  ;;  %v5822_v36 = vcombine.high %v1192_v21, %v1196_v22  ;;  %v5821_v30 = vcombine.low %v1192_v21, %v1196_v22  ;;  %v5797_v22 = vcombine.low %v1168_v28, %v1172_v32 }
 0x2fb   : > { %4584 = vmatprep.subr.bf16.mxu1 %v5870_v31  ;;  %v1324_v24 = vld [vmem:[%s6903_s29 + $0xff8] sm:$0xff]  ;;  %v5701_v31 = vcombine.low %v1072_v9, %v1076_v10  ;;  %v7578_v33 = vpop.f32.mrf.mxu0  ;;  %v5933_v9 = vcombine.low %v1304_v58, %v1308_v59  ;;  %v5798_v10 = vcombine.high %v1168_v28, %v1172_v32 }
 0x2fc   : > { %v1292_v21 = vld [vmem:[%s6903_s29 + $0xef8] sm:$0xff] }
 0x2fd   : > { %4542 = vmatpush1.bf16.msra.mxu0 %v5741_v26  ;;  %v5950_v26 = vcombine.high %v1320_v23, %v1324_v24  ;;  %v1144_v59 = vld [vmem:[%s6903_s29 + $0xa58] sm:$0xff] }
 0x2fe   : > { %4585 = vmatpush1.bf16.msra.mxu1 %v5869_v42  ;;  %4543 = vmatprep.subr.bf16.mxu0 %v5734_v27  ;;  %v1184_v42 = vld [vmem:[%s6903_s29 + $0xb98] sm:$0xff] }
 0x2ff   : > { %4586 = vmatprep.subr.bf16.mxu1 %v5862_v7  ;;  %v1188_v27 = vld [vmem:[%s6903_s29 + $0xbb8] sm:$0xff]  ;;  %v7574_v7 = vpop.f32.mrf.mxu1 }
 0x301   : > { %4544 = vmatpush1.bf16.msra.mxu0 %v5733_v35  ;;  %v5949_v35 = vcombine.low %v1320_v23, %v1324_v24  ;;  %v7582_v56 = vpop.f32.mrf.mxu1 }
 0x302   : > { %4587 = vmatpush1.bf16.msra.mxu1 %v5861_v37  ;;  %4545 = vmatprep.subr.bf16.mxu0 %v5726_v41  ;;  %v5814_v37 = vcombine.high %v1184_v42, %v1188_v27  ;;  %v5942_v41 = vcombine.high %v1312_v20, %v1316_v29 }
 0x303   : > { %4588 = vmatprep.subr.bf16.mxu1 %v5854_v45  ;;  %v1176_v45 = vld [vmem:[%s6903_s29 + $0xb58] sm:$0xff]  ;;  %v7590_v4 = vpop.f32.mrf.mxu1 }
 0x305   : > { %4546 = vmatpush1.bf16.msra.mxu0 %v5725_v62  ;;  %v5813_v62 = vcombine.low %v1184_v42, %v1188_v27  ;;  %v1280_v27 = vld [vmem:[%s6903_s29 + $0xe98] sm:$0xff] }
 0x306   : > { %4589 = vmatpush1.bf16.msra.mxu1 %v5853_v2  ;;  %4547 = vmatprep.subr.bf16.mxu0 %v5718_v3  ;;  %v7586_v2 = vpop.f32.mrf.mxu0  ;;  %v5941_v3 = vcombine.low %v1312_v20, %v1316_v29  ;;  %v1284_v20 = vld [vmem:[%s6903_s29 + $0xeb8] sm:$0xff] }
 0x307   : > { %4590 = vmatprep.subr.bf16.mxu1 %v5846_v38  ;;  %v5806_v38 = vcombine.high %v1176_v45, %v1180_v54  ;;  %v7611_v29 = vld [vmem:[%s6919_s19 + $0x8] sm:$0xff]  ;;  %v5910_v58 = vcombine.high %v1280_v27, %v1284_v20 }
 0x309   : > { %4548 = vmatpush1.bf16.msra.mxu0 %v5717_v5  ;;  %v7592_v5 = vpop.f32.mrf.mxu0 }
 0x30a   : > { %4591 = vmatpush1.bf16.msra.mxu1 %v5845_v44  ;;  %4549 = vmatprep.subr.bf16.mxu0 %v5710_v6  ;;  %v1296_v44 = vld [vmem:[%s6903_s29 + $0xf18] sm:$0xff] }
 0x30b   : > { %4592 = vmatprep.subr.bf16.mxu1 %v5838_v8  ;;  %v1300_v6 = vld [vmem:[%s6903_s29 + $0xf38] sm:$0xff]  ;;  %v5805_v8 = vcombine.low %v1176_v45, %v1180_v54  ;;  %v7621_v54 = vrot.slane %v7611_v29, %v515_v50 }
 0x30c   : > { %v5926_v12 = vcombine.high %v1296_v44, %v1300_v6  ;;  %v5925_v24 = vcombine.low %v1296_v44, %v1300_v6  ;;  %v5909_v44 = vcombine.low %v1280_v27, %v1284_v20  ;;  %v6245_v20 = vld [vmem:[%s6921_s1 + $0xf8] sm:$0xff]  }
 0x30d   : > { %4550 = vmatpush1.bf16.msra.mxu0 %v5709_v15  ;;  %v1164_v15 = vld [vmem:[%s6903_s29 + $0xaf8] sm:$0xff] }
 0x30e   : > { %4593 = vmatpush1.bf16.msra.mxu1 %v5837_v51  ;;  %4551 = vmatprep.subr.bf16.mxu0 %v5702_v18  ;;  %v7598_v51 = vpop.f32.mrf.mxu1  ;;  %v4143_v18 = vpop.f32.mrf.mxu0 }
 0x30f   : > { %4594 = vmatprep.subr.bf16.mxu1 %v5830_v19  ;;  %v1288_v19 = vld [vmem:[%s6903_s29 + $0xed8] sm:$0xff] }
 0x310   : > { %v7602_v23 = vpop.f32.mrf.mxu1  ;;  %v7606_v42 = vpop.f32.mrf.mxu0 }
 0x311   : > { %4552 = vmatpush1.bf16.msra.mxu0 %v5701_v31  ;;  %v5790_v31 = vcombine.high %v1160_v14, %v1164_v15 }
 0x312   : > { %4595 = vmatpush1.bf16.msra.mxu1 %v5829_v34  ;;  %4553 = vmatprep.subr.bf16.mxu0 %v5822_v36  ;;  %v5918_v34 = vcombine.high %v1288_v19, %v1292_v21  ;;  %v1152_v36 = vld [vmem:[%s6903_s29 + $0xa98] sm:$0xff] }
 0x313   : > { %4596 = vmatprep.subr.bf16.mxu1 %v5950_v26  ;;  %v1156_v26 = vld [vmem:[%s6903_s29 + $0xab8] sm:$0xff] }
 0x314   : > { %v5782_v45 = vcombine.high %v1152_v36, %v1156_v26 }
 0x315   : > { %4554 = vmatpush2.bf16.msra.mxu0 %v5821_v30  ;;  %v5789_v30 = vcombine.low %v1160_v14, %v1164_v15  ;;  %v1264_v14 = vld [vmem:[%s6903_s29 + $0xe18] sm:$0xff] }
 0x316   : > { %4597 = vmatpush2.bf16.msra.mxu1 %v5949_v35  ;;  %4555 = vmatprep.subr.bf16.mxu0 %v5814_v37  ;;  %v7616_v35 = vrot.slane %v7611_v29, %v507_v48  ;;  %v4186_v37 = vpop.f32.mrf.mxu1  ;;  %v1272_v48 = vld [vmem:[%s6903_s29 + $0xe58] sm:$0xff] }
 0x317   : > { %4598 = vmatprep.subr.bf16.mxu1 %v5942_v41  ;;  %v5917_v41 = vcombine.low %v1288_v19, %v1292_v21  ;;  %v1268_v15 = vld [vmem:[%s6903_s29 + $0xe38] sm:$0xff] }
 0x318   : > { %v3972_v28 = vadd.f32 %v7540_v57, %v7616_v35  ;;  %v7631_v32 = vpop.f32.mrf.mxu1 }
 0x319   : > { %4556 = vmatpush2.bf16.msra.mxu0 %v5813_v62  ;;  %v1148_v62 = vld [vmem:[%s6903_s29 + $0xa78] sm:$0xff] }
 0x31a   : > { %4599 = vmatpush2.bf16.msra.mxu1 %v5941_v3  ;;  %4557 = vmatprep.subr.bf16.mxu0 %v5806_v38  ;;  %v7625_v3 = vpop.f32.mrf.mxu0  ;;  %v1276_v38 = vld [vmem:[%s6903_s29 + $0xe78] sm:$0xff]  ;;  %v5774_v6 = vcombine.high %v1144_v59, %v1148_v62  ;;  %v5773_v57 = vcombine.low %v1144_v59, %v1148_v62  ;;  %v4015_v19 = vadd.f32 %v7552_v40, %v3972_v28  ;;  %v7641_v21 = vpop.f32.mrf.mxu1  ;;  %v6228_v28 = vld [vmem:[%s6921_s1 + $0x70] sm:$0xff]  }
 0x31b   : > { %4600 = vmatprep.subr.bf16.mxu1 %v5934_v39  ;;  %v5781_v39 = vcombine.low %v1152_v36, %v1156_v26  ;;  %v6229_v36 = vld [vmem:[%s6921_s1 + $0x78] sm:$0xff]  }
 0x31c   : > { %v7633_v50 = vpop.f32.mrf.mxu0  ;;  %v4058_v26 = vadd.f32 %v7570_v13, %v4015_v19  ;;  %v7645_v27 = vpop.f32.mrf.mxu1  ;;  %v6237_v59 = vld [vmem:[%s6921_s1 + $0xb8] sm:$0xff]  }
 0x31d   : > { %4558 = vmatpush2.bf16.msra.mxu0 %v5805_v8  ;;  %v4144_v8 = vadd.f32 %v4143_v18, %v7621_v54 }
 0x31e   : > { %4601 = vmatpush2.bf16.msra.mxu1 %v5933_v9  ;;  %4559 = vmatprep.subr.bf16.mxu0 %v5798_v10  ;;  %v5902_v9 = vcombine.high %v1272_v48, %v1276_v38  ;;  %v1136_v10 = vld [vmem:[%s6903_s29 + $0xa18] sm:$0xff]  ;;  %v4101_v62 = vadd.f32 %v7582_v56, %v4058_v26  ;;  %v4272_v13 = vpop.f32.mrf.mxu1  ;;  %v6236_v56 = vld [vmem:[%s6921_s1 + $0xb0] sm:$0xff]   ;;  %v6235_v26 = vld [vmem:[%s6921_s1 + $0xa8] sm:$0xff]  }
 0x31f   : > { %4602 = vmatprep.subr.bf16.mxu1 %v5926_v12  ;;  %v1140_v12 = vld [vmem:[%s6903_s29 + $0xa38] sm:$0xff] }
 0x320   : > { %v5766_v18 = vcombine.high %v1136_v10, %v1140_v12  ;;  %v5765_v40 = vcombine.low %v1136_v10, %v1140_v12  ;;  %v6085_v10 = vunpack.c.l.bf16 %v6245_v20 }
 0x321   : > { %4560 = vmatpush2.bf16.msra.mxu0 %v5797_v22  ;;  %v4229_v22 = vpop.f32.mrf.mxu0 }
 0x322   : > { %4603 = vmatpush2.bf16.msra.mxu1 %v5925_v24  ;;  %4561 = vmatprep.subr.bf16.mxu0 %v5790_v31  ;;  %v5901_v24 = vcombine.low %v1272_v48, %v1276_v38  ;;  %v4187_v31 = vadd.f32 %v4186_v37, %v4144_v8  ;;  %v6086_v37 = vunpack.c.h.bf16 %v6245_v20  ;;  %v6220_v8 = vld [vmem:[%s6921_s1 + $0x30] sm:$0xff]   ;;  %v6049_v20 = vunpack.c.l.bf16 %v6236_v56 }
 0x323   : > { %4604 = vmatprep.subr.bf16.mxu1 %v5918_v34  ;;  %v5894_v34 = vcombine.high %v1264_v14, %v1268_v15 }
 0x325   : > { %4562 = vmatpush2.bf16.msra.mxu0 %v5789_v30  ;;  %v4230_v30 = vadd.f32 %v4229_v22, %v4187_v31  ;;  %v5986_v22 = vunpack.c.h.bf16 %v6220_v8  ;;  %v6243_v31 = vld [vmem:[%s6921_s1 + $0xe8] sm:$0xff]  }
 0x326   : > { %4605 = vmatpush2.bf16.msra.mxu1 %v5917_v41  ;;  %4563 = vmatprep.subr.bf16.mxu0 %v5782_v45  ;;  %v5893_v41 = vcombine.low %v1264_v14, %v1268_v15  ;;  %v6022_v45 = vunpack.c.h.bf16 %v6229_v36  ;;  %v6053_v15 = vunpack.c.l.bf16 %v6237_v59 }
 0x327   : > { %4606 = vmatprep.subr.bf16.mxu1 %v5910_v58  ;;  %v6221_v58 = vld [vmem:[%s6921_s1 + $0x38] sm:$0xff]   ;;  %v4273_v48 = vadd.f32 %v4272_v13, %v4230_v30  ;;  %v6077_v13 = vunpack.c.l.bf16 %v6243_v31 }
 0x328   : > { %v5990_v38 = vunpack.c.h.bf16 %v6221_v58  ;;  %v5989_v12 = vunpack.c.l.bf16 %v6221_v58  ;;  %v6046_v58 = vunpack.c.h.bf16 %v6235_v26 }
 0x329   : > { %4564 = vmatpush2.bf16.msra.mxu0 %v5781_v39  ;;  %v6054_v39 = vunpack.c.h.bf16 %v6237_v59  ;;  %v4626_v14 = vmax.f32 %v4273_v48, 0.0  ;;  %v6242_v59 = vld [vmem:[%s6921_s1 + $0xe0] sm:$0xff]  }
 0x32a   : > { %4607 = vmatpush2.bf16.msra.mxu1 %v5909_v44  ;;  %4565 = vmatprep.subr.bf16.mxu0 %v5774_v6  ;;  %v6021_v44 = vunpack.c.l.bf16 %v6229_v36  ;;  %v6244_v6 = vld [vmem:[%s6921_s1 + $0xf0] sm:$0xff]  }
 0x32b   : > { %4608 = vmatprep.subr.bf16.mxu1 %v5902_v9  ;;  %v4624_v9 = vmax.f32 %v4101_v62, 0.0  ;;  %v6082_v19 = vunpack.c.h.bf16 %v6244_v6  ;;  %v6081_v36 = vunpack.c.l.bf16 %v6244_v6  ;;  %v6218_v62 = vld [vmem:[%s6921_s1 + $0x20] sm:$0xff]  }
 0x32c   : > { %v5978_v6 = vunpack.c.h.bf16 %v6218_v62 }
 0x32d   : > { %4566 = vmatpush2.bf16.msra.mxu0 %v5773_v57  ;;  %v6018_v57 = vunpack.c.h.bf16 %v6228_v28 }
 0x32e   : > { %4609 = vmatpush2.bf16.msra.mxu1 %v5901_v24  ;;  %4567 = vmatprep.subr.bf16.mxu0 %v5766_v18  ;;  %v6227_v24 = vld [vmem:[%s6921_s1 + $0x68] sm:$0xff]   ;;  %v6017_v18 = vunpack.c.l.bf16 %v6228_v28 }
 0x32f   : > { %4610 = vmatprep.subr.bf16.mxu1 %v5894_v34  ;;  %v6219_v34 = vld [vmem:[%s6921_s1 + $0x28] sm:$0xff]   ;;  %v6014_v30 = vunpack.c.h.bf16 %v6227_v24 }
 0x330   : > { %v5981_v48 = vunpack.c.l.bf16 %v6219_v34 }
 0x331   : > { %4568 = vmatpush2.bf16.msra.mxu0 %v5765_v40  ;;  %v6078_v40 = vunpack.c.h.bf16 %v6243_v31  ;;  %v6224_v31 = vld [vmem:[%s6921_s1 + $0x50] sm:$0xff]  }
 0x332   : > { %4611 = vmatpush2.bf16.msra.mxu1 %v5893_v41  ;;  %6278 = vmatprep.subr.mxu0 %v6022_v45  ;;  %v5982_v41 = vunpack.c.h.bf16 %v6219_v34  ;;  %v6226_v45 = vld [vmem:[%s6921_s1 + $0x60] sm:$0xff]  }
 0x333   : > { %6316 = vmatprep.subr.mxu1 %v6086_v37  ;;  %v6013_v37 = vunpack.c.l.bf16 %v6227_v24  ;;  %v6010_v28 = vunpack.c.h.bf16 %v6226_v45 }
 0x334   : > { %4570 = vmatmul.mubr.bf16.vlgmr.msra.gmra.mxu0 %v7176_v53  ;;  %v6050_v53 = vunpack.c.h.bf16 %v6236_v56  ;;  %v6241_v56 = vld [vmem:[%s6921_s1 + $0xd8] sm:$0xff]  }
 0x335   : > { %4613 = vmatmul.mubr.bf16.vlgmr.msra.gmra.mxu1 %v7178_v55  ;;  %6279 = vmatpush3.msra.mxu0 %v5990_v38  ;;  %v5985_v55 = vunpack.c.l.bf16 %v6220_v8  ;;  %v6234_v38 = vld [vmem:[%s6921_s1 + $0xa0] sm:$0xff]   ;;  %v6225_v8 = vld [vmem:[%s6921_s1 + $0x58] sm:$0xff]  }
 0x336   : > { %4966 = vmatprep.mubr.f32.mxu0 %v4624_v9  ;;  %6317 = vmatpush3.msra.mxu1 %v6054_v39  ;;  %v6045_v39 = vunpack.c.l.bf16 %v6235_v26  ;;  %v1338_v9 = vrot.slane %v7611_v29, %v503_v49  ;;  %v6006_v24 = vunpack.c.h.bf16 %v6225_v8  ;;  %v1346_v49 = vrot.slane %v7611_v29, %v511_v52  ;;  %v6240_v26 = vld [vmem:[%s6921_s1 + $0xd0] sm:$0xff]  }
 0x337   : > { %5041 = vmatprep.mubr.f32.mxu1 %v4626_v14  ;;  %6280 = vmatprep.subr.mxu0 %v6021_v44  ;;  %v6074_v44 = vunpack.c.h.bf16 %v6242_v59  ;;  %v6217_v14 = vld [vmem:[%s6921_s1 + $0x18] sm:$0xff]   ;;  %v6232_v52 = vld [vmem:[%s6921_s1 + $0x90] sm:$0xff]  }
 0x338   : > { %6318 = vmatprep.subr.mxu1 %v6085_v10  ;;  %6281 = vmatpush3.msra.mxu0 %v5989_v12  ;;  %v6042_v10 = vunpack.c.h.bf16 %v6234_v38  ;;  %v6009_v12 = vunpack.c.l.bf16 %v6226_v45  ;;  %v3970_v34 = vadd.f32 %v7534_v46, %v1338_v9  ;;  %v6002_v46 = vunpack.c.h.bf16 %v6224_v31 }
 0x339   : > { %6319 = vmatpush3.msra.mxu1 %v6053_v15  ;;  %6282 = vmatprep.subr.mxu0 %v6018_v57  ;;  %v6073_v15 = vunpack.c.l.bf16 %v6242_v59  ;;  %v5977_v57 = vunpack.c.l.bf16 %v6218_v62  ;;  %v6066_v59 = vunpack.c.h.bf16 %v6240_v26 }
 0x33a   : > { %6320 = vmatprep.subr.mxu1 %v6082_v19  ;;  %6283 = vmatpush3.msra.mxu0 %v5986_v22  ;;  %v6233_v19 = vld [vmem:[%s6921_s1 + $0x98] sm:$0xff]   ;;  %v6041_v22 = vunpack.c.l.bf16 %v6234_v38  ;;  %v6001_v38 = vunpack.c.l.bf16 %v6224_v31 }
 0x33b   : > { %6321 = vmatpush3.msra.mxu1 %v6050_v53  ;;  %6284 = vmatprep.subr.mxu0 %v6017_v18  ;;  %v6070_v53 = vunpack.c.h.bf16 %v6241_v56  ;;  %v5974_v18 = vunpack.c.h.bf16 %v6217_v14  ;;  %v6037_v45 = vunpack.c.l.bf16 %v6233_v19 }
 0x33c   : > { %6322 = vmatprep.subr.mxu1 %v6081_v36  ;;  %6285 = vmatpush3.msra.mxu0 %v5985_v55  ;;  %v6038_v36 = vunpack.c.h.bf16 %v6233_v19  ;;  %v6005_v55 = vunpack.c.l.bf16 %v6225_v8  ;;  %v6231_v8 = vld [vmem:[%s6921_s1 + $0x88] sm:$0xff]  }
 0x33d   : > { %6323 = vmatpush3.msra.mxu1 %v6049_v20  ;;  %6286 = vmatprep.subr.mxu0 %v6014_v30  ;;  %v6216_v20 = vld [vmem:[%s6921_s1 + $0x10] sm:$0xff]   ;;  %v6069_v30 = vunpack.c.l.bf16 %v6241_v56 }
 0x33e   : > { %6324 = vmatprep.subr.mxu1 %v6078_v40  ;;  %6287 = vmatpush3.msra.mxu0 %v5982_v41  ;;  %v5973_v40 = vunpack.c.l.bf16 %v6217_v14  ;;  %v3976_v41 = vadd.f32 %v7556_v11, %v7616_v35  ;;  %v5970_v62 = vunpack.c.h.bf16 %v6216_v20  ;;  %v4148_v11 = vadd.f32 %v7625_v3, %v7621_v54 }
 0x33f   : > { %6325 = vmatpush3.msra.mxu1 %v6046_v58  ;;  %6288 = vmatprep.subr.mxu0 %v6013_v37  ;;  %v4142_v58 = vadd.f32 %v7592_v5, %v1346_v49  ;;  %v7683_v37 = vpop.f32.mrf.mxu0  ;;  %v6034_v35 = vunpack.c.h.bf16 %v6232_v52  ;;  %v3974_v5 = vadd.f32 %v7548_v43, %v1338_v9  ;;  %v6033_v54 = vunpack.c.l.bf16 %v6232_v52 }
 0x340   : > { %6326 = vmatprep.subr.mxu1 %v6077_v13  ;;  %6289 = vmatpush3.msra.mxu0 %v5981_v48  ;;  %v6223_v13 = vld [vmem:[%s6921_s1 + $0x48] sm:$0xff]   ;;  %v4013_v48 = vadd.f32 %v7544_v0, %v3970_v34  ;;  %v4146_v43 = vadd.f32 %v7606_v42, %v1346_v49  ;;  %v4274_v42 = vpop.f32.mrf.mxu1 }
 0x341   : > { %6327 = vmatpush3.msra.mxu1 %v6045_v39  ;;  %6290 = vmatprep.subr.mxu0 %v6010_v28  ;;  %v6239_v39 = vld [vmem:[%s6921_s1 + $0xc8] sm:$0xff]   ;;  %v5998_v3 = vunpack.c.h.bf16 %v6223_v13  ;;  %v4233_v9 = vpop.f32.mrf.mxu0  ;;  %v5997_v19 = vunpack.c.l.bf16 %v6223_v13  ;;  %v4017_v31 = vadd.f32 %v7560_v16, %v3974_v5 }
 0x342   : > { %6328 = vmatprep.subr.mxu1 %v6074_v44  ;;  %6291 = vmatpush3.msra.mxu0 %v5978_v6  ;;  %v6215_v28 = vld [vmem:[%s6921_s1 + $0x8] sm:$0xff]   ;;  %v6065_v44 = vunpack.c.l.bf16 %v6240_v26  ;;  %v5969_v6 = vunpack.c.l.bf16 %v6216_v20  ;;  %v4056_v0 = vadd.f32 %v7562_v17, %v4013_v48  ;;  %v6062_v56 = vunpack.c.h.bf16 %v6239_v39 }
 0x343   : > { %6329 = vmatpush3.msra.mxu1 %v6042_v10  ;;  %6292 = vmatprep.subr.mxu0 %v6009_v12  ;;  %v4019_v10 = vadd.f32 %v7568_v25, %v3976_v41  ;;  %v4185_v12 = vadd.f32 %v7602_v23, %v4142_v58  ;;  %v5966_v14 = vunpack.c.h.bf16 %v6215_v28  ;;  %v4191_v17 = vadd.f32 %v7641_v21, %v4148_v11 }
 0x344   : > { %6330 = vmatprep.subr.mxu1 %v6073_v15  ;;  %6293 = vmatpush3.msra.mxu0 %v5977_v57  ;;  %v6222_v15 = vld [vmem:[%s6921_s1 + $0x40] sm:$0xff]   ;;  %v6030_v57 = vunpack.c.h.bf16 %v6231_v8  ;;  %v6061_v49 = vunpack.c.l.bf16 %v6239_v39  ;;  %v4060_v20 = vadd.f32 %v7578_v33, %v4017_v31 }
 0x345   : > { %6331 = vmatpush3.msra.mxu1 %v6041_v22  ;;  %6294 = vmatprep.subr.mxu0 %v6006_v24  ;;  %v4062_v25 = vadd.f32 %v7586_v2, %v4019_v10  ;;  %v6238_v22 = vld [vmem:[%s6921_s1 + $0xc0] sm:$0xff]   ;;  %v4228_v23 = vadd.f32 %v7633_v50, %v4185_v12  ;;  %v4234_v34 = vadd.f32 %v4233_v9, %v4191_v17  ;;  %v6029_v2 = vunpack.c.l.bf16 %v6231_v8 }
 0x346   : > { %6332 = vmatprep.subr.mxu1 %v6070_v53  ;;  %6295 = vmatpush3.msra.mxu0 %v5974_v18  ;;  %v5960_v24 = vld [vmem:[%s6921_s1] sm:$0xff]   ;;  %v5965_v53 = vunpack.c.l.bf16 %v6215_v28  ;;  %v5994_v21 = vunpack.c.h.bf16 %v6222_v15  ;;  %v6058_v50 = vunpack.c.h.bf16 %v6238_v22  ;;  %v6057_v41 = vunpack.c.l.bf16 %v6238_v22  ;;  %v6269_v28 = vld [vmem:[%s6921_s1 + $0x1b8] sm:$0xff]  }
 0x347   : > { %6333 = vmatpush3.msra.mxu1 %v6038_v36  ;;  %6296 = vmatprep.subr.mxu0 %v6005_v55  ;;  %v6230_v18 = vld [vmem:[%s6921_s1 + $0x80] sm:$0xff]   ;;  %v4099_v36 = vadd.f32 %v7574_v7, %v4056_v0  ;;  %v4189_v55 = vadd.f32 %v7631_v32, %v4146_v43  ;;  %v5962_v26 = vunpack.c.h.bf16 %v5960_v24  ;;  %v4271_v52 = vadd.f32 %v7645_v27, %v4228_v23  ;;  %v4276_v32 = vpop.f32.mrf.mxu1  ;;  %v6259_v43 = vld [vmem:[%s6921_s1 + $0x168] sm:$0xff]  }
 0x348   : > { %6334 = vmatprep.subr.mxu1 %v6069_v30  ;;  %6297 = vmatpush3.msra.mxu0 %v5973_v40  ;;  %v4105_v30 = vadd.f32 %v7598_v51, %v4062_v25  ;;  %v6026_v16 = vunpack.c.h.bf16 %v6230_v18  ;;  %v5993_v40 = vunpack.c.l.bf16 %v6222_v15  ;;  %v4277_v58 = vadd.f32 %v4276_v32, %v4234_v34  ;;  %v6253_v51 = vld [vmem:[%s6921_s1 + $0x138] sm:$0xff]   ;;  %v6251_v15 = vld [vmem:[%s6921_s1 + $0x128] sm:$0xff]   ;;  %v6250_v31 = vld [vmem:[%s6921_s1 + $0x120] sm:$0xff]  }
 0x349   : > { %6335 = vmatpush3.msra.mxu1 %v6037_v45  ;;  %6298 = vmatprep.subr.mxu0 %v6002_v46  ;;  %v4232_v7 = vadd.f32 %v7683_v37, %v4189_v55  ;;  %v5961_v45 = vunpack.c.l.bf16 %v5960_v24  ;;  %v6261_v46 = vld [vmem:[%s6921_s1 + $0x178] sm:$0xff]   ;;  %v6025_v33 = vunpack.c.l.bf16 %v6230_v18  ;;  %v4103_v27 = vadd.f32 %v7590_v4, %v4060_v20  ;;  %v6252_v4 = vld [vmem:[%s6921_s1 + $0x130] sm:$0xff]   ;;  %v6275_v24 = vld [vmem:[%s6921_s1 + $0x1e8] sm:$0xff]  }
 0x34a   : > { %6336 = vmatprep.subr.mxu1 %v6066_v59  ;;  %6299 = vmatpush3.msra.mxu0 %v5970_v62  ;;  %v6277_v59 = vld [vmem:[%s6921_s1 + $0x1f8] sm:$0xff]   ;;  %v4623_v62 = vmax.f32 %v4099_v36, 0.0  ;;  %v4632_v37 = vmax.f32 %v4105_v30, 0.0  ;;  %v6150_v13 = vunpack.c.h.bf16 %v6261_v46  ;;  %v4625_v48 = vmax.f32 %v4271_v52, 0.0 }
 0x34b   : > { %6337 = vmatpush3.msra.mxu1 %v6034_v35  ;;  %6300 = vmatprep.subr.mxu0 %v6001_v38  ;;  %v4275_v11 = vadd.f32 %v4274_v42, %v4232_v7  ;;  %v6118_v35 = vunpack.c.h.bf16 %v6253_v51  ;;  %v6260_v38 = vld [vmem:[%s6921_s1 + $0x170] sm:$0xff]   ;;  %v6214_v39 = vunpack.c.h.bf16 %v6277_v59  ;;  %v4634_v5 = vmax.f32 %v4277_v58, 0.0  ;;  %v6258_v42 = vld [vmem:[%s6921_s1 + $0x160] sm:$0xff]   ;;  %v6257_v20 = vld [vmem:[%s6921_s1 + $0x158] sm:$0xff]  }
 0x34c   : > { %6338 = vmatprep.subr.mxu1 %v6065_v44  ;;  %6301 = vmatpush3.msra.mxu0 %v5969_v6  ;;  %v6149_v44 = vunpack.c.l.bf16 %v6261_v46  ;;  %v6117_v6 = vunpack.c.l.bf16 %v6253_v51  ;;  %v4631_v8 = vmax.f32 %v4103_v27, 0.0  ;;  %v6146_v10 = vunpack.c.h.bf16 %v6260_v38  ;;  %v6249_v52 = vld [vmem:[%s6921_s1 + $0x118] sm:$0xff]   ;;  %v6256_v51 = vld [vmem:[%s6921_s1 + $0x150] sm:$0xff]  }
 0x34d   : > { %6339 = vmatpush3.msra.mxu1 %v6033_v54  ;;  %6302 = vmatprep.subr.mxu0 %v5998_v3  ;;  %v6182_v0 = vunpack.c.h.bf16 %v6269_v28  ;;  %v6276_v54 = vld [vmem:[%s6921_s1 + $0x1f0] sm:$0xff]   ;;  %v4633_v3 = vmax.f32 %v4275_v11, 0.0  ;;  %v6114_v12 = vunpack.c.h.bf16 %v6252_v4  ;;  %v6213_v9 = vunpack.c.l.bf16 %v6277_v59  ;;  %v6273_v58 = vld [vmem:[%s6921_s1 + $0x1d8] sm:$0xff]  }
 0x34e   : > { %6340 = vmatprep.subr.mxu1 %v6062_v56  ;;  %6303 = vmatpush3.msra.mxu0 %v5966_v14  ;;  %v6268_v56 = vld [vmem:[%s6921_s1 + $0x1b0] sm:$0xff]   ;;  %v6145_v14 = vunpack.c.l.bf16 %v6260_v38  ;;  %v6181_v25 = vunpack.c.l.bf16 %v6269_v28  ;;  %v6113_v17 = vunpack.c.l.bf16 %v6252_v4  ;;  %v6110_v23 = vunpack.c.h.bf16 %v6251_v15  ;;  %v4356_v38 = vpop.f32.mrf.mxu1  ;;  %v6255_v4 = vld [vmem:[%s6921_s1 + $0x148] sm:$0xff]  }
 0x34f   : > { %6341 = vmatpush3.msra.mxu1 %v6030_v57  ;;  %6304 = vmatprep.subr.mxu0 %v5997_v19  ;;  %v6210_v57 = vunpack.c.h.bf16 %v6276_v54  ;;  %v6142_v19 = vunpack.c.h.bf16 %v6259_v43  ;;  %v6178_v22 = vunpack.c.h.bf16 %v6268_v56  ;;  %v6141_v18 = vunpack.c.l.bf16 %v6259_v43 }
 0x350   : > { %6342 = vmatprep.subr.mxu1 %v6061_v49  ;;  %6305 = vmatpush3.msra.mxu0 %v5965_v53  ;;  %v6209_v49 = vunpack.c.l.bf16 %v6276_v54  ;;  %v6267_v53 = vld [vmem:[%s6921_s1 + $0x1a8] sm:$0xff]   ;;  %v6177_v34 = vunpack.c.l.bf16 %v6268_v56  ;;  %v6138_v36 = vunpack.c.h.bf16 %v6258_v42  ;;  %v6205_v30 = vunpack.c.l.bf16 %v6275_v24  ;;  %v4358_v56 = vpop.f32.mrf.mxu1 }
 0x351   : > { %6343 = vmatpush3.msra.mxu1 %v6029_v2  ;;  %6306 = vmatprep.subr.mxu0 %v5994_v21  ;;  %v6109_v2 = vunpack.c.l.bf16 %v6251_v15  ;;  %v6206_v21 = vunpack.c.h.bf16 %v6275_v24  ;;  %v6174_v55 = vunpack.c.h.bf16 %v6267_v53  ;;  %v6173_v7 = vunpack.c.l.bf16 %v6267_v53 }
 0x352   : > { %6344 = vmatprep.subr.mxu1 %v6058_v50  ;;  %6307 = vmatpush3.msra.mxu0 %v5962_v26  ;;  %v6274_v50 = vld [vmem:[%s6921_s1 + $0x1e0] sm:$0xff]   ;;  %v6106_v26 = vunpack.c.h.bf16 %v6250_v31  ;;  %v6105_v32 = vunpack.c.l.bf16 %v6250_v31  ;;  %v6133_v27 = vunpack.c.l.bf16 %v6257_v20  ;;  %v6101_v11 = vunpack.c.l.bf16 %v6249_v52 }
 0x353   : > { %6345 = vmatpush3.msra.mxu1 %v6026_v16  ;;  %6308 = vmatprep.subr.mxu0 %v5993_v40  ;;  %v6266_v16 = vld [vmem:[%s6921_s1 + $0x1a0] sm:$0xff]   ;;  %v6137_v40 = vunpack.c.l.bf16 %v6258_v42  ;;  %v6201_v59 = vunpack.c.l.bf16 %v6274_v50  ;;  %v4360_v42 = vpop.f32.mrf.mxu1 }
 0x354   : > { %6346 = vmatprep.subr.mxu1 %v6057_v41  ;;  %6309 = vmatpush3.msra.mxu0 %v5961_v45  ;;  %v6202_v41 = vunpack.c.h.bf16 %v6274_v50  ;;  %v6134_v45 = vunpack.c.h.bf16 %v6257_v20  ;;  %v6170_v46 = vunpack.c.h.bf16 %v6266_v16 }
 0x355   : > { %6347 = vmatpush3.msra.mxu1 %v6025_v33  ;;  %4967 = vmatmul.mubr.f32.vlgmr.msra.gmra.mxu0 %v4623_v62  ;;  %v6102_v33 = vunpack.c.h.bf16 %v6249_v52  ;;  %v6265_v62 = vld [vmem:[%s6921_s1 + $0x198] sm:$0xff]   ;;  %v6271_v52 = vld [vmem:[%s6921_s1 + $0x1c8] sm:$0xff]  }
 0x356   : > { %5042 = vmatmul.mubr.f32.vlgmr.msra.gmra.mxu1 %v4625_v48  ;;  %4971 = vmatprep.mubr.f32.mxu0 %v4632_v37  ;;  %v6248_v37 = vld [vmem:[%s6921_s1 + $0x110] sm:$0xff]   ;;  %v4313_v48 = vpop.f32.mrf.mxu0  ;;  %v6166_v28 = vunpack.c.h.bf16 %v6265_v62  ;;  %v6165_v54 = vunpack.c.l.bf16 %v6265_v62  ;;  %v6189_v62 = vunpack.c.l.bf16 %v6271_v52 }
 0x357   : > { %5046 = vmatprep.mubr.f32.mxu1 %v4634_v5  ;;  %6354 = vmatprep.subr.mxu0 %v6150_v13  ;;  %v6169_v13 = vunpack.c.l.bf16 %v6266_v16  ;;  %v7735_v5 = vld [vmem:[%s6921_s1 + $0x1d0] sm:$0xff]  }
 0x358   : > { %6355 = vmatpush3.msra.mxu0 %v6118_v35  ;;  %6392 = vmatprep.subr.mxu1 %v6214_v39  ;;  %v6198_v35 = vunpack.c.h.bf16 %v6273_v58  ;;  %v6130_v39 = vunpack.c.h.bf16 %v6256_v51  ;;  %v6194_v43 = vunpack.c.h.bf16 %v7735_v5  ;;  %v6193_v50 = vunpack.c.l.bf16 %v7735_v5 }
 0x359   : > { %4972 = vmatmul.mubr.f32.gmra.mxu0 %v4631_v8  ;;  %6356 = vmatprep.subr.mxu0 %v6149_v44  ;;  %v6098_v44 = vunpack.c.h.bf16 %v6248_v37  ;;  %v7739_v8 = vld [vmem:[%s6921_s1 + $0x190] sm:$0xff]  }
 0x35a   : > { %5047 = vmatmul.mubr.f32.gmra.mxu1 %v4633_v3  ;;  %6357 = vmatpush3.msra.mxu0 %v6117_v6  ;;  %v6197_v6 = vunpack.c.l.bf16 %v6273_v58  ;;  %v4315_v3 = vpop.f32.mrf.mxu0  ;;  %v6162_v15 = vunpack.c.h.bf16 %v7739_v8 }
 0x35b   : > { %6358 = vmatprep.subr.mxu0 %v6146_v10  ;;  %6393 = vmatpush3.msra.mxu1 %v6182_v0  ;;  %v6129_v10 = vunpack.c.l.bf16 %v6256_v51  ;;  %v6247_v0 = vld [vmem:[%s6921_s1 + $0x108] sm:$0xff]  }
 0x35c   : > { %6359 = vmatpush3.msra.mxu0 %v6114_v12  ;;  %6394 = vmatprep.subr.mxu1 %v6213_v9  ;;  %v6097_v12 = vunpack.c.l.bf16 %v6248_v37  ;;  %v1354_v9 = vrot.slane %v7611_v29, %v519_v60  ;;  %v4317_v24 = vpop.f32.mrf.mxu0  ;;  %v6093_v60 = vunpack.c.l.bf16 %v6247_v0 }
 0x35d   : > { %6360 = vmatprep.subr.mxu0 %v6145_v14  ;;  %6395 = vmatpush3.msra.mxu1 %v6181_v25  ;;  %v6126_v14 = vunpack.c.h.bf16 %v6255_v4  ;;  %v6094_v25 = vunpack.c.h.bf16 %v6247_v0 }
 0x35e   : > { %6361 = vmatpush3.msra.mxu0 %v6113_v17  ;;  %6396 = vmatprep.subr.mxu1 %v6210_v57  ;;  %v6254_v17 = vld [vmem:[%s6921_s1 + $0x140] sm:$0xff]   ;;  %v1358_v57 = vrot.slane %v7611_v29, %v523_v61 }
 0x35f   : > { %6362 = vmatprep.subr.mxu0 %v6142_v19  ;;  %6397 = vmatpush3.msra.mxu1 %v6178_v22  ;;  %v6125_v19 = vunpack.c.l.bf16 %v6255_v4  ;;  %v6246_v22 = vld [vmem:[%s6921_s1 + $0x100] sm:$0xff]   ;;  %v6121_v31 = vunpack.c.l.bf16 %v6254_v17 }
 0x360   : > { %6363 = vmatpush3.msra.mxu0 %v6110_v23  ;;  %6398 = vmatprep.subr.mxu1 %v6209_v49  ;;  %v4314_v23 = vadd.f32 %v4313_v48, %v1354_v9  ;;  %v6122_v49 = vunpack.c.h.bf16 %v6254_v17  ;;  %v6090_v53 = vunpack.c.h.bf16 %v6246_v22  ;;  %v6089_v61 = vunpack.c.l.bf16 %v6246_v22 }
 0x361   : > { %6364 = vmatprep.subr.mxu0 %v6141_v18  ;;  %6399 = vmatpush3.msra.mxu1 %v6177_v34  ;;  %v4316_v18 = vadd.f32 %v4315_v3, %v1358_v57  ;;  %v4319_v34 = vpop.f32.mrf.mxu0  ;;  %v1366_v17 = vrot.slane %v7611_v29, %v531_v63 }
 0x362   : > { %6365 = vmatpush3.msra.mxu0 %v6109_v2  ;;  %6400 = vmatprep.subr.mxu1 %v6206_v21  ;;  %v4357_v2 = vadd.f32 %v4356_v38, %v4314_v23  ;;  %v4318_v21 = vadd.f32 %v4317_v24, %v1354_v9  ;;  %v4320_v20 = vadd.f32 %v4319_v34, %v1358_v57 }
 0x363   : > { %6366 = vmatprep.subr.mxu0 %v6138_v36  ;;  %6401 = vmatpush3.msra.mxu1 %v6174_v55  ;;  %v4362_v36 = vpop.f32.mrf.mxu1 }
 0x364   : > { %6367 = vmatpush3.msra.mxu0 %v6106_v26  ;;  %6402 = vmatprep.subr.mxu1 %v6205_v30  ;;  %v4359_v26 = vadd.f32 %v4358_v56, %v4316_v18 }
 0x365   : > { %6368 = vmatprep.subr.mxu0 %v6137_v40  ;;  %6403 = vmatpush3.msra.mxu1 %v6173_v7  ;;  %v6161_v40 = vunpack.c.l.bf16 %v7739_v8 }
 0x366   : > { %6369 = vmatpush3.msra.mxu0 %v6105_v32  ;;  %6404 = vmatprep.subr.mxu1 %v6202_v41  ;;  %v6190_v32 = vunpack.c.h.bf16 %v6271_v52  ;;  %v6263_v41 = vld [vmem:[%s6921_s1 + $0x188] sm:$0xff]  }
 0x367   : > { %6370 = vmatprep.subr.mxu0 %v6134_v45  ;;  %6405 = vmatpush3.msra.mxu1 %v6170_v46  ;;  %v4361_v45 = vadd.f32 %v4360_v42, %v4318_v21 }
 0x368   : > { %6371 = vmatpush3.msra.mxu0 %v6102_v33  ;;  %6406 = vmatprep.subr.mxu1 %v6201_v59  ;;  %v6158_v33 = vunpack.c.h.bf16 %v6263_v41 }
 0x369   : > { %6372 = vmatprep.subr.mxu0 %v6133_v27  ;;  %6407 = vmatpush3.msra.mxu1 %v6169_v13  ;;  %v4363_v27 = vadd.f32 %v4362_v36, %v4320_v20 }
 0x36a   : > { %6373 = vmatpush3.msra.mxu0 %v6101_v11  ;;  %6408 = vmatprep.subr.mxu1 %v6198_v35  ;;  %v6157_v11 = vunpack.c.l.bf16 %v6263_v41  ;;  %v6270_v35 = vld [vmem:[%s6921_s1 + $0x1c0] sm:$0xff]  }
 0x36b   : > { %6374 = vmatprep.subr.mxu0 %v6130_v39  ;;  %6409 = vmatpush3.msra.mxu1 %v6166_v28  ;;  %v6186_v39 = vunpack.c.h.bf16 %v6270_v35  ;;  %v6262_v28 = vld [vmem:[%s6921_s1 + $0x180] sm:$0xff]   ;;  %v6185_v0 = vunpack.c.l.bf16 %v6270_v35 }
 0x36c   : > { %6375 = vmatpush3.msra.mxu0 %v6098_v44  ;;  %6410 = vmatprep.subr.mxu1 %v6197_v6  ;;  %v6154_v4 = vunpack.c.h.bf16 %v6262_v28  ;;  %v6153_v3 = vunpack.c.l.bf16 %v6262_v28 }
 0x36d   : > { %6376 = vmatprep.subr.mxu0 %v6129_v10  ;;  %6411 = vmatpush3.msra.mxu1 %v6165_v54 }
 0x36e   : > { %6377 = vmatpush3.msra.mxu0 %v6097_v12  ;;  %6412 = vmatprep.subr.mxu1 %v6194_v43 }
 0x36f   : > { %6378 = vmatprep.subr.mxu0 %v6126_v14  ;;  %6413 = vmatpush3.msra.mxu1 %v6162_v15  ;;  %v1362_v15 = vrot.slane %v7611_v29, %v527_v1 }
 0x370   : > { %6379 = vmatpush3.msra.mxu0 %v6094_v25  ;;  %6414 = vmatprep.subr.mxu1 %v6193_v50 }
 0x371   : > { %6380 = vmatprep.subr.mxu0 %v6125_v19  ;;  %6415 = vmatpush3.msra.mxu1 %v6161_v40 }
 0x372   : > { %6381 = vmatpush3.msra.mxu0 %v6093_v60  ;;  %6416 = vmatprep.subr.mxu1 %v6190_v32 }
 0x373   : > { %6382 = vmatprep.subr.mxu0 %v6122_v49  ;;  %6417 = vmatpush3.msra.mxu1 %v6158_v33 }
 0x374   : > { %v4399_v55 = vpop.f32.mrf.mxu0  ;;  %6383 = vmatpush3.msra.mxu0 %v6090_v53  ;;  %6418 = vmatprep.subr.mxu1 %v6189_v62 }
 0x375   : > { %v4400_v30 = vadd.f32 %v4399_v55, %v4357_v2  ;;  %v4442_v16 = vpop.f32.mrf.mxu1  ;;  %6384 = vmatprep.subr.mxu0 %v6121_v31  ;;  %6419 = vmatpush3.msra.mxu1 %v6157_v11 }
 0x376   : > { %v4401_v7 = vpop.f32.mrf.mxu0  ;;  %6385 = vmatpush3.msra.mxu0 %v6089_v61  ;;  %6420 = vmatprep.subr.mxu1 %v6186_v39 }
 0x377   : > { %v4402_v46 = vadd.f32 %v4401_v7, %v4359_v26  ;;  %v4444_v58 = vpop.f32.mrf.mxu1  ;;  %v4443_v51 = vadd.f32 %v4442_v16, %v4400_v30  ;;  %6421 = vmatpush3.msra.mxu1 %v6154_v4 }
 0x378   : > { %v4403_v59 = vpop.f32.mrf.mxu0  ;;  %6422 = vmatprep.subr.mxu1 %v6185_v0 }
 0x379   : > { %v4445_v37 = vadd.f32 %v4444_v58, %v4402_v46  ;;  %v4404_v13 = vadd.f32 %v4403_v59, %v4361_v45  ;;  %v4446_v48 = vpop.f32.mrf.mxu1  ;;  %v4627_v6 = vmax.f32 %v4443_v51, 0.0  ;;  %6423 = vmatpush3.msra.mxu1 %v6153_v3 }
 0x37a   : > { %v4405_v38 = vpop.f32.mrf.mxu0 }
 0x37b   : > { %v4628_v5 = vmax.f32 %v4445_v37, 0.0  ;;  %v4406_v44 = vadd.f32 %v4405_v38, %v4363_v27  ;;  %v4447_v8 = vadd.f32 %v4446_v48, %v4404_v13  ;;  %v4448_v10 = vpop.f32.mrf.mxu1  ;;  %v5951_v48 = vld [vmem:[%s6919_s19 + $0x10] ss:$0 sm:$0xff] }
 0x37d   : > { %v4449_v54 = vadd.f32 %v4448_v10, %v4406_v44  ;;  %5116 = vmatprep.mubr.f32.mxu0 %v4628_v5  ;;  %v4635_v43 = vmax.f32 %v4447_v8, 0.0 }
 0x37e   : > { %5117 = vmatmul.mubr.f32.vlgmr.msra.gmra.mxu0 %v4627_v6 }
 0x37f   : > { %v4636_v12 = vmax.f32 %v4449_v54, 0.0 }
 0x381   : > { %5121 = vmatprep.mubr.f32.mxu0 %v4636_v12 }
 0x382   : > { %5122 = vmatmul.mubr.f32.gmra.mxu0 %v4635_v43 }
 0x3b4   : > { %v4485_v9 = vpop.f32.mrf.mxu0 }
 0x3b5   : > { %v4528_v56 = vpop.f32.mrf.mxu1  ;;  %v4486_v19 = vadd.f32 %v4485_v9, %v1362_v15 }
 0x3b6   : > { %v4487_v14 = vpop.f32.mrf.mxu0 }
 0x3b7   : > { %v4530_v25 = vpop.f32.mrf.mxu1  ;;  %v4488_v24 = vadd.f32 %v4487_v14, %v1366_v17  ;;  %v4529_v23 = vadd.f32 %v4528_v56, %v4486_v19 }
 0x3b8   : > { %v4489_v57 = vpop.f32.mrf.mxu0 }
 0x3b9   : > { %v4532_v22 = vpop.f32.mrf.mxu1  ;;  %v4490_v42 = vadd.f32 %v4489_v57, %v1362_v15  ;;  %v4531_v18 = vadd.f32 %v4530_v25, %v4488_v24 }
 0x3ba   : > { %v4491_v60 = vpop.f32.mrf.mxu0 }
 0x3bb   : > { %v4534_v49 = vpop.f32.mrf.mxu1  ;;  %v4492_v31 = vadd.f32 %v4491_v60, %v1366_v17  ;;  %v4533_v1 = vadd.f32 %v4532_v22, %v4490_v42 }
 0x3bd   : > { %v4535_v63 = vadd.f32 %v4534_v49, %v4492_v31 }
 0x3f4   : > { %v4571_v53 = vpop.f32.mrf.mxu0 }
 0x3f5   : > { %v4572_v34 = vadd.f32 %v4571_v53, %v4529_v23  ;;  %v4614_v61 = vpop.f32.mrf.mxu1 }
 0x3f6   : > { %v4573_v2 = vpop.f32.mrf.mxu0 }
 0x3f7   : > { %v4574_v21 = vadd.f32 %v4573_v2, %v4531_v18  ;;  %v4616_v36 = vpop.f32.mrf.mxu1  ;;  %v4615_v47 = vadd.f32 %v4614_v61, %v4572_v34 }
 0x3f8   : > { %v4575_v55 = vpop.f32.mrf.mxu0 }
 0x3f9   : > { %v4617_v29 = vadd.f32 %v4616_v36, %v4574_v21  ;;  %v4576_v50 = vadd.f32 %v4575_v55, %v4533_v1  ;;  %v4618_v26 = vpop.f32.mrf.mxu1  ;;  %v4629_v40 = vmax.f32 %v4615_v47, 0.0 }
 0x3fa   : > { %v4577_v20 = vpop.f32.mrf.mxu0 }
 0x3fb   : > { %v4630_v30 = vmax.f32 %v4617_v29, 0.0  ;;  %v4578_v16 = vadd.f32 %v4577_v20, %v4535_v63  ;;  %v4619_v52 = vadd.f32 %v4618_v26, %v4576_v50  ;;  %v4620_v7 = vpop.f32.mrf.mxu1 }
 0x3fd   : > { %v4621_v32 = vadd.f32 %v4620_v7, %v4578_v16  ;;  %5191 = vmatprep.mubr.f32.mxu1 %v4630_v30  ;;  %v4637_v45 = vmax.f32 %v4619_v52, 0.0 }
 0x3fe   : > { %5192 = vmatmul.mubr.f32.vlgmr.msra.gmra.mxu1 %v4629_v40 }
 0x3ff   : > { %v4638_v41 = vmax.f32 %v4621_v32, 0.0 }
 0x401   : > { %5196 = vmatprep.mubr.f32.mxu1 %v4638_v41 }
 0x402   : > { %5197 = vmatmul.mubr.f32.gmra.mxu1 %v4637_v45 }
 0x415   : > { %v6310_v46 = vpop.f32.mrf.mxu0 }
 0x416   : > { %v6348_v51 = vpop.f32.mrf.mxu1 }
 0x417   : > { %v6311_v58 = vpop.f32.mrf.mxu0 }
 0x418   : > { %v6349_v27 = vpop.f32.mrf.mxu1  ;;  %v6312_v13 = vadd.f32 %v6311_v58, %v6310_v46 }
 0x419   : > { %v6313_v33 = vpop.f32.mrf.mxu0  ;;  %v6350_v5 = vadd.f32 %v6349_v27, %v6348_v51 }
 0x41a   : > { %v6351_v11 = vpop.f32.mrf.mxu1  ;;  %v4969_v38 = vadd.f32 %v6312_v13, %v5951_v48 }
 0x41b   : > { %v6314_v59 = vpop.f32.mrf.mxu0 }
 0x41c   : > { %v6315_v39 = vadd.f32 %v6314_v59, %v6313_v33  ;;  %v6352_v28 = vpop.f32.mrf.mxu1  ;;  %v5044_v8 = vadd.f32 %v6350_v5, %v4969_v38 }
 0x41d   : > { %v6353_v54 = vadd.f32 %v6352_v28, %v6351_v11 }
 0x41e   : > { %v4974_v10 = vadd.f32 %v6315_v39, %v5951_v48 }
 0x420   : > { %v5049_v56 = vadd.f32 %v6353_v54, %v4974_v10 }
 0x43e   : > { %v6386_v62 = vpop.f32.mrf.mxu0 }
 0x440   : > { %v6387_v37 = vpop.f32.mrf.mxu0 }
 0x441   : > { %v6388_v44 = vadd.f32 %v6387_v37, %v6386_v62 }
 0x442   : > { %v6389_v35 = vpop.f32.mrf.mxu0 }
 0x443   : > { %v5119_v3 = vadd.f32 %v6388_v44, %v5044_v8 }
 0x444   : > { %v6390_v4 = vpop.f32.mrf.mxu0 }
 0x445   : > { %v6391_v12 = vadd.f32 %v6390_v4, %v6389_v35 }
 0x447   : > { %v5124_v25 = vadd.f32 %v6391_v12, %v5049_v56 }
 0x4be   : > { %v6424_v6 = vpop.f32.mrf.mxu1 }
 0x4c0   : > { %v6425_v0 = vpop.f32.mrf.mxu1 }
 0x4c1   : > { %v6426_v43 = vadd.f32 %v6425_v0, %v6424_v6 }
 0x4c2   : > { %v6427_v9 = vpop.f32.mrf.mxu1 }
 0x4c3   : > { %v5194_v14 = vadd.f32 %v6426_v43, %v5119_v3 }
 0x4c4   : > { %v6428_v15 = vpop.f32.mrf.mxu1 }
 0x4c5   : > { %6527 = vtanh.f32 %v5194_v14  ;;  %v6429_v17 = vadd.f32 %v6428_v15, %v6427_v9 }
 0x4c7   : > { %v5199_v57 = vadd.f32 %v6429_v17, %v5124_v25 }
 0x4c9   : > { %6529 = vtanh.f32 %v5199_v57 }
 0x4d2   : > { %v6528_v19 = vpop.eup %6527 }
 0x4d3   : > { %5204 = vst [vmem:[%s6914_s28] sm:$0xff] %v6528_v19 }
 0x4d6   : > { %v6530_v22 = vpop.eup %6529 }
 0x4d7   : > { %5205 = vst [vmem:[%s6914_s28 + $0x8] sm:$0xff] %v6530_v22 }
 0x4d8 PF: > { %s34_s18 = sadd.s32 1, %s6709_s18   ;;  %s7807_s30 = sld [smem:[#allocation18_spill]] }
 0x4d9   : > { %p31_p12 = scmp.ge.s32.totalorder %s34_s18, 4   ;;  %s7808_s1 = smov %s6693_s14 }
 0x4da   : > { %s7809_s14 = smov %s6697_s15  ;;  %s7810_s15 = smov %s6831_s24 }
 0x4db   : > { %s7811_s16 = smov %s6705_s17  ;;  %33 = sbr.rel (!%p31_p12) target bundleno = 32 (0x20), region = 249 }
 0x4de   : > { %s7812_s17 = smov %s7807_s30 }
 0x4e0   :  { %5236 = vsyncpa [#allocation8], 1 }
 0x4e1   :  { %5238 = vsyncpa [#allocation8 + $0x1], 1 }
 0x4e2   :  { %5239 = vsyncpa [#allocation10], 1 }
 0x4e3   :  { %5241 = vsyncpa [#allocation10 + $0x1], 1 }
 0x4e4   :  { %5242 = vsyncmov [#allocation3] }
 0x4e7   :  { %s5243_s29 = vpop.sfrf %5242 }
 0x4e8   :  { %p5954_p13 = scmp.ne.s32.totalorder %s5243_s29, 0 }
 0x4ea   :  { %5247 = shalt.err (%p5954_p13)  }

</bundles_post_ra>
